<compile_context>
chip_gen: v7x
topology: tpu7x:2x2x1
jax: 0.10.0
libtpu: 0.0.40
codegen_flags: <defaults>
</compile_context>

<pallas_src>
import jax
import jax.numpy as jnp
from jax.experimental import pallas as pl
from jax.experimental.pallas import tpu as pltpu

_LEAK = 0.2  # LeakyReLU negative slope


# ----------------------------------------------------------------------------
# Fused per-image kernel: conv1 GEMM -> s2d scratch -> conv2 taps -> fused FC.
# ----------------------------------------------------------------------------
def _disc_kernel(p1_ref, w1_ref, b1_ref, w2_ref, b2_ref, wfc_ref, o_ref, s2_ref):
    """One grid step = one image.

    p1_ref : (1, 1024, 48) bf16  conv1 im2col patches, rows ordered (oh%2, ow%2, oh//2, ow//2)
    w1_ref : (48, 64)      bf16  conv1 weight, rows (ki,kj,cin), cols cout
    b1_ref : (1, 64)       f32
    w2_ref : (16, 64, 128) bf16  conv2 per-tap weights, tap = ki*4+kj, (cin, cout)
    b2_ref : (1, 128)      f32
    wfc_ref: (256, 128)    f32   fc weight, rows = oh*16+ow, lanes = c (PyTorch (C,H,W) repacked)
    o_ref  : (1, 1, 128)   f32   per-image fc partial row (final 128-lane reduce + bias in JAX)
    s2_ref : (2, 2, 17, 17, 64) f32 scratch; s2[p, q, A, B, c] = h1_pad[2A+p, 2B+q, c]
    """
    # Zero the padded space-to-depth scratch.  Only the 1-px border strictly needs
    # it, but a full VMEM zero-fill is trivial and megacore-safe.
    s2_ref[...] = jnp.zeros(s2_ref.shape, s2_ref.dtype)

    # ---- conv1: 4 chunks of 256 rows (one (oh%2, ow%2) parity group each).
    #      GEMM + bias + LeakyReLU, written straight into the s2d scratch
    #      (contiguous (16,16,64) stores, keeps <=20 vregs live per chunk).
    b1 = b1_ref[...]                                              # (1, 64) f32
    for oh_par in range(2):
        for ow_par in range(2):
            g = oh_par * 2 + ow_par
            lhs = p1_ref[0, g * 256:(g + 1) * 256, :]             # (256, 48) bf16
            acc = jnp.dot(lhs, w1_ref[...], preferred_element_type=jnp.float32)
            acc = acc + b1
            acc = jnp.maximum(acc, _LEAK * acc)                   # LeakyReLU(0.2)
            # group (oh_par, ow_par) -> plane (p, q) = (1-oh_par, 1-ow_par),
            # interior offset (a0, b0) = (oh_par, ow_par)
            p, q = 1 - oh_par, 1 - ow_par
            a0, b0 = oh_par, ow_par
            s2_ref[p, q, a0:a0 + 16, b0:b0 + 16, :] = acc.reshape(16, 16, 64)

    # ---- conv2: 16 shifted tap matmuls from the s2d scratch, + bias + LeakyReLU,
    #      with the Linear(32768, 1) reduction fused per 128-row chunk.
    b2 = b2_ref[...]                                              # (1, 128) f32
    partial = jnp.zeros((1, 128), jnp.float32)
    for rc in range(2):                                           # oh in [rc*8, rc*8+8)
        acc = jnp.zeros((128, 128), jnp.float32)
        for ki in range(4):
            ia, ip = ki // 2, ki % 2
            a = ia + rc * 8
            for kj in range(4):
                jb, jq = kj // 2, kj % 2
                slab = s2_ref[ip, jq, a:a + 8, jb:jb + 16, :]     # (8, 16, 64) f32
                slab = slab.reshape(128, 64).astype(jnp.bfloat16)
                acc = acc + jnp.dot(slab, w2_ref[ki * 4 + kj],
                                    preferred_element_type=jnp.float32)
        acc = acc + b2
        acc = jnp.maximum(acc, _LEAK * acc)                       # LeakyReLU(0.2)
        wfc = wfc_ref[rc * 128:(rc + 1) * 128, :]                 # (128, 128) f32
        partial = partial + jnp.sum(acc * wfc, axis=0, keepdims=True)

    o_ref[...] = partial.reshape(1, 1, 128)


def discriminator_pallas(p1, w1_mat, b1, w2_taps, b2, wfc):
    """p1: (N, 1024, 48) bf16 -> per-image fc partial rows (N, 1, 128) f32."""
    n = p1.shape[0]
    return pl.pallas_call(
        _disc_kernel,
        out_shape=jax.ShapeDtypeStruct((n, 1, 128), jnp.float32),
        grid=(n,),
        in_specs=[
            pl.BlockSpec((1,) + p1.shape[1:], lambda i: (i, 0, 0)),
            pl.BlockSpec(w1_mat.shape, lambda i: (0, 0)),
            pl.BlockSpec(b1.shape, lambda i: (0, 0)),
            pl.BlockSpec(w2_taps.shape, lambda i: (0, 0, 0)),
            pl.BlockSpec(b2.shape, lambda i: (0, 0)),
            pl.BlockSpec(wfc.shape, lambda i: (0, 0)),
        ],
        out_specs=pl.BlockSpec((1, 1, 128), lambda i: (i, 0, 0)),
        scratch_shapes=[pltpu.VMEM((2, 2, 17, 17, 64), jnp.float32)],
        compiler_params=pltpu.CompilerParams(
            dimension_semantics=("parallel",),
            vmem_limit_bytes=32 * 1024 * 1024),
    )(p1, w1_mat, b1, w2_taps, b2, wfc)


# ----------------------------------------------------------------------------
# Host-side glue (plain JAX, pure data rearrangement).
# ----------------------------------------------------------------------------
def conv1_patches_grouped(x_nhwc, kh=4, kw=4, stride=2, pad=1):
    """im2col for conv1.  Rows ordered (oh%2, ow%2, oh//2, ow//2) so the kernel can
    write the conv1 result straight into its padded space-to-depth scratch with
    contiguous stores.  Columns ordered (ki, kj, cin) to match w1_mat."""
    n, h, w, c = x_nhwc.shape
    x = jnp.pad(x_nhwc, ((0, 0), (pad, pad), (pad, pad), (0, 0)))
    oh = (h + 2 * pad - kh) // stride + 1
    ow = (w + 2 * pad - kw) // stride + 1
    cols = []
    for i in range(kh):
        for j in range(kw):
            cols.append(x[:, i:i + stride * oh:stride, j:j + stride * ow:stride, :])
    p = jnp.stack(cols, axis=3).reshape(n, oh, ow, kh * kw * c)       # (N, 32, 32, 48)
    p = p.reshape(n, oh // 2, 2, ow // 2, 2, kh * kw * c)
    p = jnp.transpose(p, (0, 2, 4, 1, 3, 5))                          # (n, ohp, owp, oh2, ow2, K)
    return p.reshape(n, oh * ow, kh * kw * c)                         # (N, 1024, 48)


def init_params(key):
    k1, k2, k3, k4, k5, k6 = jax.random.split(key, 6)
    return {
        "w1": jax.random.normal(k1, (64, 3, 4, 4), jnp.float32) * 0.05,    # OIHW
        "b1": jax.random.normal(k4, (64,), jnp.float32) * 0.05,
        "w2": jax.random.normal(k2, (128, 64, 4, 4), jnp.float32) * 0.05,  # OIHW
        "b2": jax.random.normal(k5, (128,), jnp.float32) * 0.05,
        # fc weight column, rows in PyTorch .view(N,-1) order, i.e. (C,H,W) flatten
        "w_fc": jax.random.normal(k3, (32768, 1), jnp.float32) * 0.01,
        "b_fc": jax.random.normal(k6, (1,), jnp.float32) * 0.1,
    }


def prepare_params(params):
    """One-time host-side repack into the layouts the fused kernel expects."""
    w1, w2, w_fc = params["w1"], params["w2"], params["w_fc"]
    co1, ci1, kh1, kw1 = w1.shape
    co2, ci2, kh2, kw2 = w2.shape
    # conv1 GEMM weight: (kh*kw*cin, cout), row order (ki, kj, cin) matches im2col cols
    w1_mat = jnp.transpose(w1, (2, 3, 1, 0)).reshape(kh1 * kw1 * ci1, co1)
    # conv2 per-tap weights: w2_taps[ki*4+kj] = (cin, cout)
    w2_taps = jnp.transpose(w2, (2, 3, 1, 0)).reshape(kh2 * kw2, ci2, co2)
    # fc column repacked from PyTorch (C,H,W) flatten order to lane-dense (H*W, C) rows
    wfc_hwc = jnp.transpose(w_fc.reshape(co2, 16, 16), (1, 2, 0)).reshape(256, co2)
    return {
        "w1_mat": w1_mat.astype(jnp.bfloat16),
        "b1": params["b1"].reshape(1, co1).astype(jnp.float32),
        "w2_taps": w2_taps.astype(jnp.bfloat16),
        "b2": params["b2"].reshape(1, co2).astype(jnp.float32),
        "w_fc_hwc": wfc_hwc.astype(jnp.float32),
        "b_fc": params["b_fc"].astype(jnp.float32),
    }


def discriminator_forward(x_nchw, prep):
    """NCHW image batch in, (N, 1) logits out — matches the PyTorch module."""
    x = jnp.transpose(x_nchw, (0, 2, 3, 1)).astype(jnp.bfloat16)      # NHWC bf16
    p1 = conv1_patches_grouped(x)                                     # (N, 1024, 48) bf16
    partial = discriminator_pallas(p1, prep["w1_mat"], prep["b1"],
                                   prep["w2_taps"], prep["b2"],
                                   prep["w_fc_hwc"])                  # (N, 1, 128) f32
    # tiny tail: 128-lane reduce of the per-image partial + fc bias
    return jnp.sum(partial[:, 0, :], axis=-1, keepdims=True) + prep["b_fc"]


# ----------------------------------------------------------------------------
# Pure-f32 XLA reference (same math as the PyTorch module).
# ----------------------------------------------------------------------------
def discriminator_ref(x_nchw, params):
    hi = jax.lax.Precision.HIGHEST
    h = jax.lax.conv_general_dilated(
        x_nchw.astype(jnp.float32), params["w1"], window_strides=(2, 2),
        padding=((1, 1), (1, 1)), dimension_numbers=("NCHW", "OIHW", "NCHW"),
        precision=hi)
    h = h + params["b1"][None, :, None, None]
    h = jnp.maximum(h, _LEAK * h)
    h = jax.lax.conv_general_dilated(
        h, params["w2"], window_strides=(2, 2),
        padding=((1, 1), (1, 1)), dimension_numbers=("NCHW", "OIHW", "NCHW"),
        precision=hi)
    h = h + params["b2"][None, :, None, None]
    h = jnp.maximum(h, _LEAK * h)
    feats = h.reshape(h.shape[0], -1)                                 # (N, 32768), (C,H,W) order
    return jnp.dot(feats, params["w_fc"], precision=hi) + params["b_fc"]


if __name__ == "__main__":
    import numpy as np

    key = jax.random.PRNGKey(0)
    kx, kp = jax.random.split(key)
    params = init_params(kp)
    prep = prepare_params(params)

    # batch=2, 3x64x64 NCHW images -> encoder output 128x16x16 = 32768 features
    x = jax.random.normal(kx, (2, 3, 64, 64), jnp.float32)

    out = jax.jit(discriminator_forward)(x, prep)
    out = jax.block_until_ready(out)
    assert out.shape == (2, 1) and out.dtype == jnp.float32

    # reference check (kernel runs patches / MXU operands in bf16 -> loose tolerance)
    ref = discriminator_ref(x, params)
    assert np.allclose(np.asarray(out), np.asarray(ref), rtol=0.05, atol=0.1), (out, ref)
    print("KERNEL_OK")
</pallas_src>

<mosaic_0001>
module attributes {stable_mosaic.version = 11 : i64} {
  func.func @_disc_kernel(%arg0: i32, %arg1: memref<1x1024x48xbf16, #tpu.memory_space<vmem>>, %arg2: memref<48x64xbf16, #tpu.memory_space<vmem>>, %arg3: memref<1x64xf32, #tpu.memory_space<vmem>>, %arg4: memref<16x64x128xbf16, #tpu.memory_space<vmem>>, %arg5: memref<1x128xf32, #tpu.memory_space<vmem>>, %arg6: memref<256x128xf32, #tpu.memory_space<vmem>>, %arg7: memref<1x1x128xf32, #tpu.memory_space<vmem>>, %arg8: memref<2x2x17x17x64xf32, #tpu.memory_space<vmem>>) attributes {dimension_semantics = [#tpu.dimension_semantics<parallel>], iteration_bounds = array<i64: 2>, scalar_prefetch = 0 : i64, scratch_operands = 1 : i64, tpu.core_type = #tpu.core_type<tc>, window_params = [{transform_indices = @transform_0, window_bounds = array<i64: 1, 1024, 48>}, {pipeline_mode = #tpu.pipeline_mode<synchronous>, transform_indices = @transform_1, window_bounds = array<i64: 48, 64>}, {pipeline_mode = #tpu.pipeline_mode<synchronous>, transform_indices = @transform_2, window_bounds = array<i64: 1, 64>}, {pipeline_mode = #tpu.pipeline_mode<synchronous>, transform_indices = @transform_3, window_bounds = array<i64: 16, 64, 128>}, {pipeline_mode = #tpu.pipeline_mode<synchronous>, transform_indices = @transform_4, window_bounds = array<i64: 1, 128>}, {pipeline_mode = #tpu.pipeline_mode<synchronous>, transform_indices = @transform_5, window_bounds = array<i64: 256, 128>}, {transform_indices = @transform_6, window_bounds = array<i64: 1, 1, 128>}]} {
    %cst = arith.constant 0.000000e+00 : f32
    %0 = vector.broadcast %cst : f32 to vector<2x2x17x17x64xf32>
    %c0 = arith.constant 0 : index
    %c0_0 = arith.constant 0 : index
    %c0_1 = arith.constant 0 : index
    %c0_2 = arith.constant 0 : index
    %c0_3 = arith.constant 0 : index
    %1 = vector.load %arg8[%c0, %c0_0, %c0_1, %c0_2, %c0_3] : memref<2x2x17x17x64xf32, #tpu.memory_space<vmem>>, vector<2x2x17x17x64xf32>
    tpu.vector_store %arg8[%c0, %c0_0, %c0_1, %c0_2, %c0_3], %0 {strides = array<i32>} : memref<2x2x17x17x64xf32, #tpu.memory_space<vmem>>, vector<2x2x17x17x64xf32>,
    %c0_4 = arith.constant 0 : index
    %c0_5 = arith.constant 0 : index
    %2 = vector.load %arg3[%c0_4, %c0_5] : memref<1x64xf32, #tpu.memory_space<vmem>>, vector<1x64xf32>
    %c0_6 = arith.constant 0 : index
    %c0_7 = arith.constant 0 : index
    %c0_8 = arith.constant 0 : index
    %3 = vector.load %arg1[%c0_6, %c0_7, %c0_8] : memref<1x1024x48xbf16, #tpu.memory_space<vmem>>, vector<1x256x48xbf16>
    %4 = vector.shape_cast %3 : vector<1x256x48xbf16> to vector<256x48xbf16>
    %c0_9 = arith.constant 0 : index
    %c0_10 = arith.constant 0 : index
    %5 = vector.load %arg2[%c0_9, %c0_10] : memref<48x64xbf16, #tpu.memory_space<vmem>>, vector<48x64xbf16>
    %cst_11 = arith.constant dense<0.000000e+00> : vector<256x64xf32>
    %6 = tpu.matmul %4, %5, %cst_11 {dimension_numbers = #tpu.dot_dimension_numbers<[1], [0], [0], [1], [0, 0, 1, 1], [], []>} : vector<256x48xbf16>, vector<48x64xbf16>, vector<256x64xf32> -> vector<256x64xf32>
    %7 = vector.broadcast %2 : vector<1x64xf32> to vector<256x64xf32>
    %8 = arith.addf %6, %7 : vector<256x64xf32>
    %cst_12 = arith.constant 2.000000e-01 : f32
    %9 = vector.broadcast %cst_12 : f32 to vector<256x64xf32>
    %10 = arith.mulf %9, %8 : vector<256x64xf32>
    %11 = arith.maximumf %8, %10 : vector<256x64xf32>
    %12 = vector.shape_cast %11 : vector<256x64xf32> to vector<16x16x64xf32>
    %c1 = arith.constant 1 : index
    %c1_13 = arith.constant 1 : index
    %c0_14 = arith.constant 0 : index
    %c0_15 = arith.constant 0 : index
    %c0_16 = arith.constant 0 : index
    %13 = vector.load %arg8[%c1, %c1_13, %c0_14, %c0_15, %c0_16] : memref<2x2x17x17x64xf32, #tpu.memory_space<vmem>>, vector<1x1x16x16x64xf32>
    %14 = vector.shape_cast %13 : vector<1x1x16x16x64xf32> to vector<16x16x64xf32>
    %15 = vector.shape_cast %12 : vector<16x16x64xf32> to vector<1x1x16x16x64xf32>
    tpu.vector_store %arg8[%c1, %c1_13, %c0_14, %c0_15, %c0_16], %15 {strides = array<i32>} : memref<2x2x17x17x64xf32, #tpu.memory_space<vmem>>, vector<1x1x16x16x64xf32>,
    %c0_17 = arith.constant 0 : index
    %c256 = arith.constant 256 : index
    %c0_18 = arith.constant 0 : index
    %16 = vector.load %arg1[%c0_17, %c256, %c0_18] : memref<1x1024x48xbf16, #tpu.memory_space<vmem>>, vector<1x256x48xbf16>
    %17 = vector.shape_cast %16 : vector<1x256x48xbf16> to vector<256x48xbf16>
    %c0_19 = arith.constant 0 : index
    %c0_20 = arith.constant 0 : index
    %18 = vector.load %arg2[%c0_19, %c0_20] : memref<48x64xbf16, #tpu.memory_space<vmem>>, vector<48x64xbf16>
    %cst_21 = arith.constant dense<0.000000e+00> : vector<256x64xf32>
    %19 = tpu.matmul %17, %18, %cst_21 {dimension_numbers = #tpu.dot_dimension_numbers<[1], [0], [0], [1], [0, 0, 1, 1], [], []>} : vector<256x48xbf16>, vector<48x64xbf16>, vector<256x64xf32> -> vector<256x64xf32>
    %20 = vector.broadcast %2 : vector<1x64xf32> to vector<256x64xf32>
    %21 = arith.addf %19, %20 : vector<256x64xf32>
    %cst_22 = arith.constant 2.000000e-01 : f32
    %22 = vector.broadcast %cst_22 : f32 to vector<256x64xf32>
    %23 = arith.mulf %22, %21 : vector<256x64xf32>
    %24 = arith.maximumf %21, %23 : vector<256x64xf32>
    %25 = vector.shape_cast %24 : vector<256x64xf32> to vector<16x16x64xf32>
    %c1_23 = arith.constant 1 : index
    %c0_24 = arith.constant 0 : index
    %c0_25 = arith.constant 0 : index
    %c1_26 = arith.constant 1 : index
    %c0_27 = arith.constant 0 : index
    %26 = vector.load %arg8[%c1_23, %c0_24, %c0_25, %c1_26, %c0_27] : memref<2x2x17x17x64xf32, #tpu.memory_space<vmem>>, vector<1x1x16x16x64xf32>
    %27 = vector.shape_cast %26 : vector<1x1x16x16x64xf32> to vector<16x16x64xf32>
    %28 = vector.shape_cast %25 : vector<16x16x64xf32> to vector<1x1x16x16x64xf32>
    tpu.vector_store %arg8[%c1_23, %c0_24, %c0_25, %c1_26, %c0_27], %28 {strides = array<i32>} : memref<2x2x17x17x64xf32, #tpu.memory_space<vmem>>, vector<1x1x16x16x64xf32>,
    %c0_28 = arith.constant 0 : index
    %c512 = arith.constant 512 : index
    %c0_29 = arith.constant 0 : index
    %29 = vector.load %arg1[%c0_28, %c512, %c0_29] : memref<1x1024x48xbf16, #tpu.memory_space<vmem>>, vector<1x256x48xbf16>
    %30 = vector.shape_cast %29 : vector<1x256x48xbf16> to vector<256x48xbf16>
    %c0_30 = arith.constant 0 : index
    %c0_31 = arith.constant 0 : index
    %31 = vector.load %arg2[%c0_30, %c0_31] : memref<48x64xbf16, #tpu.memory_space<vmem>>, vector<48x64xbf16>
    %cst_32 = arith.constant dense<0.000000e+00> : vector<256x64xf32>
    %32 = tpu.matmul %30, %31, %cst_32 {dimension_numbers = #tpu.dot_dimension_numbers<[1], [0], [0], [1], [0, 0, 1, 1], [], []>} : vector<256x48xbf16>, vector<48x64xbf16>, vector<256x64xf32> -> vector<256x64xf32>
    %33 = vector.broadcast %2 : vector<1x64xf32> to vector<256x64xf32>
    %34 = arith.addf %32, %33 : vector<256x64xf32>
    %cst_33 = arith.constant 2.000000e-01 : f32
    %35 = vector.broadcast %cst_33 : f32 to vector<256x64xf32>
    %36 = arith.mulf %35, %34 : vector<256x64xf32>
    %37 = arith.maximumf %34, %36 : vector<256x64xf32>
    %38 = vector.shape_cast %37 : vector<256x64xf32> to vector<16x16x64xf32>
    %c0_34 = arith.constant 0 : index
    %c1_35 = arith.constant 1 : index
    %c1_36 = arith.constant 1 : index
    %c0_37 = arith.constant 0 : index
    %c0_38 = arith.constant 0 : index
    %39 = vector.load %arg8[%c0_34, %c1_35, %c1_36, %c0_37, %c0_38] : memref<2x2x17x17x64xf32, #tpu.memory_space<vmem>>, vector<1x1x16x16x64xf32>
    %40 = vector.shape_cast %39 : vector<1x1x16x16x64xf32> to vector<16x16x64xf32>
    %41 = vector.shape_cast %38 : vector<16x16x64xf32> to vector<1x1x16x16x64xf32>
    tpu.vector_store %arg8[%c0_34, %c1_35, %c1_36, %c0_37, %c0_38], %41 {strides = array<i32>} : memref<2x2x17x17x64xf32, #tpu.memory_space<vmem>>, vector<1x1x16x16x64xf32>,
    %c0_39 = arith.constant 0 : index
    %c768 = arith.constant 768 : index
    %c0_40 = arith.constant 0 : index
    %42 = vector.load %arg1[%c0_39, %c768, %c0_40] : memref<1x1024x48xbf16, #tpu.memory_space<vmem>>, vector<1x256x48xbf16>
    %43 = vector.shape_cast %42 : vector<1x256x48xbf16> to vector<256x48xbf16>
    %c0_41 = arith.constant 0 : index
    %c0_42 = arith.constant 0 : index
    %44 = vector.load %arg2[%c0_41, %c0_42] : memref<48x64xbf16, #tpu.memory_space<vmem>>, vector<48x64xbf16>
    %cst_43 = arith.constant dense<0.000000e+00> : vector<256x64xf32>
    %45 = tpu.matmul %43, %44, %cst_43 {dimension_numbers = #tpu.dot_dimension_numbers<[1], [0], [0], [1], [0, 0, 1, 1], [], []>} : vector<256x48xbf16>, vector<48x64xbf16>, vector<256x64xf32> -> vector<256x64xf32>
    %46 = vector.broadcast %2 : vector<1x64xf32> to vector<256x64xf32>
    %47 = arith.addf %45, %46 : vector<256x64xf32>
    %cst_44 = arith.constant 2.000000e-01 : f32
    %48 = vector.broadcast %cst_44 : f32 to vector<256x64xf32>
    %49 = arith.mulf %48, %47 : vector<256x64xf32>
    %50 = arith.maximumf %47, %49 : vector<256x64xf32>
    %51 = vector.shape_cast %50 : vector<256x64xf32> to vector<16x16x64xf32>
    %c0_45 = arith.constant 0 : index
    %c0_46 = arith.constant 0 : index
    %c1_47 = arith.constant 1 : index
    %c1_48 = arith.constant 1 : index
    %c0_49 = arith.constant 0 : index
    %52 = vector.load %arg8[%c0_45, %c0_46, %c1_47, %c1_48, %c0_49] : memref<2x2x17x17x64xf32, #tpu.memory_space<vmem>>, vector<1x1x16x16x64xf32>
    %53 = vector.shape_cast %52 : vector<1x1x16x16x64xf32> to vector<16x16x64xf32>
    %54 = vector.shape_cast %51 : vector<16x16x64xf32> to vector<1x1x16x16x64xf32>
    tpu.vector_store %arg8[%c0_45, %c0_46, %c1_47, %c1_48, %c0_49], %54 {strides = array<i32>} : memref<2x2x17x17x64xf32, #tpu.memory_space<vmem>>, vector<1x1x16x16x64xf32>,
    %c0_50 = arith.constant 0 : index
    %c0_51 = arith.constant 0 : index
    %55 = vector.load %arg5[%c0_50, %c0_51] : memref<1x128xf32, #tpu.memory_space<vmem>>, vector<1x128xf32>
    %cst_52 = arith.constant 0.000000e+00 : f32
    %56 = vector.broadcast %cst_52 : f32 to vector<1x128xf32>
    %cst_53 = arith.constant 0.000000e+00 : f32
    %57 = vector.broadcast %cst_53 : f32 to vector<128x128xf32>
    %c0_54 = arith.constant 0 : index
    %c0_55 = arith.constant 0 : index
    %c0_56 = arith.constant 0 : index
    %c0_57 = arith.constant 0 : index
    %c0_58 = arith.constant 0 : index
    %58 = vector.load %arg8[%c0_54, %c0_55, %c0_56, %c0_57, %c0_58] : memref<2x2x17x17x64xf32, #tpu.memory_space<vmem>>, vector<1x1x8x16x64xf32>
    %59 = vector.shape_cast %58 : vector<1x1x8x16x64xf32> to vector<8x16x64xf32>
    %60 = vector.shape_cast %59 : vector<8x16x64xf32> to vector<128x64xf32>
    %61 = arith.truncf %60 : vector<128x64xf32> to vector<128x64xbf16>
    %c0_59 = arith.constant 0 : index
    %c0_60 = arith.constant 0 : index
    %c0_61 = arith.constant 0 : index
    %62 = vector.load %arg4[%c0_59, %c0_60, %c0_61] : memref<16x64x128xbf16, #tpu.memory_space<vmem>>, vector<1x64x128xbf16>
    %63 = vector.shape_cast %62 : vector<1x64x128xbf16> to vector<64x128xbf16>
    %cst_62 = arith.constant dense<0.000000e+00> : vector<128x128xf32>
    %64 = tpu.matmul %61, %63, %cst_62 {dimension_numbers = #tpu.dot_dimension_numbers<[1], [0], [0], [1], [0, 0, 1, 1], [], []>} : vector<128x64xbf16>, vector<64x128xbf16>, vector<128x128xf32> -> vector<128x128xf32>
    %65 = arith.addf %57, %64 : vector<128x128xf32>
    %c0_63 = arith.constant 0 : index
    %c1_64 = arith.constant 1 : index
    %c0_65 = arith.constant 0 : index
    %c0_66 = arith.constant 0 : index
    %c0_67 = arith.constant 0 : index
    %66 = vector.load %arg8[%c0_63, %c1_64, %c0_65, %c0_66, %c0_67] : memref<2x2x17x17x64xf32, #tpu.memory_space<vmem>>, vector<1x1x8x16x64xf32>
    %67 = vector.shape_cast %66 : vector<1x1x8x16x64xf32> to vector<8x16x64xf32>
    %68 = vector.shape_cast %67 : vector<8x16x64xf32> to vector<128x64xf32>
    %69 = arith.truncf %68 : vector<128x64xf32> to vector<128x64xbf16>
    %c1_68 = arith.constant 1 : index
    %c0_69 = arith.constant 0 : index
    %c0_70 = arith.constant 0 : index
    %70 = vector.load %arg4[%c1_68, %c0_69, %c0_70] : memref<16x64x128xbf16, #tpu.memory_space<vmem>>, vector<1x64x128xbf16>
    %71 = vector.shape_cast %70 : vector<1x64x128xbf16> to vector<64x128xbf16>
    %cst_71 = arith.constant dense<0.000000e+00> : vector<128x128xf32>
    %72 = tpu.matmul %69, %71, %cst_71 {dimension_numbers = #tpu.dot_dimension_numbers<[1], [0], [0], [1], [0, 0, 1, 1], [], []>} : vector<128x64xbf16>, vector<64x128xbf16>, vector<128x128xf32> -> vector<128x128xf32>
    %73 = arith.addf %65, %72 : vector<128x128xf32>
    %c0_72 = arith.constant 0 : index
    %c0_73 = arith.constant 0 : index
    %c0_74 = arith.constant 0 : index
    %c1_75 = arith.constant 1 : index
    %c0_76 = arith.constant 0 : index
    %74 = vector.load %arg8[%c0_72, %c0_73, %c0_74, %c1_75, %c0_76] : memref<2x2x17x17x64xf32, #tpu.memory_space<vmem>>, vector<1x1x8x16x64xf32>
    %75 = vector.shape_cast %74 : vector<1x1x8x16x64xf32> to vector<8x16x64xf32>
    %76 = vector.shape_cast %75 : vector<8x16x64xf32> to vector<128x64xf32>
    %77 = arith.truncf %76 : vector<128x64xf32> to vector<128x64xbf16>
    %c2 = arith.constant 2 : index
    %c0_77 = arith.constant 0 : index
    %c0_78 = arith.constant 0 : index
    %78 = vector.load %arg4[%c2, %c0_77, %c0_78] : memref<16x64x128xbf16, #tpu.memory_space<vmem>>, vector<1x64x128xbf16>
    %79 = vector.shape_cast %78 : vector<1x64x128xbf16> to vector<64x128xbf16>
    %cst_79 = arith.constant dense<0.000000e+00> : vector<128x128xf32>
    %80 = tpu.matmul %77, %79, %cst_79 {dimension_numbers = #tpu.dot_dimension_numbers<[1], [0], [0], [1], [0, 0, 1, 1], [], []>} : vector<128x64xbf16>, vector<64x128xbf16>, vector<128x128xf32> -> vector<128x128xf32>
    %81 = arith.addf %73, %80 : vector<128x128xf32>
    %c0_80 = arith.constant 0 : index
    %c1_81 = arith.constant 1 : index
    %c0_82 = arith.constant 0 : index
    %c1_83 = arith.constant 1 : index
    %c0_84 = arith.constant 0 : index
    %82 = vector.load %arg8[%c0_80, %c1_81, %c0_82, %c1_83, %c0_84] : memref<2x2x17x17x64xf32, #tpu.memory_space<vmem>>, vector<1x1x8x16x64xf32>
    %83 = vector.shape_cast %82 : vector<1x1x8x16x64xf32> to vector<8x16x64xf32>
    %84 = vector.shape_cast %83 : vector<8x16x64xf32> to vector<128x64xf32>
    %85 = arith.truncf %84 : vector<128x64xf32> to vector<128x64xbf16>
    %c3 = arith.constant 3 : index
    %c0_85 = arith.constant 0 : index
    %c0_86 = arith.constant 0 : index
    %86 = vector.load %arg4[%c3, %c0_85, %c0_86] : memref<16x64x128xbf16, #tpu.memory_space<vmem>>, vector<1x64x128xbf16>
    %87 = vector.shape_cast %86 : vector<1x64x128xbf16> to vector<64x128xbf16>
    %cst_87 = arith.constant dense<0.000000e+00> : vector<128x128xf32>
    %88 = tpu.matmul %85, %87, %cst_87 {dimension_numbers = #tpu.dot_dimension_numbers<[1], [0], [0], [1], [0, 0, 1, 1], [], []>} : vector<128x64xbf16>, vector<64x128xbf16>, vector<128x128xf32> -> vector<128x128xf32>
    %89 = arith.addf %81, %88 : vector<128x128xf32>
    %c1_88 = arith.constant 1 : index
    %c0_89 = arith.constant 0 : index
    %c0_90 = arith.constant 0 : index
    %c0_91 = arith.constant 0 : index
    %c0_92 = arith.constant 0 : index
    %90 = vector.load %arg8[%c1_88, %c0_89, %c0_90, %c0_91, %c0_92] : memref<2x2x17x17x64xf32, #tpu.memory_space<vmem>>, vector<1x1x8x16x64xf32>
    %91 = vector.shape_cast %90 : vector<1x1x8x16x64xf32> to vector<8x16x64xf32>
    %92 = vector.shape_cast %91 : vector<8x16x64xf32> to vector<128x64xf32>
    %93 = arith.truncf %92 : vector<128x64xf32> to vector<128x64xbf16>
    %c4 = arith.constant 4 : index
    %c0_93 = arith.constant 0 : index
    %c0_94 = arith.constant 0 : index
    %94 = vector.load %arg4[%c4, %c0_93, %c0_94] : memref<16x64x128xbf16, #tpu.memory_space<vmem>>, vector<1x64x128xbf16>
    %95 = vector.shape_cast %94 : vector<1x64x128xbf16> to vector<64x128xbf16>
    %cst_95 = arith.constant dense<0.000000e+00> : vector<128x128xf32>
    %96 = tpu.matmul %93, %95, %cst_95 {dimension_numbers = #tpu.dot_dimension_numbers<[1], [0], [0], [1], [0, 0, 1, 1], [], []>} : vector<128x64xbf16>, vector<64x128xbf16>, vector<128x128xf32> -> vector<128x128xf32>
    %97 = arith.addf %89, %96 : vector<128x128xf32>
    %c1_96 = arith.constant 1 : index
    %c1_97 = arith.constant 1 : index
    %c0_98 = arith.constant 0 : index
    %c0_99 = arith.constant 0 : index
    %c0_100 = arith.constant 0 : index
    %98 = vector.load %arg8[%c1_96, %c1_97, %c0_98, %c0_99, %c0_100] : memref<2x2x17x17x64xf32, #tpu.memory_space<vmem>>, vector<1x1x8x16x64xf32>
    %99 = vector.shape_cast %98 : vector<1x1x8x16x64xf32> to vector<8x16x64xf32>
    %100 = vector.shape_cast %99 : vector<8x16x64xf32> to vector<128x64xf32>
    %101 = arith.truncf %100 : vector<128x64xf32> to vector<128x64xbf16>
    %c5 = arith.constant 5 : index
    %c0_101 = arith.constant 0 : index
    %c0_102 = arith.constant 0 : index
    %102 = vector.load %arg4[%c5, %c0_101, %c0_102] : memref<16x64x128xbf16, #tpu.memory_space<vmem>>, vector<1x64x128xbf16>
    %103 = vector.shape_cast %102 : vector<1x64x128xbf16> to vector<64x128xbf16>
    %cst_103 = arith.constant dense<0.000000e+00> : vector<128x128xf32>
    %104 = tpu.matmul %101, %103, %cst_103 {dimension_numbers = #tpu.dot_dimension_numbers<[1], [0], [0], [1], [0, 0, 1, 1], [], []>} : vector<128x64xbf16>, vector<64x128xbf16>, vector<128x128xf32> -> vector<128x128xf32>
    %105 = arith.addf %97, %104 : vector<128x128xf32>
    %c1_104 = arith.constant 1 : index
    %c0_105 = arith.constant 0 : index
    %c0_106 = arith.constant 0 : index
    %c1_107 = arith.constant 1 : index
    %c0_108 = arith.constant 0 : index
    %106 = vector.load %arg8[%c1_104, %c0_105, %c0_106, %c1_107, %c0_108] : memref<2x2x17x17x64xf32, #tpu.memory_space<vmem>>, vector<1x1x8x16x64xf32>
    %107 = vector.shape_cast %106 : vector<1x1x8x16x64xf32> to vector<8x16x64xf32>
    %108 = vector.shape_cast %107 : vector<8x16x64xf32> to vector<128x64xf32>
    %109 = arith.truncf %108 : vector<128x64xf32> to vector<128x64xbf16>
    %c6 = arith.constant 6 : index
    %c0_109 = arith.constant 0 : index
    %c0_110 = arith.constant 0 : index
    %110 = vector.load %arg4[%c6, %c0_109, %c0_110] : memref<16x64x128xbf16, #tpu.memory_space<vmem>>, vector<1x64x128xbf16>
    %111 = vector.shape_cast %110 : vector<1x64x128xbf16> to vector<64x128xbf16>
    %cst_111 = arith.constant dense<0.000000e+00> : vector<128x128xf32>
    %112 = tpu.matmul %109, %111, %cst_111 {dimension_numbers = #tpu.dot_dimension_numbers<[1], [0], [0], [1], [0, 0, 1, 1], [], []>} : vector<128x64xbf16>, vector<64x128xbf16>, vector<128x128xf32> -> vector<128x128xf32>
    %113 = arith.addf %105, %112 : vector<128x128xf32>
    %c1_112 = arith.constant 1 : index
    %c1_113 = arith.constant 1 : index
    %c0_114 = arith.constant 0 : index
    %c1_115 = arith.constant 1 : index
    %c0_116 = arith.constant 0 : index
    %114 = vector.load %arg8[%c1_112, %c1_113, %c0_114, %c1_115, %c0_116] : memref<2x2x17x17x64xf32, #tpu.memory_space<vmem>>, vector<1x1x8x16x64xf32>
    %115 = vector.shape_cast %114 : vector<1x1x8x16x64xf32> to vector<8x16x64xf32>
    %116 = vector.shape_cast %115 : vector<8x16x64xf32> to vector<128x64xf32>
    %117 = arith.truncf %116 : vector<128x64xf32> to vector<128x64xbf16>
    %c7 = arith.constant 7 : index
    %c0_117 = arith.constant 0 : index
    %c0_118 = arith.constant 0 : index
    %118 = vector.load %arg4[%c7, %c0_117, %c0_118] : memref<16x64x128xbf16, #tpu.memory_space<vmem>>, vector<1x64x128xbf16>
    %119 = vector.shape_cast %118 : vector<1x64x128xbf16> to vector<64x128xbf16>
    %cst_119 = arith.constant dense<0.000000e+00> : vector<128x128xf32>
    %120 = tpu.matmul %117, %119, %cst_119 {dimension_numbers = #tpu.dot_dimension_numbers<[1], [0], [0], [1], [0, 0, 1, 1], [], []>} : vector<128x64xbf16>, vector<64x128xbf16>, vector<128x128xf32> -> vector<128x128xf32>
    %121 = arith.addf %113, %120 : vector<128x128xf32>
    %c0_120 = arith.constant 0 : index
    %c0_121 = arith.constant 0 : index
    %c1_122 = arith.constant 1 : index
    %c0_123 = arith.constant 0 : index
    %c0_124 = arith.constant 0 : index
    %122 = vector.load %arg8[%c0_120, %c0_121, %c1_122, %c0_123, %c0_124] : memref<2x2x17x17x64xf32, #tpu.memory_space<vmem>>, vector<1x1x8x16x64xf32>
    %123 = vector.shape_cast %122 : vector<1x1x8x16x64xf32> to vector<8x16x64xf32>
    %124 = vector.shape_cast %123 : vector<8x16x64xf32> to vector<128x64xf32>
    %125 = arith.truncf %124 : vector<128x64xf32> to vector<128x64xbf16>
    %c8 = arith.constant 8 : index
    %c0_125 = arith.constant 0 : index
    %c0_126 = arith.constant 0 : index
    %126 = vector.load %arg4[%c8, %c0_125, %c0_126] : memref<16x64x128xbf16, #tpu.memory_space<vmem>>, vector<1x64x128xbf16>
    %127 = vector.shape_cast %126 : vector<1x64x128xbf16> to vector<64x128xbf16>
    %cst_127 = arith.constant dense<0.000000e+00> : vector<128x128xf32>
    %128 = tpu.matmul %125, %127, %cst_127 {dimension_numbers = #tpu.dot_dimension_numbers<[1], [0], [0], [1], [0, 0, 1, 1], [], []>} : vector<128x64xbf16>, vector<64x128xbf16>, vector<128x128xf32> -> vector<128x128xf32>
    %129 = arith.addf %121, %128 : vector<128x128xf32>
    %c0_128 = arith.constant 0 : index
    %c1_129 = arith.constant 1 : index
    %c1_130 = arith.constant 1 : index
    %c0_131 = arith.constant 0 : index
    %c0_132 = arith.constant 0 : index
    %130 = vector.load %arg8[%c0_128, %c1_129, %c1_130, %c0_131, %c0_132] : memref<2x2x17x17x64xf32, #tpu.memory_space<vmem>>, vector<1x1x8x16x64xf32>
    %131 = vector.shape_cast %130 : vector<1x1x8x16x64xf32> to vector<8x16x64xf32>
    %132 = vector.shape_cast %131 : vector<8x16x64xf32> to vector<128x64xf32>
    %133 = arith.truncf %132 : vector<128x64xf32> to vector<128x64xbf16>
    %c9 = arith.constant 9 : index
    %c0_133 = arith.constant 0 : index
    %c0_134 = arith.constant 0 : index
    %134 = vector.load %arg4[%c9, %c0_133, %c0_134] : memref<16x64x128xbf16, #tpu.memory_space<vmem>>, vector<1x64x128xbf16>
    %135 = vector.shape_cast %134 : vector<1x64x128xbf16> to vector<64x128xbf16>
    %cst_135 = arith.constant dense<0.000000e+00> : vector<128x128xf32>
    %136 = tpu.matmul %133, %135, %cst_135 {dimension_numbers = #tpu.dot_dimension_numbers<[1], [0], [0], [1], [0, 0, 1, 1], [], []>} : vector<128x64xbf16>, vector<64x128xbf16>, vector<128x128xf32> -> vector<128x128xf32>
    %137 = arith.addf %129, %136 : vector<128x128xf32>
    %c0_136 = arith.constant 0 : index
    %c0_137 = arith.constant 0 : index
    %c1_138 = arith.constant 1 : index
    %c1_139 = arith.constant 1 : index
    %c0_140 = arith.constant 0 : index
    %138 = vector.load %arg8[%c0_136, %c0_137, %c1_138, %c1_139, %c0_140] : memref<2x2x17x17x64xf32, #tpu.memory_space<vmem>>, vector<1x1x8x16x64xf32>
    %139 = vector.shape_cast %138 : vector<1x1x8x16x64xf32> to vector<8x16x64xf32>
    %140 = vector.shape_cast %139 : vector<8x16x64xf32> to vector<128x64xf32>
    %141 = arith.truncf %140 : vector<128x64xf32> to vector<128x64xbf16>
    %c10 = arith.constant 10 : index
    %c0_141 = arith.constant 0 : index
    %c0_142 = arith.constant 0 : index
    %142 = vector.load %arg4[%c10, %c0_141, %c0_142] : memref<16x64x128xbf16, #tpu.memory_space<vmem>>, vector<1x64x128xbf16>
    %143 = vector.shape_cast %142 : vector<1x64x128xbf16> to vector<64x128xbf16>
    %cst_143 = arith.constant dense<0.000000e+00> : vector<128x128xf32>
    %144 = tpu.matmul %141, %143, %cst_143 {dimension_numbers = #tpu.dot_dimension_numbers<[1], [0], [0], [1], [0, 0, 1, 1], [], []>} : vector<128x64xbf16>, vector<64x128xbf16>, vector<128x128xf32> -> vector<128x128xf32>
    %145 = arith.addf %137, %144 : vector<128x128xf32>
    %c0_144 = arith.constant 0 : index
    %c1_145 = arith.constant 1 : index
    %c1_146 = arith.constant 1 : index
    %c1_147 = arith.constant 1 : index
    %c0_148 = arith.constant 0 : index
    %146 = vector.load %arg8[%c0_144, %c1_145, %c1_146, %c1_147, %c0_148] : memref<2x2x17x17x64xf32, #tpu.memory_space<vmem>>, vector<1x1x8x16x64xf32>
    %147 = vector.shape_cast %146 : vector<1x1x8x16x64xf32> to vector<8x16x64xf32>
    %148 = vector.shape_cast %147 : vector<8x16x64xf32> to vector<128x64xf32>
    %149 = arith.truncf %148 : vector<128x64xf32> to vector<128x64xbf16>
    %c11 = arith.constant 11 : index
    %c0_149 = arith.constant 0 : index
    %c0_150 = arith.constant 0 : index
    %150 = vector.load %arg4[%c11, %c0_149, %c0_150] : memref<16x64x128xbf16, #tpu.memory_space<vmem>>, vector<1x64x128xbf16>
    %151 = vector.shape_cast %150 : vector<1x64x128xbf16> to vector<64x128xbf16>
    %cst_151 = arith.constant dense<0.000000e+00> : vector<128x128xf32>
    %152 = tpu.matmul %149, %151, %cst_151 {dimension_numbers = #tpu.dot_dimension_numbers<[1], [0], [0], [1], [0, 0, 1, 1], [], []>} : vector<128x64xbf16>, vector<64x128xbf16>, vector<128x128xf32> -> vector<128x128xf32>
    %153 = arith.addf %145, %152 : vector<128x128xf32>
    %c1_152 = arith.constant 1 : index
    %c0_153 = arith.constant 0 : index
    %c1_154 = arith.constant 1 : index
    %c0_155 = arith.constant 0 : index
    %c0_156 = arith.constant 0 : index
    %154 = vector.load %arg8[%c1_152, %c0_153, %c1_154, %c0_155, %c0_156] : memref<2x2x17x17x64xf32, #tpu.memory_space<vmem>>, vector<1x1x8x16x64xf32>
    %155 = vector.shape_cast %154 : vector<1x1x8x16x64xf32> to vector<8x16x64xf32>
    %156 = vector.shape_cast %155 : vector<8x16x64xf32> to vector<128x64xf32>
    %157 = arith.truncf %156 : vector<128x64xf32> to vector<128x64xbf16>
    %c12 = arith.constant 12 : index
    %c0_157 = arith.constant 0 : index
    %c0_158 = arith.constant 0 : index
    %158 = vector.load %arg4[%c12, %c0_157, %c0_158] : memref<16x64x128xbf16, #tpu.memory_space<vmem>>, vector<1x64x128xbf16>
    %159 = vector.shape_cast %158 : vector<1x64x128xbf16> to vector<64x128xbf16>
    %cst_159 = arith.constant dense<0.000000e+00> : vector<128x128xf32>
    %160 = tpu.matmul %157, %159, %cst_159 {dimension_numbers = #tpu.dot_dimension_numbers<[1], [0], [0], [1], [0, 0, 1, 1], [], []>} : vector<128x64xbf16>, vector<64x128xbf16>, vector<128x128xf32> -> vector<128x128xf32>
    %161 = arith.addf %153, %160 : vector<128x128xf32>
    %c1_160 = arith.constant 1 : index
    %c1_161 = arith.constant 1 : index
    %c1_162 = arith.constant 1 : index
    %c0_163 = arith.constant 0 : index
    %c0_164 = arith.constant 0 : index
    %162 = vector.load %arg8[%c1_160, %c1_161, %c1_162, %c0_163, %c0_164] : memref<2x2x17x17x64xf32, #tpu.memory_space<vmem>>, vector<1x1x8x16x64xf32>
    %163 = vector.shape_cast %162 : vector<1x1x8x16x64xf32> to vector<8x16x64xf32>
    %164 = vector.shape_cast %163 : vector<8x16x64xf32> to vector<128x64xf32>
    %165 = arith.truncf %164 : vector<128x64xf32> to vector<128x64xbf16>
    %c13 = arith.constant 13 : index
    %c0_165 = arith.constant 0 : index
    %c0_166 = arith.constant 0 : index
    %166 = vector.load %arg4[%c13, %c0_165, %c0_166] : memref<16x64x128xbf16, #tpu.memory_space<vmem>>, vector<1x64x128xbf16>
    %167 = vector.shape_cast %166 : vector<1x64x128xbf16> to vector<64x128xbf16>
    %cst_167 = arith.constant dense<0.000000e+00> : vector<128x128xf32>
    %168 = tpu.matmul %165, %167, %cst_167 {dimension_numbers = #tpu.dot_dimension_numbers<[1], [0], [0], [1], [0, 0, 1, 1], [], []>} : vector<128x64xbf16>, vector<64x128xbf16>, vector<128x128xf32> -> vector<128x128xf32>
    %169 = arith.addf %161, %168 : vector<128x128xf32>
    %c1_168 = arith.constant 1 : index
    %c0_169 = arith.constant 0 : index
    %c1_170 = arith.constant 1 : index
    %c1_171 = arith.constant 1 : index
    %c0_172 = arith.constant 0 : index
    %170 = vector.load %arg8[%c1_168, %c0_169, %c1_170, %c1_171, %c0_172] : memref<2x2x17x17x64xf32, #tpu.memory_space<vmem>>, vector<1x1x8x16x64xf32>
    %171 = vector.shape_cast %170 : vector<1x1x8x16x64xf32> to vector<8x16x64xf32>
    %172 = vector.shape_cast %171 : vector<8x16x64xf32> to vector<128x64xf32>
    %173 = arith.truncf %172 : vector<128x64xf32> to vector<128x64xbf16>
    %c14 = arith.constant 14 : index
    %c0_173 = arith.constant 0 : index
    %c0_174 = arith.constant 0 : index
    %174 = vector.load %arg4[%c14, %c0_173, %c0_174] : memref<16x64x128xbf16, #tpu.memory_space<vmem>>, vector<1x64x128xbf16>
    %175 = vector.shape_cast %174 : vector<1x64x128xbf16> to vector<64x128xbf16>
    %cst_175 = arith.constant dense<0.000000e+00> : vector<128x128xf32>
    %176 = tpu.matmul %173, %175, %cst_175 {dimension_numbers = #tpu.dot_dimension_numbers<[1], [0], [0], [1], [0, 0, 1, 1], [], []>} : vector<128x64xbf16>, vector<64x128xbf16>, vector<128x128xf32> -> vector<128x128xf32>
    %177 = arith.addf %169, %176 : vector<128x128xf32>
    %c1_176 = arith.constant 1 : index
    %c1_177 = arith.constant 1 : index
    %c1_178 = arith.constant 1 : index
    %c1_179 = arith.constant 1 : index
    %c0_180 = arith.constant 0 : index
    %178 = vector.load %arg8[%c1_176, %c1_177, %c1_178, %c1_179, %c0_180] : memref<2x2x17x17x64xf32, #tpu.memory_space<vmem>>, vector<1x1x8x16x64xf32>
    %179 = vector.shape_cast %178 : vector<1x1x8x16x64xf32> to vector<8x16x64xf32>
    %180 = vector.shape_cast %179 : vector<8x16x64xf32> to vector<128x64xf32>
    %181 = arith.truncf %180 : vector<128x64xf32> to vector<128x64xbf16>
    %c15 = arith.constant 15 : index
    %c0_181 = arith.constant 0 : index
    %c0_182 = arith.constant 0 : index
    %182 = vector.load %arg4[%c15, %c0_181, %c0_182] : memref<16x64x128xbf16, #tpu.memory_space<vmem>>, vector<1x64x128xbf16>
    %183 = vector.shape_cast %182 : vector<1x64x128xbf16> to vector<64x128xbf16>
    %cst_183 = arith.constant dense<0.000000e+00> : vector<128x128xf32>
    %184 = tpu.matmul %181, %183, %cst_183 {dimension_numbers = #tpu.dot_dimension_numbers<[1], [0], [0], [1], [0, 0, 1, 1], [], []>} : vector<128x64xbf16>, vector<64x128xbf16>, vector<128x128xf32> -> vector<128x128xf32>
    %185 = arith.addf %177, %184 : vector<128x128xf32>
    %186 = vector.broadcast %55 : vector<1x128xf32> to vector<128x128xf32>
    %187 = arith.addf %185, %186 : vector<128x128xf32>
    %cst_184 = arith.constant 2.000000e-01 : f32
    %188 = vector.broadcast %cst_184 : f32 to vector<128x128xf32>
    %189 = arith.mulf %188, %187 : vector<128x128xf32>
    %190 = arith.maximumf %187, %189 : vector<128x128xf32>
    %c0_185 = arith.constant 0 : index
    %c0_186 = arith.constant 0 : index
    %191 = vector.load %arg6[%c0_185, %c0_186] : memref<256x128xf32, #tpu.memory_space<vmem>>, vector<128x128xf32>
    %192 = arith.mulf %190, %191 : vector<128x128xf32>
    %cst_187 = arith.constant dense<0.000000e+00> : vector<128xf32>
    %193 = vector.multi_reduction <add>, %192, %cst_187 [0] : vector<128x128xf32> to vector<128xf32>
    %194 = vector.shape_cast %193 : vector<128xf32> to vector<1x128xf32>
    %195 = arith.addf %56, %194 : vector<1x128xf32>
    %cst_188 = arith.constant 0.000000e+00 : f32
    %196 = vector.broadcast %cst_188 : f32 to vector<128x128xf32>
    %c0_189 = arith.constant 0 : index
    %c0_190 = arith.constant 0 : index
    %c8_191 = arith.constant 8 : index
    %c0_192 = arith.constant 0 : index
    %c0_193 = arith.constant 0 : index
    %197 = vector.load %arg8[%c0_189, %c0_190, %c8_191, %c0_192, %c0_193] : memref<2x2x17x17x64xf32, #tpu.memory_space<vmem>>, vector<1x1x8x16x64xf32>
    %198 = vector.shape_cast %197 : vector<1x1x8x16x64xf32> to vector<8x16x64xf32>
    %199 = vector.shape_cast %198 : vector<8x16x64xf32> to vector<128x64xf32>
    %200 = arith.truncf %199 : vector<128x64xf32> to vector<128x64xbf16>
    %c0_194 = arith.constant 0 : index
    %c0_195 = arith.constant 0 : index
    %c0_196 = arith.constant 0 : index
    %201 = vector.load %arg4[%c0_194, %c0_195, %c0_196] : memref<16x64x128xbf16, #tpu.memory_space<vmem>>, vector<1x64x128xbf16>
    %202 = vector.shape_cast %201 : vector<1x64x128xbf16> to vector<64x128xbf16>
    %cst_197 = arith.constant dense<0.000000e+00> : vector<128x128xf32>
    %203 = tpu.matmul %200, %202, %cst_197 {dimension_numbers = #tpu.dot_dimension_numbers<[1], [0], [0], [1], [0, 0, 1, 1], [], []>} : vector<128x64xbf16>, vector<64x128xbf16>, vector<128x128xf32> -> vector<128x128xf32>
    %204 = arith.addf %196, %203 : vector<128x128xf32>
    %c0_198 = arith.constant 0 : index
    %c1_199 = arith.constant 1 : index
    %c8_200 = arith.constant 8 : index
    %c0_201 = arith.constant 0 : index
    %c0_202 = arith.constant 0 : index
    %205 = vector.load %arg8[%c0_198, %c1_199, %c8_200, %c0_201, %c0_202] : memref<2x2x17x17x64xf32, #tpu.memory_space<vmem>>, vector<1x1x8x16x64xf32>
    %206 = vector.shape_cast %205 : vector<1x1x8x16x64xf32> to vector<8x16x64xf32>
    %207 = vector.shape_cast %206 : vector<8x16x64xf32> to vector<128x64xf32>
    %208 = arith.truncf %207 : vector<128x64xf32> to vector<128x64xbf16>
    %c1_203 = arith.constant 1 : index
    %c0_204 = arith.constant 0 : index
    %c0_205 = arith.constant 0 : index
    %209 = vector.load %arg4[%c1_203, %c0_204, %c0_205] : memref<16x64x128xbf16, #tpu.memory_space<vmem>>, vector<1x64x128xbf16>
    %210 = vector.shape_cast %209 : vector<1x64x128xbf16> to vector<64x128xbf16>
    %cst_206 = arith.constant dense<0.000000e+00> : vector<128x128xf32>
    %211 = tpu.matmul %208, %210, %cst_206 {dimension_numbers = #tpu.dot_dimension_numbers<[1], [0], [0], [1], [0, 0, 1, 1], [], []>} : vector<128x64xbf16>, vector<64x128xbf16>, vector<128x128xf32> -> vector<128x128xf32>
    %212 = arith.addf %204, %211 : vector<128x128xf32>
    %c0_207 = arith.constant 0 : index
    %c0_208 = arith.constant 0 : index
    %c8_209 = arith.constant 8 : index
    %c1_210 = arith.constant 1 : index
    %c0_211 = arith.constant 0 : index
    %213 = vector.load %arg8[%c0_207, %c0_208, %c8_209, %c1_210, %c0_211] : memref<2x2x17x17x64xf32, #tpu.memory_space<vmem>>, vector<1x1x8x16x64xf32>
    %214 = vector.shape_cast %213 : vector<1x1x8x16x64xf32> to vector<8x16x64xf32>
    %215 = vector.shape_cast %214 : vector<8x16x64xf32> to vector<128x64xf32>
    %216 = arith.truncf %215 : vector<128x64xf32> to vector<128x64xbf16>
    %c2_212 = arith.constant 2 : index
    %c0_213 = arith.constant 0 : index
    %c0_214 = arith.constant 0 : index
    %217 = vector.load %arg4[%c2_212, %c0_213, %c0_214] : memref<16x64x128xbf16, #tpu.memory_space<vmem>>, vector<1x64x128xbf16>
    %218 = vector.shape_cast %217 : vector<1x64x128xbf16> to vector<64x128xbf16>
    %cst_215 = arith.constant dense<0.000000e+00> : vector<128x128xf32>
    %219 = tpu.matmul %216, %218, %cst_215 {dimension_numbers = #tpu.dot_dimension_numbers<[1], [0], [0], [1], [0, 0, 1, 1], [], []>} : vector<128x64xbf16>, vector<64x128xbf16>, vector<128x128xf32> -> vector<128x128xf32>
    %220 = arith.addf %212, %219 : vector<128x128xf32>
    %c0_216 = arith.constant 0 : index
    %c1_217 = arith.constant 1 : index
    %c8_218 = arith.constant 8 : index
    %c1_219 = arith.constant 1 : index
    %c0_220 = arith.constant 0 : index
    %221 = vector.load %arg8[%c0_216, %c1_217, %c8_218, %c1_219, %c0_220] : memref<2x2x17x17x64xf32, #tpu.memory_space<vmem>>, vector<1x1x8x16x64xf32>
    %222 = vector.shape_cast %221 : vector<1x1x8x16x64xf32> to vector<8x16x64xf32>
    %223 = vector.shape_cast %222 : vector<8x16x64xf32> to vector<128x64xf32>
    %224 = arith.truncf %223 : vector<128x64xf32> to vector<128x64xbf16>
    %c3_221 = arith.constant 3 : index
    %c0_222 = arith.constant 0 : index
    %c0_223 = arith.constant 0 : index
    %225 = vector.load %arg4[%c3_221, %c0_222, %c0_223] : memref<16x64x128xbf16, #tpu.memory_space<vmem>>, vector<1x64x128xbf16>
    %226 = vector.shape_cast %225 : vector<1x64x128xbf16> to vector<64x128xbf16>
    %cst_224 = arith.constant dense<0.000000e+00> : vector<128x128xf32>
    %227 = tpu.matmul %224, %226, %cst_224 {dimension_numbers = #tpu.dot_dimension_numbers<[1], [0], [0], [1], [0, 0, 1, 1], [], []>} : vector<128x64xbf16>, vector<64x128xbf16>, vector<128x128xf32> -> vector<128x128xf32>
    %228 = arith.addf %220, %227 : vector<128x128xf32>
    %c1_225 = arith.constant 1 : index
    %c0_226 = arith.constant 0 : index
    %c8_227 = arith.constant 8 : index
    %c0_228 = arith.constant 0 : index
    %c0_229 = arith.constant 0 : index
    %229 = vector.load %arg8[%c1_225, %c0_226, %c8_227, %c0_228, %c0_229] : memref<2x2x17x17x64xf32, #tpu.memory_space<vmem>>, vector<1x1x8x16x64xf32>
    %230 = vector.shape_cast %229 : vector<1x1x8x16x64xf32> to vector<8x16x64xf32>
    %231 = vector.shape_cast %230 : vector<8x16x64xf32> to vector<128x64xf32>
    %232 = arith.truncf %231 : vector<128x64xf32> to vector<128x64xbf16>
    %c4_230 = arith.constant 4 : index
    %c0_231 = arith.constant 0 : index
    %c0_232 = arith.constant 0 : index
    %233 = vector.load %arg4[%c4_230, %c0_231, %c0_232] : memref<16x64x128xbf16, #tpu.memory_space<vmem>>, vector<1x64x128xbf16>
    %234 = vector.shape_cast %233 : vector<1x64x128xbf16> to vector<64x128xbf16>
    %cst_233 = arith.constant dense<0.000000e+00> : vector<128x128xf32>
    %235 = tpu.matmul %232, %234, %cst_233 {dimension_numbers = #tpu.dot_dimension_numbers<[1], [0], [0], [1], [0, 0, 1, 1], [], []>} : vector<128x64xbf16>, vector<64x128xbf16>, vector<128x128xf32> -> vector<128x128xf32>
    %236 = arith.addf %228, %235 : vector<128x128xf32>
    %c1_234 = arith.constant 1 : index
    %c1_235 = arith.constant 1 : index
    %c8_236 = arith.constant 8 : index
    %c0_237 = arith.constant 0 : index
    %c0_238 = arith.constant 0 : index
    %237 = vector.load %arg8[%c1_234, %c1_235, %c8_236, %c0_237, %c0_238] : memref<2x2x17x17x64xf32, #tpu.memory_space<vmem>>, vector<1x1x8x16x64xf32>
    %238 = vector.shape_cast %237 : vector<1x1x8x16x64xf32> to vector<8x16x64xf32>
    %239 = vector.shape_cast %238 : vector<8x16x64xf32> to vector<128x64xf32>
    %240 = arith.truncf %239 : vector<128x64xf32> to vector<128x64xbf16>
    %c5_239 = arith.constant 5 : index
    %c0_240 = arith.constant 0 : index
    %c0_241 = arith.constant 0 : index
    %241 = vector.load %arg4[%c5_239, %c0_240, %c0_241] : memref<16x64x128xbf16, #tpu.memory_space<vmem>>, vector<1x64x128xbf16>
    %242 = vector.shape_cast %241 : vector<1x64x128xbf16> to vector<64x128xbf16>
    %cst_242 = arith.constant dense<0.000000e+00> : vector<128x128xf32>
    %243 = tpu.matmul %240, %242, %cst_242 {dimension_numbers = #tpu.dot_dimension_numbers<[1], [0], [0], [1], [0, 0, 1, 1], [], []>} : vector<128x64xbf16>, vector<64x128xbf16>, vector<128x128xf32> -> vector<128x128xf32>
    %244 = arith.addf %236, %243 : vector<128x128xf32>
    %c1_243 = arith.constant 1 : index
    %c0_244 = arith.constant 0 : index
    %c8_245 = arith.constant 8 : index
    %c1_246 = arith.constant 1 : index
    %c0_247 = arith.constant 0 : index
    %245 = vector.load %arg8[%c1_243, %c0_244, %c8_245, %c1_246, %c0_247] : memref<2x2x17x17x64xf32, #tpu.memory_space<vmem>>, vector<1x1x8x16x64xf32>
    %246 = vector.shape_cast %245 : vector<1x1x8x16x64xf32> to vector<8x16x64xf32>
    %247 = vector.shape_cast %246 : vector<8x16x64xf32> to vector<128x64xf32>
    %248 = arith.truncf %247 : vector<128x64xf32> to vector<128x64xbf16>
    %c6_248 = arith.constant 6 : index
    %c0_249 = arith.constant 0 : index
    %c0_250 = arith.constant 0 : index
    %249 = vector.load %arg4[%c6_248, %c0_249, %c0_250] : memref<16x64x128xbf16, #tpu.memory_space<vmem>>, vector<1x64x128xbf16>
    %250 = vector.shape_cast %249 : vector<1x64x128xbf16> to vector<64x128xbf16>
    %cst_251 = arith.constant dense<0.000000e+00> : vector<128x128xf32>
    %251 = tpu.matmul %248, %250, %cst_251 {dimension_numbers = #tpu.dot_dimension_numbers<[1], [0], [0], [1], [0, 0, 1, 1], [], []>} : vector<128x64xbf16>, vector<64x128xbf16>, vector<128x128xf32> -> vector<128x128xf32>
    %252 = arith.addf %244, %251 : vector<128x128xf32>
    %c1_252 = arith.constant 1 : index
    %c1_253 = arith.constant 1 : index
    %c8_254 = arith.constant 8 : index
    %c1_255 = arith.constant 1 : index
    %c0_256 = arith.constant 0 : index
    %253 = vector.load %arg8[%c1_252, %c1_253, %c8_254, %c1_255, %c0_256] : memref<2x2x17x17x64xf32, #tpu.memory_space<vmem>>, vector<1x1x8x16x64xf32>
    %254 = vector.shape_cast %253 : vector<1x1x8x16x64xf32> to vector<8x16x64xf32>
    %255 = vector.shape_cast %254 : vector<8x16x64xf32> to vector<128x64xf32>
    %256 = arith.truncf %255 : vector<128x64xf32> to vector<128x64xbf16>
    %c7_257 = arith.constant 7 : index
    %c0_258 = arith.constant 0 : index
    %c0_259 = arith.constant 0 : index
    %257 = vector.load %arg4[%c7_257, %c0_258, %c0_259] : memref<16x64x128xbf16, #tpu.memory_space<vmem>>, vector<1x64x128xbf16>
    %258 = vector.shape_cast %257 : vector<1x64x128xbf16> to vector<64x128xbf16>
    %cst_260 = arith.constant dense<0.000000e+00> : vector<128x128xf32>
    %259 = tpu.matmul %256, %258, %cst_260 {dimension_numbers = #tpu.dot_dimension_numbers<[1], [0], [0], [1], [0, 0, 1, 1], [], []>} : vector<128x64xbf16>, vector<64x128xbf16>, vector<128x128xf32> -> vector<128x128xf32>
    %260 = arith.addf %252, %259 : vector<128x128xf32>
    %c0_261 = arith.constant 0 : index
    %c0_262 = arith.constant 0 : index
    %c9_263 = arith.constant 9 : index
    %c0_264 = arith.constant 0 : index
    %c0_265 = arith.constant 0 : index
    %261 = vector.load %arg8[%c0_261, %c0_262, %c9_263, %c0_264, %c0_265] : memref<2x2x17x17x64xf32, #tpu.memory_space<vmem>>, vector<1x1x8x16x64xf32>
    %262 = vector.shape_cast %261 : vector<1x1x8x16x64xf32> to vector<8x16x64xf32>
    %263 = vector.shape_cast %262 : vector<8x16x64xf32> to vector<128x64xf32>
    %264 = arith.truncf %263 : vector<128x64xf32> to vector<128x64xbf16>
    %c8_266 = arith.constant 8 : index
    %c0_267 = arith.constant 0 : index
    %c0_268 = arith.constant 0 : index
    %265 = vector.load %arg4[%c8_266, %c0_267, %c0_268] : memref<16x64x128xbf16, #tpu.memory_space<vmem>>, vector<1x64x128xbf16>
    %266 = vector.shape_cast %265 : vector<1x64x128xbf16> to vector<64x128xbf16>
    %cst_269 = arith.constant dense<0.000000e+00> : vector<128x128xf32>
    %267 = tpu.matmul %264, %266, %cst_269 {dimension_numbers = #tpu.dot_dimension_numbers<[1], [0], [0], [1], [0, 0, 1, 1], [], []>} : vector<128x64xbf16>, vector<64x128xbf16>, vector<128x128xf32> -> vector<128x128xf32>
    %268 = arith.addf %260, %267 : vector<128x128xf32>
    %c0_270 = arith.constant 0 : index
    %c1_271 = arith.constant 1 : index
    %c9_272 = arith.constant 9 : index
    %c0_273 = arith.constant 0 : index
    %c0_274 = arith.constant 0 : index
    %269 = vector.load %arg8[%c0_270, %c1_271, %c9_272, %c0_273, %c0_274] : memref<2x2x17x17x64xf32, #tpu.memory_space<vmem>>, vector<1x1x8x16x64xf32>
    %270 = vector.shape_cast %269 : vector<1x1x8x16x64xf32> to vector<8x16x64xf32>
    %271 = vector.shape_cast %270 : vector<8x16x64xf32> to vector<128x64xf32>
    %272 = arith.truncf %271 : vector<128x64xf32> to vector<128x64xbf16>
    %c9_275 = arith.constant 9 : index
    %c0_276 = arith.constant 0 : index
    %c0_277 = arith.constant 0 : index
    %273 = vector.load %arg4[%c9_275, %c0_276, %c0_277] : memref<16x64x128xbf16, #tpu.memory_space<vmem>>, vector<1x64x128xbf16>
    %274 = vector.shape_cast %273 : vector<1x64x128xbf16> to vector<64x128xbf16>
    %cst_278 = arith.constant dense<0.000000e+00> : vector<128x128xf32>
    %275 = tpu.matmul %272, %274, %cst_278 {dimension_numbers = #tpu.dot_dimension_numbers<[1], [0], [0], [1], [0, 0, 1, 1], [], []>} : vector<128x64xbf16>, vector<64x128xbf16>, vector<128x128xf32> -> vector<128x128xf32>
    %276 = arith.addf %268, %275 : vector<128x128xf32>
    %c0_279 = arith.constant 0 : index
    %c0_280 = arith.constant 0 : index
    %c9_281 = arith.constant 9 : index
    %c1_282 = arith.constant 1 : index
    %c0_283 = arith.constant 0 : index
    %277 = vector.load %arg8[%c0_279, %c0_280, %c9_281, %c1_282, %c0_283] : memref<2x2x17x17x64xf32, #tpu.memory_space<vmem>>, vector<1x1x8x16x64xf32>
    %278 = vector.shape_cast %277 : vector<1x1x8x16x64xf32> to vector<8x16x64xf32>
    %279 = vector.shape_cast %278 : vector<8x16x64xf32> to vector<128x64xf32>
    %280 = arith.truncf %279 : vector<128x64xf32> to vector<128x64xbf16>
    %c10_284 = arith.constant 10 : index
    %c0_285 = arith.constant 0 : index
    %c0_286 = arith.constant 0 : index
    %281 = vector.load %arg4[%c10_284, %c0_285, %c0_286] : memref<16x64x128xbf16, #tpu.memory_space<vmem>>, vector<1x64x128xbf16>
    %282 = vector.shape_cast %281 : vector<1x64x128xbf16> to vector<64x128xbf16>
    %cst_287 = arith.constant dense<0.000000e+00> : vector<128x128xf32>
    %283 = tpu.matmul %280, %282, %cst_287 {dimension_numbers = #tpu.dot_dimension_numbers<[1], [0], [0], [1], [0, 0, 1, 1], [], []>} : vector<128x64xbf16>, vector<64x128xbf16>, vector<128x128xf32> -> vector<128x128xf32>
    %284 = arith.addf %276, %283 : vector<128x128xf32>
    %c0_288 = arith.constant 0 : index
    %c1_289 = arith.constant 1 : index
    %c9_290 = arith.constant 9 : index
    %c1_291 = arith.constant 1 : index
    %c0_292 = arith.constant 0 : index
    %285 = vector.load %arg8[%c0_288, %c1_289, %c9_290, %c1_291, %c0_292] : memref<2x2x17x17x64xf32, #tpu.memory_space<vmem>>, vector<1x1x8x16x64xf32>
    %286 = vector.shape_cast %285 : vector<1x1x8x16x64xf32> to vector<8x16x64xf32>
    %287 = vector.shape_cast %286 : vector<8x16x64xf32> to vector<128x64xf32>
    %288 = arith.truncf %287 : vector<128x64xf32> to vector<128x64xbf16>
    %c11_293 = arith.constant 11 : index
    %c0_294 = arith.constant 0 : index
    %c0_295 = arith.constant 0 : index
    %289 = vector.load %arg4[%c11_293, %c0_294, %c0_295] : memref<16x64x128xbf16, #tpu.memory_space<vmem>>, vector<1x64x128xbf16>
    %290 = vector.shape_cast %289 : vector<1x64x128xbf16> to vector<64x128xbf16>
    %cst_296 = arith.constant dense<0.000000e+00> : vector<128x128xf32>
    %291 = tpu.matmul %288, %290, %cst_296 {dimension_numbers = #tpu.dot_dimension_numbers<[1], [0], [0], [1], [0, 0, 1, 1], [], []>} : vector<128x64xbf16>, vector<64x128xbf16>, vector<128x128xf32> -> vector<128x128xf32>
    %292 = arith.addf %284, %291 : vector<128x128xf32>
    %c1_297 = arith.constant 1 : index
    %c0_298 = arith.constant 0 : index
    %c9_299 = arith.constant 9 : index
    %c0_300 = arith.constant 0 : index
    %c0_301 = arith.constant 0 : index
    %293 = vector.load %arg8[%c1_297, %c0_298, %c9_299, %c0_300, %c0_301] : memref<2x2x17x17x64xf32, #tpu.memory_space<vmem>>, vector<1x1x8x16x64xf32>
    %294 = vector.shape_cast %293 : vector<1x1x8x16x64xf32> to vector<8x16x64xf32>
    %295 = vector.shape_cast %294 : vector<8x16x64xf32> to vector<128x64xf32>
    %296 = arith.truncf %295 : vector<128x64xf32> to vector<128x64xbf16>
    %c12_302 = arith.constant 12 : index
    %c0_303 = arith.constant 0 : index
    %c0_304 = arith.constant 0 : index
    %297 = vector.load %arg4[%c12_302, %c0_303, %c0_304] : memref<16x64x128xbf16, #tpu.memory_space<vmem>>, vector<1x64x128xbf16>
    %298 = vector.shape_cast %297 : vector<1x64x128xbf16> to vector<64x128xbf16>
    %cst_305 = arith.constant dense<0.000000e+00> : vector<128x128xf32>
    %299 = tpu.matmul %296, %298, %cst_305 {dimension_numbers = #tpu.dot_dimension_numbers<[1], [0], [0], [1], [0, 0, 1, 1], [], []>} : vector<128x64xbf16>, vector<64x128xbf16>, vector<128x128xf32> -> vector<128x128xf32>
    %300 = arith.addf %292, %299 : vector<128x128xf32>
    %c1_306 = arith.constant 1 : index
    %c1_307 = arith.constant 1 : index
    %c9_308 = arith.constant 9 : index
    %c0_309 = arith.constant 0 : index
    %c0_310 = arith.constant 0 : index
    %301 = vector.load %arg8[%c1_306, %c1_307, %c9_308, %c0_309, %c0_310] : memref<2x2x17x17x64xf32, #tpu.memory_space<vmem>>, vector<1x1x8x16x64xf32>
    %302 = vector.shape_cast %301 : vector<1x1x8x16x64xf32> to vector<8x16x64xf32>
    %303 = vector.shape_cast %302 : vector<8x16x64xf32> to vector<128x64xf32>
    %304 = arith.truncf %303 : vector<128x64xf32> to vector<128x64xbf16>
    %c13_311 = arith.constant 13 : index
    %c0_312 = arith.constant 0 : index
    %c0_313 = arith.constant 0 : index
    %305 = vector.load %arg4[%c13_311, %c0_312, %c0_313] : memref<16x64x128xbf16, #tpu.memory_space<vmem>>, vector<1x64x128xbf16>
    %306 = vector.shape_cast %305 : vector<1x64x128xbf16> to vector<64x128xbf16>
    %cst_314 = arith.constant dense<0.000000e+00> : vector<128x128xf32>
    %307 = tpu.matmul %304, %306, %cst_314 {dimension_numbers = #tpu.dot_dimension_numbers<[1], [0], [0], [1], [0, 0, 1, 1], [], []>} : vector<128x64xbf16>, vector<64x128xbf16>, vector<128x128xf32> -> vector<128x128xf32>
    %308 = arith.addf %300, %307 : vector<128x128xf32>
    %c1_315 = arith.constant 1 : index
    %c0_316 = arith.constant 0 : index
    %c9_317 = arith.constant 9 : index
    %c1_318 = arith.constant 1 : index
    %c0_319 = arith.constant 0 : index
    %309 = vector.load %arg8[%c1_315, %c0_316, %c9_317, %c1_318, %c0_319] : memref<2x2x17x17x64xf32, #tpu.memory_space<vmem>>, vector<1x1x8x16x64xf32>
    %310 = vector.shape_cast %309 : vector<1x1x8x16x64xf32> to vector<8x16x64xf32>
    %311 = vector.shape_cast %310 : vector<8x16x64xf32> to vector<128x64xf32>
    %312 = arith.truncf %311 : vector<128x64xf32> to vector<128x64xbf16>
    %c14_320 = arith.constant 14 : index
    %c0_321 = arith.constant 0 : index
    %c0_322 = arith.constant 0 : index
    %313 = vector.load %arg4[%c14_320, %c0_321, %c0_322] : memref<16x64x128xbf16, #tpu.memory_space<vmem>>, vector<1x64x128xbf16>
    %314 = vector.shape_cast %313 : vector<1x64x128xbf16> to vector<64x128xbf16>
    %cst_323 = arith.constant dense<0.000000e+00> : vector<128x128xf32>
    %315 = tpu.matmul %312, %314, %cst_323 {dimension_numbers = #tpu.dot_dimension_numbers<[1], [0], [0], [1], [0, 0, 1, 1], [], []>} : vector<128x64xbf16>, vector<64x128xbf16>, vector<128x128xf32> -> vector<128x128xf32>
    %316 = arith.addf %308, %315 : vector<128x128xf32>
    %c1_324 = arith.constant 1 : index
    %c1_325 = arith.constant 1 : index
    %c9_326 = arith.constant 9 : index
    %c1_327 = arith.constant 1 : index
    %c0_328 = arith.constant 0 : index
    %317 = vector.load %arg8[%c1_324, %c1_325, %c9_326, %c1_327, %c0_328] : memref<2x2x17x17x64xf32, #tpu.memory_space<vmem>>, vector<1x1x8x16x64xf32>
    %318 = vector.shape_cast %317 : vector<1x1x8x16x64xf32> to vector<8x16x64xf32>
    %319 = vector.shape_cast %318 : vector<8x16x64xf32> to vector<128x64xf32>
    %320 = arith.truncf %319 : vector<128x64xf32> to vector<128x64xbf16>
    %c15_329 = arith.constant 15 : index
    %c0_330 = arith.constant 0 : index
    %c0_331 = arith.constant 0 : index
    %321 = vector.load %arg4[%c15_329, %c0_330, %c0_331] : memref<16x64x128xbf16, #tpu.memory_space<vmem>>, vector<1x64x128xbf16>
    %322 = vector.shape_cast %321 : vector<1x64x128xbf16> to vector<64x128xbf16>
    %cst_332 = arith.constant dense<0.000000e+00> : vector<128x128xf32>
    %323 = tpu.matmul %320, %322, %cst_332 {dimension_numbers = #tpu.dot_dimension_numbers<[1], [0], [0], [1], [0, 0, 1, 1], [], []>} : vector<128x64xbf16>, vector<64x128xbf16>, vector<128x128xf32> -> vector<128x128xf32>
    %324 = arith.addf %316, %323 : vector<128x128xf32>
    %325 = vector.broadcast %55 : vector<1x128xf32> to vector<128x128xf32>
    %326 = arith.addf %324, %325 : vector<128x128xf32>
    %cst_333 = arith.constant 2.000000e-01 : f32
    %327 = vector.broadcast %cst_333 : f32 to vector<128x128xf32>
    %328 = arith.mulf %327, %326 : vector<128x128xf32>
    %329 = arith.maximumf %326, %328 : vector<128x128xf32>
    %c128 = arith.constant 128 : index
    %c0_334 = arith.constant 0 : index
    %330 = vector.load %arg6[%c128, %c0_334] : memref<256x128xf32, #tpu.memory_space<vmem>>, vector<128x128xf32>
    %331 = arith.mulf %329, %330 : vector<128x128xf32>
    %cst_335 = arith.constant dense<0.000000e+00> : vector<128xf32>
    %332 = vector.multi_reduction <add>, %331, %cst_335 [0] : vector<128x128xf32> to vector<128xf32>
    %333 = vector.shape_cast %332 : vector<128xf32> to vector<1x128xf32>
    %334 = arith.addf %195, %333 : vector<1x128xf32>
    %335 = vector.shape_cast %334 : vector<1x128xf32> to vector<1x1x128xf32>
    %c0_336 = arith.constant 0 : index
    %c0_337 = arith.constant 0 : index
    %c0_338 = arith.constant 0 : index
    %336 = vector.load %arg7[%c0_336, %c0_337, %c0_338] : memref<1x1x128xf32, #tpu.memory_space<vmem>>, vector<1x1x128xf32>
    tpu.vector_store %arg7[%c0_336, %c0_337, %c0_338], %335 {strides = array<i32>} : memref<1x1x128xf32, #tpu.memory_space<vmem>>, vector<1x1x128xf32>,
    return
  }
  func.func @transform_0(%arg0: i32) -> (i32, i32, i32) {
    %c0_i32 = arith.constant 0 : i32
    %c0_i32_0 = arith.constant 0 : i32
    %c0_i32_1 = arith.constant 0 : i32
    return %arg0, %c0_i32, %c0_i32_0 : i32, i32, i32
  }
  func.func @transform_1(%arg0: i32) -> (i32, i32) {
    %c0_i32 = arith.constant 0 : i32
    %c0_i32_0 = arith.constant 0 : i32
    %c0_i32_1 = arith.constant 0 : i32
    return %c0_i32, %c0_i32_0 : i32, i32
  }
  func.func @transform_2(%arg0: i32) -> (i32, i32) {
    %c0_i32 = arith.constant 0 : i32
    %c0_i32_0 = arith.constant 0 : i32
    %c0_i32_1 = arith.constant 0 : i32
    return %c0_i32, %c0_i32_0 : i32, i32
  }
  func.func @transform_3(%arg0: i32) -> (i32, i32, i32) {
    %c0_i32 = arith.constant 0 : i32
    %c0_i32_0 = arith.constant 0 : i32
    %c0_i32_1 = arith.constant 0 : i32
    %c0_i32_2 = arith.constant 0 : i32
    return %c0_i32, %c0_i32_0, %c0_i32_1 : i32, i32, i32
  }
  func.func @transform_4(%arg0: i32) -> (i32, i32) {
    %c0_i32 = arith.constant 0 : i32
    %c0_i32_0 = arith.constant 0 : i32
    %c0_i32_1 = arith.constant 0 : i32
    return %c0_i32, %c0_i32_0 : i32, i32
  }
  func.func @transform_5(%arg0: i32) -> (i32, i32) {
    %c0_i32 = arith.constant 0 : i32
    %c0_i32_0 = arith.constant 0 : i32
    %c0_i32_1 = arith.constant 0 : i32
    return %c0_i32, %c0_i32_0 : i32, i32
  }
  func.func @transform_6(%arg0: i32) -> (i32, i32, i32) {
    %c0_i32 = arith.constant 0 : i32
    %c0_i32_0 = arith.constant 0 : i32
    %c0_i32_1 = arith.constant 0 : i32
    return %arg0, %c0_i32, %c0_i32_0 : i32, i32, i32
  }
}

</mosaic_0001>

<bundles_post_ra>
// kernel: discriminator_forward.1
= control target key start
LH: loop header
LB: loop body
LE: loop exit
PB: predicated region body
PF: predicated region fallthrough
CT: control target
= control target key end

     0   :  { %s10763_s21 = smov 0   ;;  %s12597_s0 = inlined_call_operand.vmem [shape: bf16[2,1024,48], index: 0, kind: input, shape index: {}]   ;;  %s12598_s1 = inlined_call_operand.vmem [shape: bf16[48,64], index: 1, kind: input, shape index: {}]   ;;  %s12599_s2 = inlined_call_operand.vmem [shape: f32[1,64], index: 2, kind: input, shape index: {}]   ;;  %s12600_s3 = inlined_call_operand.vmem [shape: bf16[16,64,128], index: 3, kind: input, shape index: {}]   ;;  %s12601_s4 = inlined_call_operand.vmem [shape: f32[1,128], index: 4, kind: input, shape index: {}]   ;;  %s12602_s5 = inlined_call_operand.vmem [shape: f32[256,128], index: 5, kind: input, shape index: {}]   ;;  %s12603_s6 = inlined_call_operand.vmem [shape: f32[2,1,128], index: 6, kind: output, shape index: {}]  }
   0x1 LB: > { %s8116_s22 = sadd.s32 4294967295, %s10725_s21   ;;  %p8120_p0 = scmp.ge.s32.totalorder %s10725_s21, 1  ;;  %s10725_s21 = sphi %s10763_s21, %s16_s21  }
   0x2   : > { %p212_p1 = scmp.lt.s32.totalorder %s10725_s21, 3 }
   0x4   : > { %p213_p2 = pnand %p8120_p0, %p212_p1 }
   0x5   : > { %v10577_v0 = vld [vmem:[%s12598_s1] sm:$0xff] (!%p213_p2)   ;;  %p240_p3 = scmp.lt.s32.totalorder (!%p213_p2), %s8116_s22, 1  ;;  %v10578_v1 = vld [vmem:[%s12598_s1 + $0x8] sm:$0xff] (!%p213_p2)   ;;  %v10579_v2 = vld [vmem:[%s12598_s1 + $0x10] sm:$0xff] (!%p213_p2)   ;;  %vm598_vm0 = vcmask (!%p213_p2), 392192   ;;  %vm249_vm1 = vcmask (!%p213_p2), 523264  }
   0x6   : > { %216 = sbr.rel (%p213_p2) target bundleno = 1093 (0x445), region = 44  ;;  %9168 = vmatprep.subr.bf16.mxu0 (!%p213_p2), %v10577_v0  ;;  %v10587_v3 = vld [vmem:[%s12598_s1] sm:$0xff] (!%p213_p2)   ;;  %v10588_v4 = vld [vmem:[%s12598_s1 + $0x8] sm:$0xff] (!%p213_p2)   ;;  %v10811_v10 = vld [vmem:[%s12598_s1 + $0x10] sm:$0xff] (!%p213_p2)   ;;  %v10727_v11 = vmov (!%p213_p2), 0.0   ;;  %vm252_vm2 = vcmask (!%p213_p2), 516096  }
   0x7   : > { %9169 = vmatpush3.bf16.msra.mxu0 (!%p213_p2), %v10577_v0  ;;  %9206 = vmatprep.subr.bf16.mxu1 (!%p213_p2), %v10587_v3  ;;  %v10582_v6 = vld [vmem:[%s12598_s1] sm:$0xff] (!%p213_p2)   ;;  %v10804_v9 = vld [vmem:[%s12598_s1 + $0x8] sm:$0xff] (!%p213_p2)   ;;  %407 = vst.msk [vmem:[#allocation2 + $0x4e0] sm:$0xff] (!%p213_p2), %vm249_vm1, %v10727_v11  ;;  %250 = vst.msk [vmem:[#allocation2] sm:$0xff] (!%p213_p2), %vm249_vm1, %v10727_v11 }
   0x8   : > { %9170 = vmatprep.subr.bf16.mxu0 (!%p213_p2), %v10578_v1  ;;  %9207 = vmatpush3.bf16.msra.mxu1 (!%p213_p2), %v10587_v3  ;;  %251 = vst.msk [vmem:[#allocation2 + $0x8] sm:$0xff] (!%p213_p2), %vm249_vm1, %v10727_v11  ;;  %254 = vst.msk [vmem:[#allocation2 + $0x18] sm:$0xff] (!%p213_p2), %vm249_vm1, %v10727_v11  ;;  %v10597_v16 = vld [vmem:[%s12598_s1] sm:$0xff] (!%p213_p2)   ;;  %v10603_v21 = vld [vmem:[%s12598_s1 + $0x10] sm:$0xff] (!%p213_p2)  }
   0x9   : > { %9208 = vmatprep.subr.bf16.mxu1 (!%p213_p2), %v10588_v4  ;;  %255 = vst.msk [vmem:[#allocation2 + $0x20] sm:$0xff] (!%p213_p2), %vm249_vm1, %v10727_v11  ;;  %257 = vst.msk [vmem:[#allocation2 + $0x30] sm:$0xff] (!%p213_p2), %vm249_vm1, %v10727_v11  ;;  %v10609_v24 = vld [vmem:[%s12598_s1 + $0x8] sm:$0xff] (!%p213_p2)   ;;  %v10621_v32 = vld [vmem:[%s12598_s1 + $0x10] sm:$0xff] (!%p213_p2)  }
   0xa   : > { %258 = vst.msk [vmem:[#allocation2 + $0x38] sm:$0xff] (!%p213_p2), %vm249_vm1, %v10727_v11  ;;  %260 = vst.msk [vmem:[#allocation2 + $0x48] sm:$0xff] (!%p213_p2), %vm249_vm1, %v10727_v11 }
   0xb   : > { %9171 = vmatpush3.bf16.msra.mxu0 (!%p213_p2), %v10578_v1  ;;  %261 = vst.msk [vmem:[#allocation2 + $0x50] sm:$0xff] (!%p213_p2), %vm249_vm1, %v10727_v11  ;;  %263 = vst.msk [vmem:[#allocation2 + $0x60] sm:$0xff] (!%p213_p2), %vm249_vm1, %v10727_v11 }
   0xc   : > { %9172 = vmatprep.subr.bf16.mxu0 (!%p213_p2), %v10579_v2  ;;  %9209 = vmatpush3.bf16.msra.mxu1 (!%p213_p2), %v10588_v4  ;;  %264 = vst.msk [vmem:[#allocation2 + $0x68] sm:$0xff] (!%p213_p2), %vm249_vm1, %v10727_v11  ;;  %266 = vst.msk [vmem:[#allocation2 + $0x78] sm:$0xff] (!%p213_p2), %vm249_vm1, %v10727_v11 }
   0xd   : > { %s12605_s22 = smov (!%p240_p3, %s8116_s22), 1  ;;  %267 = vst.msk [vmem:[#allocation2 + $0x80] sm:$0xff] %vm249_vm1, %v10727_v11  ;;  %269 = vst.msk [vmem:[#allocation2 + $0x90] sm:$0xff] %vm249_vm1, %v10727_v11  ;;  %9210 = vmatprep.subr.bf16.mxu1 %v10811_v10 }
   0xe   : > { %s8707_s29 = sshll.u32 %s12605_s22, 9  ;;  %270 = vst.msk [vmem:[#allocation2 + $0x98] sm:$0xff] %vm249_vm1, %v10727_v11  ;;  %272 = vst.msk [vmem:[#allocation2 + $0xa8] sm:$0xff] %vm249_vm1, %v10727_v11  ;;  %s247_s9 = scalar_lea.vmem %s12603_s6, %s12605_s22 }
   0xf   : > { %s10789_s10 = scalar_lea.vmem %s12597_s0, %s8707_s29  ;;  %9173 = vmatpush3.bf16.msra.mxu0 %v10579_v2  ;;  %273 = vst.msk [vmem:[#allocation2 + $0xb0] sm:$0xff] %vm249_vm1, %v10727_v11  ;;  %275 = vst.msk [vmem:[#allocation2 + $0xc0] sm:$0xff] %vm249_vm1, %v10727_v11 }
  0x10   : > { %v10580_v5 = vld [vmem:[%s10789_s10] sm:$0xff]   ;;  %v10581_v7 = vld [vmem:[%s10789_s10 + $0x8] sm:$0xff]   ;;  %v10583_v8 = vld [vmem:[%s10789_s10 + $0x10] sm:$0xff]   ;;  %9244 = vmatprep.subr.bf16.mxu0 %v10582_v6  ;;  %276 = vst.msk [vmem:[#allocation2 + $0xc8] sm:$0xff] %vm249_vm1, %v10727_v11  ;;  %9211 = vmatpush3.bf16.msra.mxu1 %v10811_v10 }
  0x11   : > { %9174 = vmatprep.mubr.msk.bf16.mxu0 %vm598_vm0, %v10580_v5  ;;  %278 = vst.msk [vmem:[#allocation2 + $0xd8] sm:$0xff] %vm249_vm1, %v10727_v11  ;;  %279 = vst.msk [vmem:[#allocation2 + $0xe0] sm:$0xff] %vm249_vm1, %v10727_v11  ;;  %v10593_v12 = vld [vmem:[%s10789_s10 + $0x80] sm:$0xff]   ;;  %v10594_v13 = vld [vmem:[%s10789_s10 + $0x88] sm:$0xff]   ;;  %9282 = vmatprep.subr.bf16.mxu1 %v10597_v16 }
  0x12   : > { %9175 = vmatmul.mubr.msk.bf16.vlgmr.msra.gmra.mrb[0].mxu0 %vm598_vm0, %v10581_v7  ;;  %281 = vst.msk [vmem:[#allocation2 + $0xf0] sm:$0xff] %vm249_vm1, %v10727_v11  ;;  %282 = vst.msk [vmem:[#allocation2 + $0xf8] sm:$0xff] %vm249_vm1, %v10727_v11  ;;  %v10584_v14 = vld [vmem:[%s10789_s10 + $0x18] sm:$0xff]   ;;  %9212 = vmatprep.mubr.msk.bf16.mxu1 %vm598_vm0, %v10593_v12  ;;  %v10585_v15 = vld [vmem:[%s10789_s10 + $0x20] sm:$0xff]  }
  0x13   : > { %9245 = vmatpush3.bf16.msra.mxu0 %v10582_v6  ;;  %9178 = vmatprep.mubr.msk.bf16.mxu0 %vm598_vm0, %v10583_v8  ;;  %284 = vst.msk [vmem:[#allocation2 + $0x108] sm:$0xff] %vm249_vm1, %v10727_v11  ;;  %285 = vst.msk [vmem:[#allocation2 + $0x110] sm:$0xff] %vm249_vm1, %v10727_v11  ;;  %v10598_v17 = vld [vmem:[%s10789_s10 + $0x90] sm:$0xff]   ;;  %v10586_v18 = vld [vmem:[%s10789_s10 + $0x28] sm:$0xff]  }
  0x14   : > { %287 = vst.msk [vmem:[#allocation2 + $0x120] sm:$0xff] %vm249_vm1, %v10727_v11  ;;  %288 = vst.msk [vmem:[#allocation2 + $0x128] sm:$0xff] %vm249_vm1, %v10727_v11  ;;  %9246 = vmatprep.subr.bf16.mxu0 %v10804_v9  ;;  %9213 = vmatmul.mubr.msk.bf16.vlgmr.msra.gmra.mrb[0].mxu1 %vm598_vm0, %v10594_v13  ;;  %v10599_v19 = vld [vmem:[%s10789_s10 + $0x98] sm:$0xff]   ;;  %v10602_v20 = vld [vmem:[%s10789_s10 + $0xa0] sm:$0xff]  }
  0x15   : > { %290 = vst.msk [vmem:[#allocation2 + $0x138] sm:$0xff] %vm249_vm1, %v10727_v11  ;;  %291 = vst.msk [vmem:[#allocation2 + $0x140] sm:$0xff] %vm249_vm1, %v10727_v11  ;;  %9283 = vmatpush3.bf16.msra.mxu1 %v10597_v16  ;;  %9216 = vmatprep.mubr.msk.bf16.mxu1 %vm598_vm0, %v10598_v17  ;;  %v10590_v22 = vld [vmem:[%s10789_s10 + $0x30] sm:$0xff]   ;;  %v10591_v23 = vld [vmem:[%s10789_s10 + $0x38] sm:$0xff]  }
  0x16   : > { %293 = vst.msk [vmem:[#allocation2 + $0x150] sm:$0xff] %vm249_vm1, %v10727_v11  ;;  %294 = vst.msk [vmem:[#allocation2 + $0x158] sm:$0xff] %vm249_vm1, %v10727_v11  ;;  %v10604_v25 = vld [vmem:[%s10789_s10 + $0xa8] sm:$0xff]   ;;  %v10607_v26 = vld [vmem:[%s10789_s10 + $0xb0] sm:$0xff]   ;;  %9284 = vmatprep.subr.bf16.mxu1 %v10609_v24 }
  0x17   : > { %296 = vst.msk [vmem:[#allocation2 + $0x168] sm:$0xff] %vm249_vm1, %v10727_v11  ;;  %297 = vst.msk [vmem:[#allocation2 + $0x170] sm:$0xff] %vm249_vm1, %v10727_v11  ;;  %9247 = vmatpush3.bf16.msra.mxu0 %v10804_v9  ;;  %v10595_v27 = vld [vmem:[%s10789_s10 + $0x40] sm:$0xff]   ;;  %v10596_v28 = vld [vmem:[%s10789_s10 + $0x48] sm:$0xff]  }
  0x18   : > { %299 = vst.msk [vmem:[#allocation2 + $0x180] sm:$0xff] %vm249_vm1, %v10727_v11  ;;  %300 = vst.msk [vmem:[#allocation2 + $0x188] sm:$0xff] %vm249_vm1, %v10727_v11  ;;  %9248 = vmatprep.subr.bf16.mxu0 %v10603_v21  ;;  %v10608_v29 = vld [vmem:[%s10789_s10 + $0xb8] sm:$0xff]   ;;  %v10612_v30 = vld [vmem:[%s10789_s10 + $0xc0] sm:$0xff]  }
  0x19   : > { %302 = vst.msk [vmem:[#allocation2 + $0x198] sm:$0xff] %vm249_vm1, %v10727_v11  ;;  %303 = vst.msk [vmem:[#allocation2 + $0x1a0] sm:$0xff] %vm249_vm1, %v10727_v11  ;;  %9285 = vmatpush3.bf16.msra.mxu1 %v10609_v24  ;;  %v10600_v31 = vld [vmem:[%s10789_s10 + $0x50] sm:$0xff]   ;;  %v10601_v33 = vld [vmem:[%s10789_s10 + $0x58] sm:$0xff]  }
  0x1a   : > { %305 = vst.msk [vmem:[#allocation2 + $0x1b0] sm:$0xff] %vm249_vm1, %v10727_v11  ;;  %306 = vst.msk [vmem:[#allocation2 + $0x1b8] sm:$0xff] %vm249_vm1, %v10727_v11  ;;  %9179 = vmatmul.mubr.msk.bf16.gmra.mrb[4].mxu0 %vm598_vm0, %v10584_v14  ;;  %9286 = vmatprep.subr.bf16.mxu1 %v10621_v32  ;;  %v10613_v34 = vld [vmem:[%s10789_s10 + $0xc8] sm:$0xff]   ;;  %v10616_v35 = vld [vmem:[%s10789_s10 + $0xd0] sm:$0xff]  }
  0x1b   : > { %308 = vst.msk [vmem:[#allocation2 + $0x1c8] sm:$0xff] %vm249_vm1, %v10727_v11  ;;  %309 = vst.msk [vmem:[#allocation2 + $0x1d0] sm:$0xff] %vm249_vm1, %v10727_v11  ;;  %9182 = vmatprep.mubr.msk.bf16.mxu0 %vm598_vm0, %v10585_v15  ;;  %9249 = vmatpush3.bf16.msra.mxu0 %v10603_v21  ;;  %v10605_v36 = vld [vmem:[%s10789_s10 + $0x60] sm:$0xff]   ;;  %v10606_v37 = vld [vmem:[%s10789_s10 + $0x68] sm:$0xff]  }
  0x1c   : > { %311 = vst.msk [vmem:[#allocation2 + $0x1e0] sm:$0xff] %vm249_vm1, %v10727_v11  ;;  %312 = vst.msk [vmem:[#allocation2 + $0x1e8] sm:$0xff] %vm249_vm1, %v10727_v11  ;;  %9217 = vmatmul.mubr.msk.bf16.gmra.mrb[4].mxu1 %vm598_vm0, %v10599_v19  ;;  %v10617_v38 = vld [vmem:[%s10789_s10 + $0xd8] sm:$0xff]   ;;  %v10620_v39 = vld [vmem:[%s10789_s10 + $0xe0] sm:$0xff]  }
  0x1d   : > { %314 = vst.msk [vmem:[#allocation2 + $0x1f8] sm:$0xff] %vm249_vm1, %v10727_v11  ;;  %315 = vst.msk [vmem:[#allocation2 + $0x200] sm:$0xff] %vm249_vm1, %v10727_v11  ;;  %9220 = vmatprep.mubr.msk.bf16.mxu1 %vm598_vm0, %v10602_v20  ;;  %9287 = vmatpush3.bf16.msra.mxu1 %v10621_v32  ;;  %v10610_v40 = vld [vmem:[%s10789_s10 + $0x70] sm:$0xff]   ;;  %v10611_v41 = vld [vmem:[%s10789_s10 + $0x78] sm:$0xff]  }
  0x1e   : > { %317 = vst.msk [vmem:[#allocation2 + $0x210] sm:$0xff] %vm249_vm1, %v10727_v11  ;;  %318 = vst.msk [vmem:[#allocation2 + $0x218] sm:$0xff] %vm249_vm1, %v10727_v11  ;;  %v10622_v42 = vld [vmem:[%s10789_s10 + $0xe8] sm:$0xff]   ;;  %v10625_v43 = vld [vmem:[%s10789_s10 + $0xf0] sm:$0xff]  }
  0x1f   : > { %320 = vst.msk [vmem:[#allocation2 + $0x228] sm:$0xff] %vm249_vm1, %v10727_v11  ;;  %321 = vst.msk [vmem:[#allocation2 + $0x230] sm:$0xff] %vm249_vm1, %v10727_v11  ;;  %v10614_v44 = vld [vmem:[%s10789_s10 + $0x100] sm:$0xff]   ;;  %v10615_v45 = vld [vmem:[%s10789_s10 + $0x108] sm:$0xff]  }
  0x20   : > { %323 = vst.msk [vmem:[#allocation2 + $0x240] sm:$0xff] %vm249_vm1, %v10727_v11  ;;  %324 = vst.msk [vmem:[#allocation2 + $0x248] sm:$0xff] %vm249_vm1, %v10727_v11  ;;  %v10626_v46 = vld [vmem:[%s10789_s10 + $0xf8] sm:$0xff]   ;;  %v10629_v47 = vld [vmem:[%s10789_s10 + $0x180] sm:$0xff]  }
  0x21   : > { %326 = vst.msk [vmem:[#allocation2 + $0x258] sm:$0xff] %vm249_vm1, %v10727_v11  ;;  %327 = vst.msk [vmem:[#allocation2 + $0x260] sm:$0xff] %vm249_vm1, %v10727_v11  ;;  %v10618_v48 = vld [vmem:[%s10789_s10 + $0x110] sm:$0xff]   ;;  %v10630_v49 = vld [vmem:[%s10789_s10 + $0x188] sm:$0xff]  }
  0x22   : > { %329 = vst.msk [vmem:[#allocation2 + $0x270] sm:$0xff] %vm249_vm1, %v10727_v11  ;;  %330 = vst.msk [vmem:[#allocation2 + $0x278] sm:$0xff] %vm249_vm1, %v10727_v11  ;;  %9183 = vmatmul.mubr.msk.bf16.gmra.mrb[8].mxu0 %vm598_vm0, %v10586_v18  ;;  %v10619_v50 = vld [vmem:[%s10789_s10 + $0x118] sm:$0xff]   ;;  %v10633_v51 = vld [vmem:[%s10789_s10 + $0x190] sm:$0xff]  }
  0x23   : > { %332 = vst.msk [vmem:[#allocation2 + $0x288] sm:$0xff] %vm249_vm1, %v10727_v11  ;;  %333 = vst.msk [vmem:[#allocation2 + $0x290] sm:$0xff] %vm249_vm1, %v10727_v11  ;;  %9186 = vmatprep.mubr.msk.bf16.mxu0 %vm598_vm0, %v10590_v22  ;;  %v10623_v52 = vld [vmem:[%s10789_s10 + $0x120] sm:$0xff]   ;;  %v10634_v53 = vld [vmem:[%s10789_s10 + $0x198] sm:$0xff]  }
  0x24   : > { %335 = vst.msk [vmem:[#allocation2 + $0x2a0] sm:$0xff] %vm249_vm1, %v10727_v11  ;;  %336 = vst.msk [vmem:[#allocation2 + $0x2a8] sm:$0xff] %vm249_vm1, %v10727_v11  ;;  %9221 = vmatmul.mubr.msk.bf16.gmra.mrb[8].mxu1 %vm598_vm0, %v10604_v25  ;;  %v10624_v54 = vld [vmem:[%s10789_s10 + $0x128] sm:$0xff]   ;;  %v10637_v55 = vld [vmem:[%s10789_s10 + $0x1a0] sm:$0xff]  }
  0x25   : > { %338 = vst.msk [vmem:[#allocation2 + $0x2b8] sm:$0xff] %vm249_vm1, %v10727_v11  ;;  %339 = vst.msk [vmem:[#allocation2 + $0x2c0] sm:$0xff] %vm249_vm1, %v10727_v11  ;;  %9224 = vmatprep.mubr.msk.bf16.mxu1 %vm598_vm0, %v10607_v26  ;;  %v10627_v56 = vld [vmem:[%s10789_s10 + $0x130] sm:$0xff]   ;;  %v10638_v57 = vld [vmem:[%s10789_s10 + $0x1a8] sm:$0xff]  }
  0x26   : > { %341 = vst.msk [vmem:[#allocation2 + $0x2d0] sm:$0xff] %vm249_vm1, %v10727_v11  ;;  %342 = vst.msk [vmem:[#allocation2 + $0x2d8] sm:$0xff] %vm249_vm1, %v10727_v11  ;;  %v10628_v58 = vld [vmem:[%s10789_s10 + $0x138] sm:$0xff]   ;;  %v10631_v59 = vld [vmem:[%s10789_s10 + $0x140] sm:$0xff]  }
  0x27   : > { %344 = vst.msk [vmem:[#allocation2 + $0x2e8] sm:$0xff] %vm249_vm1, %v10727_v11  ;;  %345 = vst.msk [vmem:[#allocation2 + $0x2f0] sm:$0xff] %vm249_vm1, %v10727_v11  ;;  %v10641_v60 = vld [vmem:[%s10789_s10 + $0x1b0] sm:$0xff]   ;;  %v11192_v61 = vld [vmem:[%s10789_s10 + $0x1b8] sm:$0xff]  }
  0x28   : > { %347 = vst.msk [vmem:[#allocation2 + $0x300] sm:$0xff] %vm249_vm1, %v10727_v11  ;;  %348 = vst.msk [vmem:[#allocation2 + $0x308] sm:$0xff] %vm249_vm1, %v10727_v11  ;;  %v11195_v62 = vld [vmem:[%s10789_s10 + $0x148] sm:$0xff]   ;;  %v11198_v63 = vld [vmem:[%s10789_s10 + $0x150] sm:$0xff]  }
  0x29   : > { %350 = vst.msk [vmem:[#allocation2 + $0x318] sm:$0xff] %vm249_vm1, %v10727_v11  ;;  %351 = vst.msk [vmem:[#allocation2 + $0x320] sm:$0xff] %vm249_vm1, %v10727_v11  ;;  %v11201_v0 = vld [vmem:[%s10789_s10 + $0x1c0] sm:$0xff]   ;;  %v10646_v1 = vld [vmem:[%s10789_s10 + $0x1c8] sm:$0xff]  }
  0x2a   : > { %353 = vst.msk [vmem:[#allocation2 + $0x330] sm:$0xff] %vm249_vm1, %v10727_v11  ;;  %354 = vst.msk [vmem:[#allocation2 + $0x338] sm:$0xff] %vm249_vm1, %v10727_v11  ;;  %9187 = vmatmul.mubr.msk.bf16.gmra.mrb[12].mxu0 %vm598_vm0, %v10591_v23  ;;  %v10636_v2 = vld [vmem:[%s10789_s10 + $0x158] sm:$0xff]   ;;  %v10647_v3 = vld [vmem:[%s10789_s10 + $0x1d0] sm:$0xff]  }
  0x2b   : > { %356 = vst.msk [vmem:[#allocation2 + $0x348] sm:$0xff] %vm249_vm1, %v10727_v11  ;;  %357 = vst.msk [vmem:[#allocation2 + $0x350] sm:$0xff] %vm249_vm1, %v10727_v11  ;;  %9190 = vmatprep.mubr.msk.bf16.mxu0 %vm598_vm0, %v10595_v27  ;;  %v10639_v4 = vld [vmem:[%s10789_s10 + $0x160] sm:$0xff]   ;;  %v10648_v5 = vld [vmem:[%s10789_s10 + $0x1d8] sm:$0xff]  }
  0x2c   : > { %359 = vst.msk [vmem:[#allocation2 + $0x360] sm:$0xff] %vm249_vm1, %v10727_v11  ;;  %360 = vst.msk [vmem:[#allocation2 + $0x368] sm:$0xff] %vm249_vm1, %v10727_v11  ;;  %9225 = vmatmul.mubr.msk.bf16.gmra.mrb[12].mxu1 %vm598_vm0, %v10608_v29  ;;  %v10640_v6 = vld [vmem:[%s10789_s10 + $0x168] sm:$0xff]   ;;  %v10649_v7 = vld [vmem:[%s10789_s10 + $0x1e0] sm:$0xff]  }
  0x2d   : > { %362 = vst.msk [vmem:[#allocation2 + $0x378] sm:$0xff] %vm249_vm1, %v10727_v11  ;;  %363 = vst.msk [vmem:[#allocation2 + $0x380] sm:$0xff] %vm249_vm1, %v10727_v11  ;;  %9228 = vmatprep.mubr.msk.bf16.mxu1 %vm598_vm0, %v10612_v30  ;;  %v10643_v8 = vld [vmem:[%s10789_s10 + $0x170] sm:$0xff]   ;;  %v10650_v9 = vld [vmem:[%s10789_s10 + $0x1e8] sm:$0xff]  }
  0x2e   : > { %365 = vst.msk [vmem:[#allocation2 + $0x390] sm:$0xff] %vm249_vm1, %v10727_v11  ;;  %366 = vst.msk [vmem:[#allocation2 + $0x398] sm:$0xff] %vm249_vm1, %v10727_v11  ;;  %v10644_v10 = vld [vmem:[%s10789_s10 + $0x178] sm:$0xff]   ;;  %v10653_v13 = vld [vmem:[%s12600_s3 + $0x20] sm:$0xff]  }
  0x2f   : > { %368 = vst.msk [vmem:[#allocation2 + $0x3a8] sm:$0xff] %vm249_vm1, %v10727_v11  ;;  %369 = vst.msk [vmem:[#allocation2 + $0x3b0] sm:$0xff] %vm249_vm1, %v10727_v11  ;;  %v10652_v12 = vld [vmem:[%s10789_s10 + $0x1f8] sm:$0xff]   ;;  %9320 = vmatprep.subr.bf16.mxu0 %v10653_v13  ;;  %9704 = vmatprep.subr.bf16.mxu1 %v10653_v13  ;;  %v10654_v14 = vld [vmem:[%s12600_s3 + $0x28] sm:$0xff]  }
  0x30   : > { %371 = vst.msk [vmem:[#allocation2 + $0x3c0] sm:$0xff] %vm249_vm1, %v10727_v11  ;;  %372 = vst.msk [vmem:[#allocation2 + $0x3c8] sm:$0xff] %vm249_vm1, %v10727_v11  ;;  %v10655_v15 = vld [vmem:[%s12600_s3 + $0x30] sm:$0xff]   ;;  %v10656_v16 = vld [vmem:[%s12600_s3 + $0x38] sm:$0xff]  }
  0x31   : > { %374 = vst.msk [vmem:[#allocation2 + $0x3d8] sm:$0xff] %vm249_vm1, %v10727_v11  ;;  %375 = vst.msk [vmem:[#allocation2 + $0x3e0] sm:$0xff] %vm249_vm1, %v10727_v11  ;;  %v2265_v17 = vld [vmem:[#allocation2 + $0x198] sm:$0xff]  ;;  %v2266_v18 = vld [vmem:[#allocation2 + $0x1a0] sm:$0xff] }
  0x32   : > { %377 = vst.msk [vmem:[#allocation2 + $0x3f0] sm:$0xff] %vm249_vm1, %v10727_v11  ;;  %378 = vst.msk [vmem:[#allocation2 + $0x3f8] sm:$0xff] %vm249_vm1, %v10727_v11  ;;  %9191 = vmatmul.mubr.msk.bf16.gmra.mrb[16].mxu0 %vm598_vm0, %v10596_v28  ;;  %v2281_v19 = vpack.c.bf16 %v2266_v18, %v2265_v17  ;;  %v11387_v20 = vld [vmem:[%s12600_s3] sm:$0xff]  }
  0x33   : > { %380 = vst.msk [vmem:[#allocation2 + $0x408] sm:$0xff] %vm249_vm1, %v10727_v11  ;;  %381 = vst.msk [vmem:[#allocation2 + $0x410] sm:$0xff] %vm249_vm1, %v10727_v11  ;;  %9194 = vmatprep.mubr.msk.bf16.mxu0 %vm598_vm0, %v10600_v31  ;;  %v11394_v21 = vld [vmem:[%s12599_s2] ss:$0 sm:$0xff] }
  0x34   : > { %383 = vst.msk [vmem:[#allocation2 + $0x420] sm:$0xff] %vm249_vm1, %v10727_v11  ;;  %384 = vst.msk [vmem:[#allocation2 + $0x428] sm:$0xff] %vm249_vm1, %v10727_v11  ;;  %9229 = vmatmul.mubr.msk.bf16.gmra.mrb[16].mxu1 %vm598_vm0, %v10613_v34 }
  0x35   : > { %386 = vst.msk [vmem:[#allocation2 + $0x438] sm:$0xff] %vm249_vm1, %v10727_v11  ;;  %387 = vst.msk [vmem:[#allocation2 + $0x440] sm:$0xff] %vm249_vm1, %v10727_v11  ;;  %9232 = vmatprep.mubr.msk.bf16.mxu1 %vm598_vm0, %v10616_v35 }
  0x36   : > { %389 = vst.msk [vmem:[#allocation2 + $0x450] sm:$0xff] %vm249_vm1, %v10727_v11  ;;  %390 = vst.msk [vmem:[#allocation2 + $0x458] sm:$0xff] %vm249_vm1, %v10727_v11 }
  0x37   : > { %392 = vst.msk [vmem:[#allocation2 + $0x468] sm:$0xff] %vm249_vm1, %v10727_v11  ;;  %393 = vst.msk [vmem:[#allocation2 + $0x470] sm:$0xff] %vm249_vm1, %v10727_v11 }
  0x38   : > { %395 = vst.msk [vmem:[#allocation2 + $0x480] sm:$0xff] %vm249_vm1, %v10727_v11  ;;  %396 = vst.msk [vmem:[#allocation2 + $0x488] sm:$0xff] %vm249_vm1, %v10727_v11 }
  0x39   : > { %398 = vst.msk [vmem:[#allocation2 + $0x498] sm:$0xff] %vm249_vm1, %v10727_v11  ;;  %399 = vst.msk [vmem:[#allocation2 + $0x4a0] sm:$0xff] %vm249_vm1, %v10727_v11 }
  0x3a   : > { %401 = vst.msk [vmem:[#allocation2 + $0x4b0] sm:$0xff] %vm249_vm1, %v10727_v11  ;;  %402 = vst.msk [vmem:[#allocation2 + $0x4b8] sm:$0xff] %vm249_vm1, %v10727_v11  ;;  %9195 = vmatmul.mubr.msk.bf16.gmra.mrb[20].mxu0 %vm598_vm0, %v10601_v33 }
  0x3b   : > { %404 = vst.msk [vmem:[#allocation2 + $0x4c8] sm:$0xff] %vm249_vm1, %v10727_v11  ;;  %405 = vst.msk [vmem:[#allocation2 + $0x4d0] sm:$0xff] %vm249_vm1, %v10727_v11  ;;  %9198 = vmatprep.mubr.msk.bf16.mxu0 %vm598_vm0, %v10605_v36 }
  0x3c   : > { %408 = vst.msk [vmem:[#allocation2 + $0x4e8] sm:$0xff] %vm249_vm1, %v10727_v11  ;;  %410 = vst.msk [vmem:[#allocation2 + $0x4f8] sm:$0xff] %vm249_vm1, %v10727_v11  ;;  %9233 = vmatmul.mubr.msk.bf16.gmra.mrb[20].mxu1 %vm598_vm0, %v10617_v38 }
  0x3d   : > { %411 = vst.msk [vmem:[#allocation2 + $0x500] sm:$0xff] %vm249_vm1, %v10727_v11  ;;  %413 = vst.msk [vmem:[#allocation2 + $0x510] sm:$0xff] %vm249_vm1, %v10727_v11  ;;  %9236 = vmatprep.mubr.msk.bf16.mxu1 %vm598_vm0, %v10620_v39 }
  0x3e   : > { %414 = vst.msk [vmem:[#allocation2 + $0x518] sm:$0xff] %vm249_vm1, %v10727_v11  ;;  %416 = vst.msk [vmem:[#allocation2 + $0x528] sm:$0xff] %vm249_vm1, %v10727_v11 }
  0x3f   : > { %417 = vst.msk [vmem:[#allocation2 + $0x530] sm:$0xff] %vm249_vm1, %v10727_v11  ;;  %419 = vst.msk [vmem:[#allocation2 + $0x540] sm:$0xff] %vm249_vm1, %v10727_v11 }
  0x40   : > { %420 = vst.msk [vmem:[#allocation2 + $0x548] sm:$0xff] %vm249_vm1, %v10727_v11  ;;  %422 = vst.msk [vmem:[#allocation2 + $0x558] sm:$0xff] %vm249_vm1, %v10727_v11 }
  0x41   : > { %423 = vst.msk [vmem:[#allocation2 + $0x560] sm:$0xff] %vm249_vm1, %v10727_v11  ;;  %425 = vst.msk [vmem:[#allocation2 + $0x570] sm:$0xff] %vm249_vm1, %v10727_v11 }
  0x42   : > { %426 = vst.msk [vmem:[#allocation2 + $0x578] sm:$0xff] %vm249_vm1, %v10727_v11  ;;  %428 = vst.msk [vmem:[#allocation2 + $0x588] sm:$0xff] %vm249_vm1, %v10727_v11  ;;  %9199 = vmatmul.mubr.msk.bf16.gmra.mrb[24].mxu0 %vm598_vm0, %v10606_v37 }
  0x43   : > { %429 = vst.msk [vmem:[#allocation2 + $0x590] sm:$0xff] %vm249_vm1, %v10727_v11  ;;  %431 = vst.msk [vmem:[#allocation2 + $0x5a0] sm:$0xff] %vm249_vm1, %v10727_v11  ;;  %9202 = vmatprep.mubr.msk.bf16.mxu0 %vm598_vm0, %v10610_v40 }
  0x44   : > { %432 = vst.msk [vmem:[#allocation2 + $0x5a8] sm:$0xff] %vm249_vm1, %v10727_v11  ;;  %434 = vst.msk [vmem:[#allocation2 + $0x5b8] sm:$0xff] %vm249_vm1, %v10727_v11  ;;  %9237 = vmatmul.mubr.msk.bf16.gmra.mrb[24].mxu1 %vm598_vm0, %v10622_v42 }
  0x45   : > { %435 = vst.msk [vmem:[#allocation2 + $0x5c0] sm:$0xff] %vm249_vm1, %v10727_v11  ;;  %437 = vst.msk [vmem:[#allocation2 + $0x5d0] sm:$0xff] %vm249_vm1, %v10727_v11  ;;  %9240 = vmatprep.mubr.msk.bf16.mxu1 %vm598_vm0, %v10625_v43 }
  0x46   : > { %438 = vst.msk [vmem:[#allocation2 + $0x5d8] sm:$0xff] %vm249_vm1, %v10727_v11  ;;  %440 = vst.msk [vmem:[#allocation2 + $0x5e8] sm:$0xff] %vm249_vm1, %v10727_v11 }
  0x47   : > { %441 = vst.msk [vmem:[#allocation2 + $0x5f0] sm:$0xff] %vm249_vm1, %v10727_v11  ;;  %443 = vst.msk [vmem:[#allocation2 + $0x600] sm:$0xff] %vm249_vm1, %v10727_v11 }
  0x48   : > { %444 = vst.msk [vmem:[#allocation2 + $0x608] sm:$0xff] %vm249_vm1, %v10727_v11  ;;  %446 = vst.msk [vmem:[#allocation2 + $0x618] sm:$0xff] %vm249_vm1, %v10727_v11 }
  0x49   : > { %447 = vst.msk [vmem:[#allocation2 + $0x620] sm:$0xff] %vm249_vm1, %v10727_v11  ;;  %449 = vst.msk [vmem:[#allocation2 + $0x630] sm:$0xff] %vm249_vm1, %v10727_v11 }
  0x4a   : > { %450 = vst.msk [vmem:[#allocation2 + $0x638] sm:$0xff] %vm249_vm1, %v10727_v11  ;;  %452 = vst.msk [vmem:[#allocation2 + $0x648] sm:$0xff] %vm249_vm1, %v10727_v11  ;;  %9203 = vmatmul.mubr.msk.bf16.gmra.mrb[28].mxu0 %vm598_vm0, %v10611_v41 }
  0x4b   : > { %453 = vst.msk [vmem:[#allocation2 + $0x650] sm:$0xff] %vm249_vm1, %v10727_v11  ;;  %9250 = vmatprep.mubr.msk.bf16.mxu0 %vm598_vm0, %v10614_v44 }
  0x4c   : > { %9241 = vmatmul.mubr.msk.bf16.gmra.mrb[28].mxu1 %vm598_vm0, %v10626_v46  ;;  %358 = vst.msk [vmem:[#allocation2 + $0x358] sm:$0x1] %vm252_vm2, %v10727_v11  ;;  %253 = vst.msk [vmem:[#allocation2 + $0x10] sm:$0x1] %vm252_vm2, %v10727_v11 }
  0x4d   : > { %9288 = vmatprep.mubr.msk.bf16.mxu1 %vm598_vm0, %v10629_v47  ;;  %256 = vst.msk [vmem:[#allocation2 + $0x28] sm:$0x1] %vm252_vm2, %v10727_v11  ;;  %259 = vst.msk [vmem:[#allocation2 + $0x40] sm:$0x1] %vm252_vm2, %v10727_v11 }
  0x4e   : > { %262 = vst.msk [vmem:[#allocation2 + $0x58] sm:$0x1] %vm252_vm2, %v10727_v11  ;;  %265 = vst.msk [vmem:[#allocation2 + $0x70] sm:$0x1] %vm252_vm2, %v10727_v11 }
  0x4f   : > { %268 = vst.msk [vmem:[#allocation2 + $0x88] sm:$0x1] %vm252_vm2, %v10727_v11  ;;  %271 = vst.msk [vmem:[#allocation2 + $0xa0] sm:$0x1] %vm252_vm2, %v10727_v11 }
  0x50   : > { %274 = vst.msk [vmem:[#allocation2 + $0xb8] sm:$0x1] %vm252_vm2, %v10727_v11  ;;  %277 = vst.msk [vmem:[#allocation2 + $0xd0] sm:$0x1] %vm252_vm2, %v10727_v11 }
  0x51   : > { %280 = vst.msk [vmem:[#allocation2 + $0xe8] sm:$0x1] %vm252_vm2, %v10727_v11  ;;  %283 = vst.msk [vmem:[#allocation2 + $0x100] sm:$0x1] %vm252_vm2, %v10727_v11 }
  0x52   : > { %9251 = vmatmul.mubr.msk.bf16.vlgmr.msra.gmra.mrb[32].mxu0 %vm598_vm0, %v10615_v45  ;;  %286 = vst.msk [vmem:[#allocation2 + $0x118] sm:$0x1] %vm252_vm2, %v10727_v11  ;;  %289 = vst.msk [vmem:[#allocation2 + $0x130] sm:$0x1] %vm252_vm2, %v10727_v11 }
  0x53   : > { %9254 = vmatprep.mubr.msk.bf16.mxu0 %vm598_vm0, %v10618_v48  ;;  %292 = vst.msk [vmem:[#allocation2 + $0x148] sm:$0x1] %vm252_vm2, %v10727_v11  ;;  %295 = vst.msk [vmem:[#allocation2 + $0x160] sm:$0x1] %vm252_vm2, %v10727_v11  ;;  %9321 = vmatpush3.bf16.msra.mxu0 %v10653_v13 }
  0x54   : > { %9289 = vmatmul.mubr.msk.bf16.vlgmr.msra.gmra.mrb[32].mxu1 %vm598_vm0, %v10630_v49  ;;  %298 = vst.msk [vmem:[#allocation2 + $0x178] sm:$0x1] %vm252_vm2, %v10727_v11  ;;  %301 = vst.msk [vmem:[#allocation2 + $0x190] sm:$0x1] %vm252_vm2, %v10727_v11  ;;  %9322 = vmatprep.subr.bf16.mxu0 %v10654_v14 }
  0x55   : > { %9292 = vmatprep.mubr.msk.bf16.mxu1 %vm598_vm0, %v10633_v51  ;;  %304 = vst.msk [vmem:[#allocation2 + $0x1a8] sm:$0x1] %vm252_vm2, %v10727_v11  ;;  %307 = vst.msk [vmem:[#allocation2 + $0x1c0] sm:$0x1] %vm252_vm2, %v10727_v11  ;;  %9705 = vmatpush3.bf16.msra.mxu1 %v10653_v13 }
  0x56   : > { %310 = vst.msk [vmem:[#allocation2 + $0x1d8] sm:$0x1] %vm252_vm2, %v10727_v11  ;;  %313 = vst.msk [vmem:[#allocation2 + $0x1f0] sm:$0x1] %vm252_vm2, %v10727_v11  ;;  %9706 = vmatprep.subr.bf16.mxu1 %v10654_v14 }
  0x57   : > { %316 = vst.msk [vmem:[#allocation2 + $0x208] sm:$0x1] %vm252_vm2, %v10727_v11  ;;  %319 = vst.msk [vmem:[#allocation2 + $0x220] sm:$0x1] %vm252_vm2, %v10727_v11  ;;  %9323 = vmatpush3.bf16.msra.mxu0 %v10654_v14 }
  0x58   : > { %322 = vst.msk [vmem:[#allocation2 + $0x238] sm:$0x1] %vm252_vm2, %v10727_v11  ;;  %325 = vst.msk [vmem:[#allocation2 + $0x250] sm:$0x1] %vm252_vm2, %v10727_v11  ;;  %9324 = vmatprep.subr.bf16.mxu0 %v10655_v15 }
  0x59   : > { %328 = vst.msk [vmem:[#allocation2 + $0x268] sm:$0x1] %vm252_vm2, %v10727_v11  ;;  %331 = vst.msk [vmem:[#allocation2 + $0x280] sm:$0x1] %vm252_vm2, %v10727_v11  ;;  %9707 = vmatpush3.bf16.msra.mxu1 %v10654_v14 }
  0x5a   : > { %9255 = vmatmul.mubr.msk.bf16.gmra.mrb[36].mxu0 %vm598_vm0, %v10619_v50  ;;  %334 = vst.msk [vmem:[#allocation2 + $0x298] sm:$0x1] %vm252_vm2, %v10727_v11  ;;  %337 = vst.msk [vmem:[#allocation2 + $0x2b0] sm:$0x1] %vm252_vm2, %v10727_v11  ;;  %9708 = vmatprep.subr.bf16.mxu1 %v10655_v15 }
  0x5b   : > { %9258 = vmatprep.mubr.msk.bf16.mxu0 %vm598_vm0, %v10623_v52  ;;  %340 = vst.msk [vmem:[#allocation2 + $0x2c8] sm:$0x1] %vm252_vm2, %v10727_v11  ;;  %343 = vst.msk [vmem:[#allocation2 + $0x2e0] sm:$0x1] %vm252_vm2, %v10727_v11  ;;  %9325 = vmatpush3.bf16.msra.mxu0 %v10655_v15 }
  0x5c   : > { %9293 = vmatmul.mubr.msk.bf16.gmra.mrb[36].mxu1 %vm598_vm0, %v10634_v53  ;;  %346 = vst.msk [vmem:[#allocation2 + $0x2f8] sm:$0x1] %vm252_vm2, %v10727_v11  ;;  %349 = vst.msk [vmem:[#allocation2 + $0x310] sm:$0x1] %vm252_vm2, %v10727_v11  ;;  %9326 = vmatprep.subr.bf16.mxu0 %v10656_v16 }
  0x5d   : > { %9296 = vmatprep.mubr.msk.bf16.mxu1 %vm598_vm0, %v10637_v55  ;;  %352 = vst.msk [vmem:[#allocation2 + $0x328] sm:$0x1] %vm252_vm2, %v10727_v11  ;;  %355 = vst.msk [vmem:[#allocation2 + $0x340] sm:$0x1] %vm252_vm2, %v10727_v11  ;;  %9709 = vmatpush3.bf16.msra.mxu1 %v10655_v15 }
  0x5e   : > { %361 = vst.msk [vmem:[#allocation2 + $0x370] sm:$0x1] %vm252_vm2, %v10727_v11  ;;  %364 = vst.msk [vmem:[#allocation2 + $0x388] sm:$0x1] %vm252_vm2, %v10727_v11  ;;  %9710 = vmatprep.subr.bf16.mxu1 %v10656_v16 }
  0x5f   : > { %367 = vst.msk [vmem:[#allocation2 + $0x3a0] sm:$0x1] %vm252_vm2, %v10727_v11  ;;  %370 = vst.msk [vmem:[#allocation2 + $0x3b8] sm:$0x1] %vm252_vm2, %v10727_v11  ;;  %9327 = vmatpush3.bf16.msra.mxu0 %v10656_v16 }
  0x60   : > { %373 = vst.msk [vmem:[#allocation2 + $0x3d0] sm:$0x1] %vm252_vm2, %v10727_v11  ;;  %376 = vst.msk [vmem:[#allocation2 + $0x3e8] sm:$0x1] %vm252_vm2, %v10727_v11  ;;  %9344 = vmatprep.subr.bf16.mxu0 %v11387_v20 }
  0x61   : > { %379 = vst.msk [vmem:[#allocation2 + $0x400] sm:$0x1] %vm252_vm2, %v10727_v11  ;;  %382 = vst.msk [vmem:[#allocation2 + $0x418] sm:$0x1] %vm252_vm2, %v10727_v11  ;;  %9711 = vmatpush3.bf16.msra.mxu1 %v10656_v16 }
  0x62   : > { %9259 = vmatmul.mubr.msk.bf16.gmra.mrb[40].mxu0 %vm598_vm0, %v10624_v54  ;;  %385 = vst.msk [vmem:[#allocation2 + $0x430] sm:$0x1] %vm252_vm2, %v10727_v11  ;;  %388 = vst.msk [vmem:[#allocation2 + $0x448] sm:$0x1] %vm252_vm2, %v10727_v11  ;;  %9728 = vmatprep.subr.bf16.mxu1 %v11387_v20 }
  0x63   : > { %9262 = vmatprep.mubr.msk.bf16.mxu0 %vm598_vm0, %v10627_v56  ;;  %391 = vst.msk [vmem:[#allocation2 + $0x460] sm:$0x1] %vm252_vm2, %v10727_v11  ;;  %394 = vst.msk [vmem:[#allocation2 + $0x478] sm:$0x1] %vm252_vm2, %v10727_v11 }
  0x64   : > { %9297 = vmatmul.mubr.msk.bf16.gmra.mrb[40].mxu1 %vm598_vm0, %v10638_v57  ;;  %397 = vst.msk [vmem:[#allocation2 + $0x490] sm:$0x1] %vm252_vm2, %v10727_v11  ;;  %400 = vst.msk [vmem:[#allocation2 + $0x4a8] sm:$0x1] %vm252_vm2, %v10727_v11 }
  0x65   : > { %9300 = vmatprep.mubr.msk.bf16.mxu1 %vm598_vm0, %v10641_v60  ;;  %403 = vst.msk [vmem:[#allocation2 + $0x4c0] sm:$0x1] %vm252_vm2, %v10727_v11  ;;  %406 = vst.msk [vmem:[#allocation2 + $0x4d8] sm:$0x1] %vm252_vm2, %v10727_v11 }
  0x66   : > { %409 = vst.msk [vmem:[#allocation2 + $0x4f0] sm:$0x1] %vm252_vm2, %v10727_v11  ;;  %412 = vst.msk [vmem:[#allocation2 + $0x508] sm:$0x1] %vm252_vm2, %v10727_v11 }
  0x67   : > { %415 = vst.msk [vmem:[#allocation2 + $0x520] sm:$0x1] %vm252_vm2, %v10727_v11  ;;  %418 = vst.msk [vmem:[#allocation2 + $0x538] sm:$0x1] %vm252_vm2, %v10727_v11 }
  0x68   : > { %421 = vst.msk [vmem:[#allocation2 + $0x550] sm:$0x1] %vm252_vm2, %v10727_v11  ;;  %424 = vst.msk [vmem:[#allocation2 + $0x568] sm:$0x1] %vm252_vm2, %v10727_v11 }
  0x69   : > { %427 = vst.msk [vmem:[#allocation2 + $0x580] sm:$0x1] %vm252_vm2, %v10727_v11  ;;  %430 = vst.msk [vmem:[#allocation2 + $0x598] sm:$0x1] %vm252_vm2, %v10727_v11 }
  0x6a   : > { %9263 = vmatmul.mubr.msk.bf16.gmra.mrb[44].mxu0 %vm598_vm0, %v10628_v58  ;;  %433 = vst.msk [vmem:[#allocation2 + $0x5b0] sm:$0x1] %vm252_vm2, %v10727_v11  ;;  %436 = vst.msk [vmem:[#allocation2 + $0x5c8] sm:$0x1] %vm252_vm2, %v10727_v11 }
  0x6b   : > { %9266 = vmatprep.mubr.msk.bf16.mxu0 %vm598_vm0, %v10631_v59  ;;  %439 = vst.msk [vmem:[#allocation2 + $0x5e0] sm:$0x1] %vm252_vm2, %v10727_v11  ;;  %442 = vst.msk [vmem:[#allocation2 + $0x5f8] sm:$0x1] %vm252_vm2, %v10727_v11 }
  0x6c   : > { %445 = vst.msk [vmem:[#allocation2 + $0x610] sm:$0x1] %vm252_vm2, %v10727_v11  ;;  %448 = vst.msk [vmem:[#allocation2 + $0x628] sm:$0x1] %vm252_vm2, %v10727_v11  ;;  %9301 = vmatmul.mubr.msk.bf16.gmra.mrb[44].mxu1 %vm598_vm0, %v11192_v61 }
  0x6d   : > { %451 = vst.msk [vmem:[#allocation2 + $0x640] sm:$0x1] %vm252_vm2, %v10727_v11  ;;  %454 = vst.msk [vmem:[#allocation2 + $0x658] sm:$0x1] %vm252_vm2, %v10727_v11  ;;  %9304 = vmatprep.mubr.msk.bf16.mxu1 %vm598_vm0, %v11201_v0  ;;  %v10651_v11 = vld [vmem:[%s10789_s10 + $0x1f0] sm:$0xff]  }
  0x72   : > { %9267 = vmatmul.mubr.msk.bf16.gmra.mrb[48].mxu0 %vm598_vm0, %v11195_v62 }
  0x73   : > { %9270 = vmatprep.mubr.msk.bf16.mxu0 %vm598_vm0, %v11198_v63 }
  0x74   : > { %9305 = vmatmul.mubr.msk.bf16.gmra.mrb[48].mxu1 %vm598_vm0, %v10646_v1 }
  0x75   : > { %9308 = vmatprep.mubr.msk.bf16.mxu1 %vm598_vm0, %v10647_v3 }
  0x7a   : > { %9271 = vmatmul.mubr.msk.bf16.gmra.mrb[52].mxu0 %vm598_vm0, %v10636_v2 }
  0x7b   : > { %9274 = vmatprep.mubr.msk.bf16.mxu0 %vm598_vm0, %v10639_v4 }
  0x7c   : > { %9309 = vmatmul.mubr.msk.bf16.gmra.mrb[52].mxu1 %vm598_vm0, %v10648_v5 }
  0x7d   : > { %9312 = vmatprep.mubr.msk.bf16.mxu1 %vm598_vm0, %v10649_v7 }
  0x82   : > { %9275 = vmatmul.mubr.msk.bf16.gmra.mrb[56].mxu0 %vm598_vm0, %v10640_v6 }
  0x83   : > { %9278 = vmatprep.mubr.msk.bf16.mxu0 %vm598_vm0, %v10643_v8 }
  0x84   : > { %9313 = vmatmul.mubr.msk.bf16.gmra.mrb[56].mxu1 %vm598_vm0, %v10650_v9 }
  0x85   : > { %9316 = vmatprep.mubr.msk.bf16.mxu1 %vm598_vm0, %v10651_v11 }
  0x8a   : > { %9279 = vmatmul.mubr.msk.bf16.gmra.mrb[60].mxu0 %vm598_vm0, %v10644_v10 }
  0x8b   : > { %9328 = vmatprep.mubr.msk.bf16.mxu0 %vm249_vm1, %v2281_v19 }
  0x8c   : > { %9317 = vmatmul.mubr.msk.bf16.gmra.mrb[60].mxu1 %vm598_vm0, %v10652_v12 }
  0xe5   : > { %v9176_v22 = vpop.f32.mrb[0].mxu0 }
  0xe6   : > { %v690_v23 = vadd.f32 %v9176_v22, %v11394_v21  ;;  %v681_v24 = vpop.f32.mrb[1].mxu0 }
  0xe7   : > { %v682_v25 = vadd.f32 %v11394_v21, %v681_v24  ;;  %v9177_v26 = vpop.f32.mrb[2].mxu0  ;;  %v9214_v37 = vpop.f32.mrb[0].mxu1 }
  0xe8   : > { %v810_v27 = vmul.f32 0.2, %v690_v23  ;;  %v693_v28 = vadd.f32 %v9177_v26, %v11394_v21  ;;  %v684_v29 = vpop.f32.mrb[3].mxu0  ;;  %v1132_v40 = vadd.f32 %v9214_v37, %v11394_v21  ;;  %v1123_v41 = vpop.f32.mrb[1].mxu1 }
  0xe9   : > { %v808_v30 = vmul.f32 0.2, %v682_v25  ;;  %v685_v31 = vadd.f32 %v11394_v21, %v684_v29  ;;  %v1124_v44 = vadd.f32 %v11394_v21, %v1123_v41  ;;  %v9215_v45 = vpop.f32.mrb[2].mxu1 }
  0xea   : > { %v842_v32 = vmax.f32 %v690_v23, %v810_v27  ;;  %v811_v33 = vmul.f32 0.2, %v693_v28  ;;  %v1252_v48 = vmul.f32 0.2, %v1132_v40  ;;  %v1135_v49 = vadd.f32 %v9215_v45, %v11394_v21  ;;  %v1126_v50 = vpop.f32.mrb[3].mxu1 }
  0xeb   : > { %v840_v34 = vmax.f32 %v682_v25, %v808_v30  ;;  %v809_v35 = vmul.f32 0.2, %v685_v31  ;;  %v1250_v54 = vmul.f32 0.2, %v1124_v44  ;;  %v1127_v55 = vadd.f32 %v11394_v21, %v1126_v50 }
  0xec   : > { %875 = vst.msk [vmem:[#allocation2 + $0x4e0] sm:$0xff] %vm249_vm1, %v842_v32  ;;  %v843_v36 = vmax.f32 %v693_v28, %v811_v33  ;;  %v1284_v58 = vmax.f32 %v1132_v40, %v1252_v48  ;;  %v1253_v59 = vmul.f32 0.2, %v1135_v49 }
  0xed   : > { %873 = vst.msk [vmem:[#allocation2 + $0x4c8] sm:$0xff] %vm249_vm1, %v840_v34  ;;  %v841_v38 = vmax.f32 %v685_v31, %v809_v35  ;;  %v9180_v39 = vpop.f32.mrb[4].mxu0  ;;  %v1282_v62 = vmax.f32 %v1124_v44, %v1250_v54  ;;  %v1251_v63 = vmul.f32 0.2, %v1127_v55 }
  0xee   : > { %876 = vst.msk [vmem:[#allocation2 + $0x4e8] sm:$0xff] %vm249_vm1, %v843_v36  ;;  %v706_v42 = vadd.f32 %v9180_v39, %v11394_v21  ;;  %v697_v43 = vpop.f32.mrb[5].mxu0  ;;  %1317 = vst.msk [vmem:[#allocation2 + $0x349] sm:$0xff] %vm249_vm1, %v1284_v58  ;;  %v1285_v2 = vmax.f32 %v1135_v49, %v1253_v59 }
  0xef   : > { %874 = vst.msk [vmem:[#allocation2 + $0x4d0] sm:$0xff] %vm249_vm1, %v841_v38  ;;  %v698_v46 = vadd.f32 %v11394_v21, %v697_v43  ;;  %v9181_v47 = vpop.f32.mrb[6].mxu0  ;;  %1315 = vst.msk [vmem:[#allocation2 + $0x331] sm:$0xff] %vm249_vm1, %v1282_v62  ;;  %v1283_v4 = vmax.f32 %v1127_v55, %v1251_v63  ;;  %v9218_v5 = vpop.f32.mrb[4].mxu1 }
  0xf0   : > { %v814_v51 = vmul.f32 0.2, %v706_v42  ;;  %v709_v52 = vadd.f32 %v9181_v47, %v11394_v21  ;;  %v700_v53 = vpop.f32.mrb[7].mxu0  ;;  %1318 = vst.msk [vmem:[#allocation2 + $0x351] sm:$0xff] %vm249_vm1, %v1285_v2  ;;  %v1148_v8 = vadd.f32 %v9218_v5, %v11394_v21  ;;  %v1139_v9 = vpop.f32.mrb[5].mxu1 }
  0xf1   : > { %v812_v56 = vmul.f32 0.2, %v698_v46  ;;  %v701_v57 = vadd.f32 %v11394_v21, %v700_v53  ;;  %1316 = vst.msk [vmem:[#allocation2 + $0x339] sm:$0xff] %vm249_vm1, %v1283_v4  ;;  %v1140_v12 = vadd.f32 %v11394_v21, %v1139_v9  ;;  %v9219_v13 = vpop.f32.mrb[6].mxu1 }
  0xf2   : > { %v846_v60 = vmax.f32 %v706_v42, %v814_v51  ;;  %v815_v61 = vmul.f32 0.2, %v709_v52  ;;  %v1256_v16 = vmul.f32 0.2, %v1148_v8  ;;  %v1151_v17 = vadd.f32 %v9219_v13, %v11394_v21  ;;  %v1142_v18 = vpop.f32.mrb[7].mxu1 }
  0xf3   : > { %v844_v0 = vmax.f32 %v698_v46, %v812_v56  ;;  %v813_v1 = vmul.f32 0.2, %v701_v57  ;;  %v1254_v24 = vmul.f32 0.2, %v1140_v12  ;;  %v1143_v25 = vadd.f32 %v11394_v21, %v1142_v18 }
  0xf4   : > { %879 = vst.msk [vmem:[#allocation2 + $0x510] sm:$0xff] %vm249_vm1, %v846_v60  ;;  %v847_v3 = vmax.f32 %v709_v52, %v815_v61  ;;  %v1288_v28 = vmax.f32 %v1148_v8, %v1256_v16  ;;  %v1257_v29 = vmul.f32 0.2, %v1151_v17 }
  0xf5   : > { %877 = vst.msk [vmem:[#allocation2 + $0x4f8] sm:$0xff] %vm249_vm1, %v844_v0  ;;  %v845_v6 = vmax.f32 %v701_v57, %v813_v1  ;;  %v9184_v7 = vpop.f32.mrb[8].mxu0  ;;  %v1286_v32 = vmax.f32 %v1140_v12, %v1254_v24  ;;  %v1255_v33 = vmul.f32 0.2, %v1143_v25 }
  0xf6   : > { %880 = vst.msk [vmem:[#allocation2 + $0x518] sm:$0xff] %vm249_vm1, %v847_v3  ;;  %v722_v10 = vadd.f32 %v9184_v7, %v11394_v21  ;;  %v713_v11 = vpop.f32.mrb[9].mxu0  ;;  %1321 = vst.msk [vmem:[#allocation2 + $0x379] sm:$0xff] %vm249_vm1, %v1288_v28  ;;  %v1289_v36 = vmax.f32 %v1151_v17, %v1257_v29 }
  0xf7   : > { %878 = vst.msk [vmem:[#allocation2 + $0x500] sm:$0xff] %vm249_vm1, %v845_v6  ;;  %v714_v14 = vadd.f32 %v11394_v21, %v713_v11  ;;  %v9185_v15 = vpop.f32.mrb[10].mxu0  ;;  %1319 = vst.msk [vmem:[#allocation2 + $0x361] sm:$0xff] %vm249_vm1, %v1286_v32  ;;  %v1287_v38 = vmax.f32 %v1143_v25, %v1255_v33  ;;  %v9222_v39 = vpop.f32.mrb[8].mxu1 }
  0xf8   : > { %v818_v19 = vmul.f32 0.2, %v722_v10  ;;  %v725_v22 = vadd.f32 %v9185_v15, %v11394_v21  ;;  %v716_v23 = vpop.f32.mrb[11].mxu0  ;;  %1322 = vst.msk [vmem:[#allocation2 + $0x381] sm:$0xff] %vm249_vm1, %v1289_v36  ;;  %v1164_v42 = vadd.f32 %v9222_v39, %v11394_v21  ;;  %v1155_v43 = vpop.f32.mrb[9].mxu1 }
  0xf9   : > { %v816_v26 = vmul.f32 0.2, %v714_v14  ;;  %v717_v27 = vadd.f32 %v11394_v21, %v716_v23  ;;  %1320 = vst.msk [vmem:[#allocation2 + $0x369] sm:$0xff] %vm249_vm1, %v1287_v38  ;;  %v1156_v46 = vadd.f32 %v11394_v21, %v1155_v43  ;;  %v9223_v47 = vpop.f32.mrb[10].mxu1 }
  0xfa   : > { %v850_v30 = vmax.f32 %v722_v10, %v818_v19  ;;  %v819_v31 = vmul.f32 0.2, %v725_v22  ;;  %v1260_v50 = vmul.f32 0.2, %v1164_v42  ;;  %v1167_v51 = vadd.f32 %v9223_v47, %v11394_v21  ;;  %v1158_v52 = vpop.f32.mrb[11].mxu1 }
  0xfb   : > { %v848_v34 = vmax.f32 %v714_v14, %v816_v26  ;;  %v817_v35 = vmul.f32 0.2, %v717_v27  ;;  %v1258_v56 = vmul.f32 0.2, %v1156_v46  ;;  %v1159_v57 = vadd.f32 %v11394_v21, %v1158_v52 }
  0xfc   : > { %883 = vst.msk [vmem:[#allocation2 + $0x540] sm:$0xff] %vm249_vm1, %v850_v30  ;;  %v851_v37 = vmax.f32 %v725_v22, %v819_v31  ;;  %v1292_v60 = vmax.f32 %v1164_v42, %v1260_v50  ;;  %v1261_v61 = vmul.f32 0.2, %v1167_v51 }
  0xfd   : > { %881 = vst.msk [vmem:[#allocation2 + $0x528] sm:$0xff] %vm249_vm1, %v848_v34  ;;  %v849_v40 = vmax.f32 %v717_v27, %v817_v35  ;;  %v9188_v41 = vpop.f32.mrb[12].mxu0  ;;  %v1290_v0 = vmax.f32 %v1156_v46, %v1258_v56  ;;  %v1259_v1 = vmul.f32 0.2, %v1159_v57 }
  0xfe   : > { %884 = vst.msk [vmem:[#allocation2 + $0x548] sm:$0xff] %vm249_vm1, %v851_v37  ;;  %v738_v44 = vadd.f32 %v9188_v41, %v11394_v21  ;;  %v729_v45 = vpop.f32.mrb[13].mxu0  ;;  %1325 = vst.msk [vmem:[#allocation2 + $0x3a9] sm:$0xff] %vm249_vm1, %v1292_v60  ;;  %v1293_v4 = vmax.f32 %v1167_v51, %v1261_v61 }
  0xff   : > { %882 = vst.msk [vmem:[#allocation2 + $0x530] sm:$0xff] %vm249_vm1, %v849_v40  ;;  %v730_v48 = vadd.f32 %v11394_v21, %v729_v45  ;;  %v9189_v49 = vpop.f32.mrb[14].mxu0  ;;  %1323 = vst.msk [vmem:[#allocation2 + $0x391] sm:$0xff] %vm249_vm1, %v1290_v0  ;;  %v1291_v6 = vmax.f32 %v1159_v57, %v1259_v1  ;;  %v9226_v7 = vpop.f32.mrb[12].mxu1 }
 0x100   : > { %v822_v53 = vmul.f32 0.2, %v738_v44  ;;  %v741_v54 = vadd.f32 %v9189_v49, %v11394_v21  ;;  %v732_v55 = vpop.f32.mrb[15].mxu0  ;;  %1326 = vst.msk [vmem:[#allocation2 + $0x3b1] sm:$0xff] %vm249_vm1, %v1293_v4  ;;  %v1180_v10 = vadd.f32 %v9226_v7, %v11394_v21  ;;  %v1171_v11 = vpop.f32.mrb[13].mxu1 }
 0x101   : > { %v820_v58 = vmul.f32 0.2, %v730_v48  ;;  %v733_v59 = vadd.f32 %v11394_v21, %v732_v55  ;;  %1324 = vst.msk [vmem:[#allocation2 + $0x399] sm:$0xff] %vm249_vm1, %v1291_v6  ;;  %v1172_v14 = vadd.f32 %v11394_v21, %v1171_v11  ;;  %v9227_v15 = vpop.f32.mrb[14].mxu1 }
 0x102   : > { %v854_v62 = vmax.f32 %v738_v44, %v822_v53  ;;  %v823_v63 = vmul.f32 0.2, %v741_v54  ;;  %v1264_v18 = vmul.f32 0.2, %v1180_v10  ;;  %v1183_v19 = vadd.f32 %v9227_v15, %v11394_v21  ;;  %v1174_v22 = vpop.f32.mrb[15].mxu1 }
 0x103   : > { %v852_v2 = vmax.f32 %v730_v48, %v820_v58  ;;  %v821_v3 = vmul.f32 0.2, %v733_v59  ;;  %v1262_v26 = vmul.f32 0.2, %v1172_v14  ;;  %v1175_v27 = vadd.f32 %v11394_v21, %v1174_v22 }
 0x104   : > { %887 = vst.msk [vmem:[#allocation2 + $0x570] sm:$0xff] %vm249_vm1, %v854_v62  ;;  %v855_v5 = vmax.f32 %v741_v54, %v823_v63  ;;  %v1296_v30 = vmax.f32 %v1180_v10, %v1264_v18  ;;  %v1265_v31 = vmul.f32 0.2, %v1183_v19 }
 0x105   : > { %885 = vst.msk [vmem:[#allocation2 + $0x558] sm:$0xff] %vm249_vm1, %v852_v2  ;;  %v853_v8 = vmax.f32 %v733_v59, %v821_v3  ;;  %v9192_v9 = vpop.f32.mrb[16].mxu0  ;;  %v1294_v34 = vmax.f32 %v1172_v14, %v1262_v26  ;;  %v1263_v35 = vmul.f32 0.2, %v1175_v27 }
 0x106   : > { %888 = vst.msk [vmem:[#allocation2 + $0x578] sm:$0xff] %vm249_vm1, %v855_v5  ;;  %v754_v12 = vadd.f32 %v9192_v9, %v11394_v21  ;;  %v745_v13 = vpop.f32.mrb[17].mxu0  ;;  %1329 = vst.msk [vmem:[#allocation2 + $0x3d9] sm:$0xff] %vm249_vm1, %v1296_v30  ;;  %v1297_v38 = vmax.f32 %v1183_v19, %v1265_v31 }
 0x107   : > { %886 = vst.msk [vmem:[#allocation2 + $0x560] sm:$0xff] %vm249_vm1, %v853_v8  ;;  %v746_v16 = vadd.f32 %v11394_v21, %v745_v13  ;;  %v9193_v17 = vpop.f32.mrb[18].mxu0  ;;  %1327 = vst.msk [vmem:[#allocation2 + $0x3c1] sm:$0xff] %vm249_vm1, %v1294_v34  ;;  %v1295_v40 = vmax.f32 %v1175_v27, %v1263_v35  ;;  %v9230_v41 = vpop.f32.mrb[16].mxu1 }
 0x108   : > { %v826_v23 = vmul.f32 0.2, %v754_v12  ;;  %v757_v24 = vadd.f32 %v9193_v17, %v11394_v21  ;;  %v748_v25 = vpop.f32.mrb[19].mxu0  ;;  %1330 = vst.msk [vmem:[#allocation2 + $0x3e1] sm:$0xff] %vm249_vm1, %v1297_v38  ;;  %v1196_v44 = vadd.f32 %v9230_v41, %v11394_v21  ;;  %v1187_v45 = vpop.f32.mrb[17].mxu1 }
 0x109   : > { %v824_v28 = vmul.f32 0.2, %v746_v16  ;;  %v749_v29 = vadd.f32 %v11394_v21, %v748_v25  ;;  %1328 = vst.msk [vmem:[#allocation2 + $0x3c9] sm:$0xff] %vm249_vm1, %v1295_v40  ;;  %v1188_v48 = vadd.f32 %v11394_v21, %v1187_v45  ;;  %v9231_v49 = vpop.f32.mrb[18].mxu1 }
 0x10a   : > { %v858_v32 = vmax.f32 %v754_v12, %v826_v23  ;;  %v827_v33 = vmul.f32 0.2, %v757_v24  ;;  %v1268_v52 = vmul.f32 0.2, %v1196_v44  ;;  %v1199_v53 = vadd.f32 %v9231_v49, %v11394_v21  ;;  %v1190_v54 = vpop.f32.mrb[19].mxu1 }
 0x10b   : > { %v856_v36 = vmax.f32 %v746_v16, %v824_v28  ;;  %v825_v37 = vmul.f32 0.2, %v749_v29  ;;  %v1266_v58 = vmul.f32 0.2, %v1188_v48  ;;  %v1191_v59 = vadd.f32 %v11394_v21, %v1190_v54 }
 0x10c   : > { %891 = vst.msk [vmem:[#allocation2 + $0x5a0] sm:$0xff] %vm249_vm1, %v858_v32  ;;  %v859_v39 = vmax.f32 %v757_v24, %v827_v33  ;;  %v1300_v62 = vmax.f32 %v1196_v44, %v1268_v52  ;;  %v1269_v63 = vmul.f32 0.2, %v1199_v53 }
 0x10d   : > { %889 = vst.msk [vmem:[#allocation2 + $0x588] sm:$0xff] %vm249_vm1, %v856_v36  ;;  %v857_v42 = vmax.f32 %v749_v29, %v825_v37  ;;  %v9196_v43 = vpop.f32.mrb[20].mxu0  ;;  %v1298_v2 = vmax.f32 %v1188_v48, %v1266_v58  ;;  %v1267_v3 = vmul.f32 0.2, %v1191_v59 }
 0x10e   : > { %892 = vst.msk [vmem:[#allocation2 + $0x5a8] sm:$0xff] %vm249_vm1, %v859_v39  ;;  %v770_v46 = vadd.f32 %v9196_v43, %v11394_v21  ;;  %v761_v47 = vpop.f32.mrb[21].mxu0  ;;  %1333 = vst.msk [vmem:[#allocation2 + $0x409] sm:$0xff] %vm249_vm1, %v1300_v62  ;;  %v1301_v6 = vmax.f32 %v1199_v53, %v1269_v63 }
 0x10f   : > { %890 = vst.msk [vmem:[#allocation2 + $0x590] sm:$0xff] %vm249_vm1, %v857_v42  ;;  %v762_v50 = vadd.f32 %v11394_v21, %v761_v47  ;;  %v9197_v51 = vpop.f32.mrb[22].mxu0  ;;  %1331 = vst.msk [vmem:[#allocation2 + $0x3f1] sm:$0xff] %vm249_vm1, %v1298_v2  ;;  %v1299_v8 = vmax.f32 %v1191_v59, %v1267_v3  ;;  %v9234_v9 = vpop.f32.mrb[20].mxu1 }
 0x110   : > { %v830_v55 = vmul.f32 0.2, %v770_v46  ;;  %v773_v56 = vadd.f32 %v9197_v51, %v11394_v21  ;;  %v764_v57 = vpop.f32.mrb[23].mxu0  ;;  %1334 = vst.msk [vmem:[#allocation2 + $0x411] sm:$0xff] %vm249_vm1, %v1301_v6  ;;  %v1212_v12 = vadd.f32 %v9234_v9, %v11394_v21  ;;  %v1203_v13 = vpop.f32.mrb[21].mxu1 }
 0x111   : > { %v828_v60 = vmul.f32 0.2, %v762_v50  ;;  %v765_v61 = vadd.f32 %v11394_v21, %v764_v57  ;;  %1332 = vst.msk [vmem:[#allocation2 + $0x3f9] sm:$0xff] %vm249_vm1, %v1299_v8  ;;  %v1204_v16 = vadd.f32 %v11394_v21, %v1203_v13  ;;  %v9235_v17 = vpop.f32.mrb[22].mxu1 }
 0x112   : > { %v862_v0 = vmax.f32 %v770_v46, %v830_v55  ;;  %v831_v1 = vmul.f32 0.2, %v773_v56  ;;  %v1272_v22 = vmul.f32 0.2, %v1212_v12  ;;  %v1215_v23 = vadd.f32 %v9235_v17, %v11394_v21  ;;  %v1206_v24 = vpop.f32.mrb[23].mxu1 }
 0x113   : > { %v860_v4 = vmax.f32 %v762_v50, %v828_v60  ;;  %v829_v5 = vmul.f32 0.2, %v765_v61  ;;  %v1270_v28 = vmul.f32 0.2, %v1204_v16  ;;  %v1207_v29 = vadd.f32 %v11394_v21, %v1206_v24 }
 0x114   : > { %895 = vst.msk [vmem:[#allocation2 + $0x5d0] sm:$0xff] %vm249_vm1, %v862_v0  ;;  %v863_v7 = vmax.f32 %v773_v56, %v831_v1  ;;  %v1304_v32 = vmax.f32 %v1212_v12, %v1272_v22  ;;  %v1273_v33 = vmul.f32 0.2, %v1215_v23 }
 0x115   : > { %893 = vst.msk [vmem:[#allocation2 + $0x5b8] sm:$0xff] %vm249_vm1, %v860_v4  ;;  %v861_v10 = vmax.f32 %v765_v61, %v829_v5  ;;  %v9200_v11 = vpop.f32.mrb[24].mxu0  ;;  %v1302_v36 = vmax.f32 %v1204_v16, %v1270_v28  ;;  %v1271_v37 = vmul.f32 0.2, %v1207_v29 }
 0x116   : > { %896 = vst.msk [vmem:[#allocation2 + $0x5d8] sm:$0xff] %vm249_vm1, %v863_v7  ;;  %v786_v14 = vadd.f32 %v9200_v11, %v11394_v21  ;;  %v777_v15 = vpop.f32.mrb[25].mxu0  ;;  %1337 = vst.msk [vmem:[#allocation2 + $0x439] sm:$0xff] %vm249_vm1, %v1304_v32  ;;  %v1305_v40 = vmax.f32 %v1215_v23, %v1273_v33 }
 0x117   : > { %894 = vst.msk [vmem:[#allocation2 + $0x5c0] sm:$0xff] %vm249_vm1, %v861_v10  ;;  %v778_v18 = vadd.f32 %v11394_v21, %v777_v15  ;;  %v9201_v19 = vpop.f32.mrb[26].mxu0  ;;  %1335 = vst.msk [vmem:[#allocation2 + $0x421] sm:$0xff] %vm249_vm1, %v1302_v36  ;;  %v1303_v42 = vmax.f32 %v1207_v29, %v1271_v37  ;;  %v9238_v43 = vpop.f32.mrb[24].mxu1 }
 0x118   : > { %v834_v25 = vmul.f32 0.2, %v786_v14  ;;  %v789_v26 = vadd.f32 %v9201_v19, %v11394_v21  ;;  %v780_v27 = vpop.f32.mrb[27].mxu0  ;;  %1338 = vst.msk [vmem:[#allocation2 + $0x441] sm:$0xff] %vm249_vm1, %v1305_v40  ;;  %v1228_v46 = vadd.f32 %v9238_v43, %v11394_v21  ;;  %v1219_v47 = vpop.f32.mrb[25].mxu1 }
 0x119   : > { %v832_v30 = vmul.f32 0.2, %v778_v18  ;;  %v781_v31 = vadd.f32 %v11394_v21, %v780_v27  ;;  %1336 = vst.msk [vmem:[#allocation2 + $0x429] sm:$0xff] %vm249_vm1, %v1303_v42  ;;  %v1220_v50 = vadd.f32 %v11394_v21, %v1219_v47  ;;  %v9239_v51 = vpop.f32.mrb[26].mxu1 }
 0x11a   : > { %v866_v34 = vmax.f32 %v786_v14, %v834_v25  ;;  %v835_v35 = vmul.f32 0.2, %v789_v26  ;;  %v1276_v54 = vmul.f32 0.2, %v1228_v46  ;;  %v1231_v55 = vadd.f32 %v9239_v51, %v11394_v21  ;;  %v1222_v56 = vpop.f32.mrb[27].mxu1 }
 0x11b   : > { %v864_v38 = vmax.f32 %v778_v18, %v832_v30  ;;  %v833_v39 = vmul.f32 0.2, %v781_v31  ;;  %v1274_v60 = vmul.f32 0.2, %v1220_v50  ;;  %v1223_v61 = vadd.f32 %v11394_v21, %v1222_v56 }
 0x11c   : > { %899 = vst.msk [vmem:[#allocation2 + $0x600] sm:$0xff] %vm249_vm1, %v866_v34  ;;  %v867_v41 = vmax.f32 %v789_v26, %v835_v35  ;;  %v1308_v0 = vmax.f32 %v1228_v46, %v1276_v54  ;;  %v1277_v1 = vmul.f32 0.2, %v1231_v55 }
 0x11d   : > { %897 = vst.msk [vmem:[#allocation2 + $0x5e8] sm:$0xff] %vm249_vm1, %v864_v38  ;;  %v865_v44 = vmax.f32 %v781_v31, %v833_v39  ;;  %v9204_v45 = vpop.f32.mrb[28].mxu0  ;;  %v1306_v4 = vmax.f32 %v1220_v50, %v1274_v60  ;;  %v1275_v5 = vmul.f32 0.2, %v1223_v61 }
 0x11e   : > { %900 = vst.msk [vmem:[#allocation2 + $0x608] sm:$0xff] %vm249_vm1, %v867_v41  ;;  %v802_v48 = vadd.f32 %v9204_v45, %v11394_v21  ;;  %v793_v49 = vpop.f32.mrb[29].mxu0  ;;  %1341 = vst.msk [vmem:[#allocation2 + $0x469] sm:$0xff] %vm249_vm1, %v1308_v0  ;;  %v1309_v8 = vmax.f32 %v1231_v55, %v1277_v1 }
 0x11f   : > { %898 = vst.msk [vmem:[#allocation2 + $0x5f0] sm:$0xff] %vm249_vm1, %v865_v44  ;;  %v794_v52 = vadd.f32 %v11394_v21, %v793_v49  ;;  %v9205_v53 = vpop.f32.mrb[30].mxu0  ;;  %1339 = vst.msk [vmem:[#allocation2 + $0x451] sm:$0xff] %vm249_vm1, %v1306_v4  ;;  %v1307_v10 = vmax.f32 %v1223_v61, %v1275_v5  ;;  %v9242_v11 = vpop.f32.mrb[28].mxu1 }
 0x120   : > { %v838_v57 = vmul.f32 0.2, %v802_v48  ;;  %v805_v58 = vadd.f32 %v9205_v53, %v11394_v21  ;;  %v796_v59 = vpop.f32.mrb[31].mxu0  ;;  %1342 = vst.msk [vmem:[#allocation2 + $0x471] sm:$0xff] %vm249_vm1, %v1309_v8  ;;  %v1244_v14 = vadd.f32 %v9242_v11, %v11394_v21  ;;  %v1235_v15 = vpop.f32.mrb[29].mxu1 }
 0x121   : > { %v836_v62 = vmul.f32 0.2, %v794_v52  ;;  %v797_v63 = vadd.f32 %v11394_v21, %v796_v59  ;;  %1340 = vst.msk [vmem:[#allocation2 + $0x459] sm:$0xff] %vm249_vm1, %v1307_v10  ;;  %v1236_v18 = vadd.f32 %v11394_v21, %v1235_v15  ;;  %v9243_v19 = vpop.f32.mrb[30].mxu1 }
 0x122   : > { %v870_v2 = vmax.f32 %v802_v48, %v838_v57  ;;  %v839_v3 = vmul.f32 0.2, %v805_v58  ;;  %v1280_v24 = vmul.f32 0.2, %v1244_v14  ;;  %v1247_v25 = vadd.f32 %v9243_v19, %v11394_v21  ;;  %v1238_v26 = vpop.f32.mrb[31].mxu1 }
 0x123   : > { %v868_v6 = vmax.f32 %v794_v52, %v836_v62  ;;  %v837_v7 = vmul.f32 0.2, %v797_v63  ;;  %v1278_v30 = vmul.f32 0.2, %v1236_v18  ;;  %v1239_v31 = vadd.f32 %v11394_v21, %v1238_v26 }
 0x124   : > { %903 = vst.msk [vmem:[#allocation2 + $0x630] sm:$0xff] %vm249_vm1, %v870_v2  ;;  %v871_v9 = vmax.f32 %v805_v58, %v839_v3  ;;  %v1312_v34 = vmax.f32 %v1244_v14, %v1280_v24  ;;  %v1281_v35 = vmul.f32 0.2, %v1247_v25 }
 0x125   : > { %901 = vst.msk [vmem:[#allocation2 + $0x618] sm:$0xff] %vm249_vm1, %v868_v6  ;;  %v869_v12 = vmax.f32 %v797_v63, %v837_v7  ;;  %v9252_v13 = vpop.f32.mrb[32].mxu0  ;;  %v1310_v38 = vmax.f32 %v1236_v18, %v1278_v30  ;;  %v1279_v39 = vmul.f32 0.2, %v1239_v31 }
 0x126   : > { %904 = vst.msk [vmem:[#allocation2 + $0x638] sm:$0xff] %vm249_vm1, %v871_v9  ;;  %v1574_v16 = vadd.f32 %v9252_v13, %v11394_v21  ;;  %v1565_v17 = vpop.f32.mrb[33].mxu0  ;;  %1345 = vst.msk [vmem:[#allocation2 + $0x499] sm:$0xff] %vm249_vm1, %v1312_v34  ;;  %v1313_v42 = vmax.f32 %v1247_v25, %v1281_v35  ;;  %v11556_v35 = vld [vmem:[%s12600_s3 + $0x8] sm:$0xff]  }
 0x127   : > { %902 = vst.msk [vmem:[#allocation2 + $0x620] sm:$0xff] %vm249_vm1, %v869_v12  ;;  %v1566_v22 = vadd.f32 %v11394_v21, %v1565_v17  ;;  %v9253_v23 = vpop.f32.mrb[34].mxu0  ;;  %1343 = vst.msk [vmem:[#allocation2 + $0x481] sm:$0xff] %vm249_vm1, %v1310_v38  ;;  %v1311_v44 = vmax.f32 %v1239_v31, %v1279_v39  ;;  %v9290_v45 = vpop.f32.mrb[32].mxu1 }
 0x128   : > { %v1694_v27 = vmul.f32 0.2, %v1574_v16  ;;  %v1577_v28 = vadd.f32 %v9253_v23, %v11394_v21  ;;  %v1568_v29 = vpop.f32.mrb[35].mxu0  ;;  %1346 = vst.msk [vmem:[#allocation2 + $0x4a1] sm:$0xff] %vm249_vm1, %v1313_v42  ;;  %v2016_v48 = vadd.f32 %v9290_v45, %v11394_v21  ;;  %v2007_v49 = vpop.f32.mrb[33].mxu1 }
 0x129   : > { %v1692_v32 = vmul.f32 0.2, %v1566_v22  ;;  %v1569_v33 = vadd.f32 %v11394_v21, %v1568_v29  ;;  %1344 = vst.msk [vmem:[#allocation2 + $0x489] sm:$0xff] %vm249_vm1, %v1311_v44  ;;  %v2008_v52 = vadd.f32 %v11394_v21, %v2007_v49  ;;  %v9291_v53 = vpop.f32.mrb[34].mxu1 }
 0x12a   : > { %v1726_v36 = vmax.f32 %v1574_v16, %v1694_v27  ;;  %v1695_v37 = vmul.f32 0.2, %v1577_v28  ;;  %v2136_v56 = vmul.f32 0.2, %v2016_v48  ;;  %v2019_v57 = vadd.f32 %v9291_v53, %v11394_v21  ;;  %v2010_v58 = vpop.f32.mrb[35].mxu1 }
 0x12b   : > { %v1724_v40 = vmax.f32 %v1566_v22, %v1692_v32  ;;  %v1693_v41 = vmul.f32 0.2, %v1569_v33  ;;  %v2134_v62 = vmul.f32 0.2, %v2008_v52  ;;  %v2011_v63 = vadd.f32 %v11394_v21, %v2010_v58 }
 0x12c   : > { %1759 = vst.msk [vmem:[#allocation2 + $0x1c8] sm:$0xff] %vm249_vm1, %v1726_v36  ;;  %v1727_v43 = vmax.f32 %v1577_v28, %v1695_v37  ;;  %v2168_v2 = vmax.f32 %v2016_v48, %v2136_v56  ;;  %v2137_v3 = vmul.f32 0.2, %v2019_v57 }
 0x12d   : > { %1757 = vst.msk [vmem:[#allocation2 + $0x1b0] sm:$0xff] %vm249_vm1, %v1724_v40  ;;  %v1725_v46 = vmax.f32 %v1569_v33, %v1693_v41  ;;  %v9256_v47 = vpop.f32.mrb[36].mxu0  ;;  %v2166_v6 = vmax.f32 %v2008_v52, %v2134_v62  ;;  %v2135_v7 = vmul.f32 0.2, %v2011_v63  ;;  %v11569_v52 = vld [vmem:[%s12600_s3 + $0x10] sm:$0xff]  }
 0x12e   : > { %1760 = vst.msk [vmem:[#allocation2 + $0x1d0] sm:$0xff] %vm249_vm1, %v1727_v43  ;;  %v1590_v50 = vadd.f32 %v9256_v47, %v11394_v21  ;;  %v1581_v51 = vpop.f32.mrb[37].mxu0  ;;  %2201 = vst.msk [vmem:[#allocation2 + $0x31] sm:$0xff] %vm249_vm1, %v2168_v2  ;;  %v2169_v10 = vmax.f32 %v2019_v57, %v2137_v3 }
 0x12f   : > { %1758 = vst.msk [vmem:[#allocation2 + $0x1b8] sm:$0xff] %vm249_vm1, %v1725_v46  ;;  %v1582_v54 = vadd.f32 %v11394_v21, %v1581_v51  ;;  %v9257_v55 = vpop.f32.mrb[38].mxu0  ;;  %2199 = vst.msk [vmem:[#allocation2 + $0x19] sm:$0xff] %vm249_vm1, %v2166_v6  ;;  %v2167_v12 = vmax.f32 %v2011_v63, %v2135_v7  ;;  %v9294_v13 = vpop.f32.mrb[36].mxu1 }
 0x130   : > { %v1698_v59 = vmul.f32 0.2, %v1590_v50  ;;  %v1593_v60 = vadd.f32 %v9257_v55, %v11394_v21  ;;  %v1584_v61 = vpop.f32.mrb[39].mxu0  ;;  %2202 = vst.msk [vmem:[#allocation2 + $0x39] sm:$0xff] %vm249_vm1, %v2169_v10  ;;  %v2032_v18 = vadd.f32 %v9294_v13, %v11394_v21  ;;  %v2023_v19 = vpop.f32.mrb[37].mxu1  ;;  %v11588_v10 = vld [vmem:[%s12600_s3 + $0x18] sm:$0xff]  }
 0x131   : > { %v1696_v0 = vmul.f32 0.2, %v1582_v54  ;;  %v1585_v1 = vadd.f32 %v11394_v21, %v1584_v61  ;;  %2200 = vst.msk [vmem:[#allocation2 + $0x21] sm:$0xff] %vm249_vm1, %v2167_v12  ;;  %v2024_v27 = vadd.f32 %v11394_v21, %v2023_v19  ;;  %v9295_v28 = vpop.f32.mrb[38].mxu1 }
 0x132   : > { %v1730_v4 = vmax.f32 %v1590_v50, %v1698_v59  ;;  %v1699_v5 = vmul.f32 0.2, %v1593_v60  ;;  %v2140_v32 = vmul.f32 0.2, %v2032_v18  ;;  %v2035_v33 = vadd.f32 %v9295_v28, %v11394_v21  ;;  %v2026_v34 = vpop.f32.mrb[39].mxu1 }
 0x133   : > { %v1728_v8 = vmax.f32 %v1582_v54, %v1696_v0  ;;  %v1697_v9 = vmul.f32 0.2, %v1585_v1  ;;  %v2269_v16 = vld [vmem:[#allocation2 + $0x1c8] sm:$0xff]  ;;  %v2138_v39 = vmul.f32 0.2, %v2024_v27  ;;  %v2027_v40 = vadd.f32 %v11394_v21, %v2026_v34 }
 0x134   : > { %1763 = vst.msk [vmem:[#allocation2 + $0x1f8] sm:$0xff] %vm249_vm1, %v1730_v4  ;;  %v1731_v11 = vmax.f32 %v1593_v60, %v1699_v5  ;;  %v2267_v24 = vld [vmem:[#allocation2 + $0x1b0] sm:$0xff]  ;;  %v2172_v43 = vmax.f32 %v2032_v18, %v2140_v32  ;;  %v2141_v44 = vmul.f32 0.2, %v2035_v33 }
 0x135   : > { %1761 = vst.msk [vmem:[#allocation2 + $0x1e0] sm:$0xff] %vm249_vm1, %v1728_v8  ;;  %v1729_v14 = vmax.f32 %v1585_v1, %v1697_v9  ;;  %v9260_v15 = vpop.f32.mrb[40].mxu0  ;;  %v2270_v17 = vld [vmem:[#allocation2 + $0x1d0] sm:$0xff]  ;;  %v2170_v47 = vmax.f32 %v2024_v27, %v2138_v39  ;;  %v2139_v48 = vmul.f32 0.2, %v2027_v40 }
 0x136   : > { %1764 = vst.msk [vmem:[#allocation2 + $0x200] sm:$0xff] %vm249_vm1, %v1731_v11  ;;  %v1606_v22 = vadd.f32 %v9260_v15, %v11394_v21  ;;  %v1597_v23 = vpop.f32.mrb[41].mxu0  ;;  %v2268_v25 = vld [vmem:[#allocation2 + $0x1b8] sm:$0xff]  ;;  %v2283_v26 = vpack.c.bf16 %v2270_v17, %v2269_v16  ;;  %2205 = vst.msk [vmem:[#allocation2 + $0x61] sm:$0xff] %vm249_vm1, %v2172_v43  ;;  %v2173_v51 = vmax.f32 %v2035_v33, %v2141_v44 }
 0x137   : > { %1762 = vst.msk [vmem:[#allocation2 + $0x1e8] sm:$0xff] %vm249_vm1, %v1729_v14  ;;  %v1598_v29 = vadd.f32 %v11394_v21, %v1597_v23  ;;  %v9261_v30 = vpop.f32.mrb[42].mxu0  ;;  %v2282_v31 = vpack.c.bf16 %v2268_v25, %v2267_v24  ;;  %2203 = vst.msk [vmem:[#allocation2 + $0x49] sm:$0xff] %vm249_vm1, %v2170_v47  ;;  %v2171_v54 = vmax.f32 %v2027_v40, %v2139_v48 }
 0x138   : > { %v1702_v36 = vmul.f32 0.2, %v1606_v22  ;;  %v1609_v37 = vadd.f32 %v9261_v30, %v11394_v21  ;;  %v1600_v38 = vpop.f32.mrb[43].mxu0  ;;  %2206 = vst.msk [vmem:[#allocation2 + $0x69] sm:$0xff] %vm249_vm1, %v2173_v51 }
 0x139   : > { %v1700_v41 = vmul.f32 0.2, %v1598_v29  ;;  %v1601_v42 = vadd.f32 %v11394_v21, %v1600_v38  ;;  %9329 = vmatmul.mubr.msk.bf16.vlgmr.msra.gmra.mrb[64].mxu0 %vm249_vm1, %v2282_v31  ;;  %2204 = vst.msk [vmem:[#allocation2 + $0x51] sm:$0xff] %vm249_vm1, %v2171_v54 }
 0x13a   : > { %v1734_v45 = vmax.f32 %v1606_v22, %v1702_v36  ;;  %v1703_v46 = vmul.f32 0.2, %v1609_v37  ;;  %9332 = vmatprep.mubr.msk.bf16.mxu0 %vm249_vm1, %v2283_v26  ;;  %9345 = vmatpush3.bf16.msra.mxu0 %v11387_v20  ;;  %v9298_v20 = vpop.f32.mrb[40].mxu1 }
 0x13b   : > { %v1732_v49 = vmax.f32 %v1598_v29, %v1700_v41  ;;  %v1701_v50 = vmul.f32 0.2, %v1601_v42  ;;  %9346 = vmatprep.subr.bf16.mxu0 %v11556_v35  ;;  %v2273_v57 = vld [vmem:[#allocation2 + $0x1f8] sm:$0xff]  ;;  %v2048_v59 = vadd.f32 %v9298_v20, %v11394_v21  ;;  %v2039_v60 = vpop.f32.mrb[41].mxu1  ;;  %v11601_v29 = vld [vmem:[%s12600_s3 + $0x40] sm:$0xff]  }
 0x13c   : > { %1767 = vst.msk [vmem:[#allocation2 + $0x228] sm:$0xff] %vm249_vm1, %v1734_v45  ;;  %v1735_v53 = vmax.f32 %v1609_v37, %v1703_v46  ;;  %v2271_v63 = vld [vmem:[#allocation2 + $0x1e0] sm:$0xff]  ;;  %v2040_v2 = vadd.f32 %v11394_v21, %v2039_v60  ;;  %v9299_v3 = vpop.f32.mrb[42].mxu1 }
 0x13d   : > { %1765 = vst.msk [vmem:[#allocation2 + $0x210] sm:$0xff] %vm249_vm1, %v1732_v49  ;;  %v1733_v55 = vmax.f32 %v1601_v42, %v1701_v50  ;;  %v9264_v56 = vpop.f32.mrb[44].mxu0  ;;  %v2274_v58 = vld [vmem:[#allocation2 + $0x200] sm:$0xff]  ;;  %v2144_v7 = vmul.f32 0.2, %v2048_v59  ;;  %v2051_v8 = vadd.f32 %v9299_v3, %v11394_v21  ;;  %v2042_v9 = vpop.f32.mrb[43].mxu1 }
 0x13e   : > { %1768 = vst.msk [vmem:[#allocation2 + $0x230] sm:$0xff] %vm249_vm1, %v1735_v53  ;;  %v1622_v61 = vadd.f32 %v9264_v56, %v11394_v21  ;;  %v1613_v62 = vpop.f32.mrb[45].mxu0  ;;  %v2272_v0 = vld [vmem:[#allocation2 + $0x1e8] sm:$0xff]  ;;  %v2285_v1 = vpack.c.bf16 %v2274_v58, %v2273_v57  ;;  %9347 = vmatpush3.bf16.msra.mxu0 %v11556_v35  ;;  %v2142_v14 = vmul.f32 0.2, %v2040_v2  ;;  %v2043_v15 = vadd.f32 %v11394_v21, %v2042_v9 }
 0x13f   : > { %1766 = vst.msk [vmem:[#allocation2 + $0x218] sm:$0xff] %vm249_vm1, %v1733_v55  ;;  %v1614_v4 = vadd.f32 %v11394_v21, %v1613_v62  ;;  %v9265_v5 = vpop.f32.mrb[46].mxu0  ;;  %v2284_v6 = vpack.c.bf16 %v2272_v0, %v2271_v63  ;;  %9348 = vmatprep.subr.bf16.mxu0 %v11569_v52  ;;  %v2176_v18 = vmax.f32 %v2048_v59, %v2144_v7  ;;  %v2145_v19 = vmul.f32 0.2, %v2051_v8  ;;  %v9302_v32 = vpop.f32.mrb[44].mxu1 }
 0x140   : > { %v1706_v11 = vmul.f32 0.2, %v1622_v61  ;;  %v1625_v12 = vadd.f32 %v9265_v5, %v11394_v21  ;;  %v1616_v13 = vpop.f32.mrb[47].mxu0  ;;  %v2174_v24 = vmax.f32 %v2040_v2, %v2142_v14  ;;  %v2143_v25 = vmul.f32 0.2, %v2043_v15  ;;  %v2055_v39 = vpop.f32.mrb[45].mxu1 }
 0x141   : > { %v1704_v16 = vmul.f32 0.2, %v1614_v4  ;;  %v1617_v17 = vadd.f32 %v11394_v21, %v1616_v13  ;;  %9333 = vmatmul.mubr.msk.bf16.gmra.mrb[68].mxu0 %vm249_vm1, %v2284_v6  ;;  %2209 = vst.msk [vmem:[#allocation2 + $0x91] sm:$0xff] %vm249_vm1, %v2176_v18  ;;  %v2177_v28 = vmax.f32 %v2051_v8, %v2145_v19  ;;  %v2064_v38 = vadd.f32 %v9302_v32, %v11394_v21  ;;  %v9303_v46 = vpop.f32.mrb[46].mxu1  ;;  %v11621_v57 = vld [vmem:[%s12599_s2] ss:$0 sm:$0xff] }
 0x142   : > { %v1738_v22 = vmax.f32 %v1622_v61, %v1706_v11  ;;  %v1707_v23 = vmul.f32 0.2, %v1625_v12  ;;  %9336 = vmatprep.mubr.msk.bf16.mxu0 %vm249_vm1, %v2285_v1  ;;  %9349 = vmatpush3.bf16.msra.mxu0 %v11569_v52  ;;  %2207 = vst.msk [vmem:[#allocation2 + $0x79] sm:$0xff] %vm249_vm1, %v2174_v24  ;;  %v2175_v31 = vmax.f32 %v2043_v15, %v2143_v25  ;;  %v2058_v53 = vpop.f32.mrb[47].mxu1  ;;  %v2233_v5 = vld [vmem:[#allocation2 + $0x8] sm:$0xff] }
 0x143   : > { %v1736_v26 = vmax.f32 %v1614_v4, %v1704_v16  ;;  %v1705_v27 = vmul.f32 0.2, %v1617_v17  ;;  %9350 = vmatprep.subr.bf16.mxu0 %v11588_v10  ;;  %v2277_v36 = vld [vmem:[#allocation2 + $0x228] sm:$0xff]  ;;  %2210 = vst.msk [vmem:[#allocation2 + $0x99] sm:$0xff] %vm249_vm1, %v2177_v28  ;;  %v2056_v45 = vadd.f32 %v11394_v21, %v2055_v39  ;;  %v2148_v50 = vmul.f32 0.2, %v2064_v38 }
 0x144   : > { %1771 = vst.msk [vmem:[#allocation2 + $0x258] sm:$0xff] %vm249_vm1, %v1738_v22  ;;  %v1739_v30 = vmax.f32 %v1625_v12, %v1707_v23  ;;  %v2275_v42 = vld [vmem:[#allocation2 + $0x210] sm:$0xff]  ;;  %2208 = vst.msk [vmem:[#allocation2 + $0x81] sm:$0xff] %vm249_vm1, %v2175_v31  ;;  %v2067_v51 = vadd.f32 %v9303_v46, %v11394_v21  ;;  %v2059_v58 = vadd.f32 %v11621_v57, %v2058_v53  ;;  %v2232_v4 = vld [vmem:[#allocation2] sm:$0xff] }
 0x145   : > { %1769 = vst.msk [vmem:[#allocation2 + $0x240] sm:$0xff] %vm249_vm1, %v1736_v26  ;;  %v1737_v33 = vmax.f32 %v1617_v17, %v1705_v27  ;;  %v9268_v34 = vpop.f32.mrb[48].mxu0  ;;  %v2278_v37 = vld [vmem:[#allocation2 + $0x230] sm:$0xff]  ;;  %v2146_v56 = vmul.f32 0.2, %v2056_v45  ;;  %v2180_v61 = vmax.f32 %v2064_v38, %v2148_v50  ;;  %v2248_v24 = vpack.c.bf16 %v2233_v5, %v2232_v4  ;;  %v2234_v53 = vld [vmem:[#allocation2 + $0x18] sm:$0xff] }
 0x146   : > { %1772 = vst.msk [vmem:[#allocation2 + $0x260] sm:$0xff] %vm249_vm1, %v1739_v30  ;;  %v1638_v40 = vadd.f32 %v9268_v34, %v11394_v21  ;;  %v1629_v41 = vpop.f32.mrb[49].mxu0  ;;  %v2276_v43 = vld [vmem:[#allocation2 + $0x218] sm:$0xff]  ;;  %v2287_v44 = vpack.c.bf16 %v2278_v37, %v2277_v36  ;;  %9351 = vmatpush3.bf16.msra.mxu0 %v11588_v10  ;;  %v2149_v62 = vmul.f32 0.2, %v2067_v51  ;;  %v2236_v46 = vld [vmem:[#allocation2 + $0x30] sm:$0xff] }
 0x147   : > { %1770 = vst.msk [vmem:[#allocation2 + $0x248] sm:$0xff] %vm249_vm1, %v1737_v33  ;;  %v1630_v47 = vadd.f32 %v11394_v21, %v1629_v41  ;;  %v9269_v48 = vpop.f32.mrb[50].mxu0  ;;  %v2286_v49 = vpack.c.bf16 %v2276_v43, %v2275_v42  ;;  %9368 = vmatprep.subr.bf16.mxu0 %v11601_v29  ;;  %v2147_v1 = vmul.f32 0.2, %v2059_v58  ;;  %2213 = vst.msk [vmem:[#allocation2 + $0xc1] sm:$0xff] %vm249_vm1, %v2180_v61  ;;  %v9306_v9 = vpop.f32.mrb[48].mxu1 }
 0x148   : > { %v1710_v54 = vmul.f32 0.2, %v1638_v40  ;;  %v1641_v20 = vadd.f32 %v9269_v48, %v11394_v21  ;;  %v1632_v55 = vpop.f32.mrb[51].mxu0  ;;  %v2178_v21 = vmax.f32 %v2056_v45, %v2146_v56  ;;  %v2181_v6 = vmax.f32 %v2067_v51, %v2149_v62  ;;  %v2071_v16 = vpop.f32.mrb[49].mxu1 }
 0x149   : > { %v1708_v59 = vmul.f32 0.2, %v1630_v47  ;;  %v1633_v60 = vadd.f32 %v11621_v57, %v1632_v55  ;;  %9337 = vmatmul.mubr.msk.bf16.gmra.mrb[72].mxu0 %vm249_vm1, %v2286_v49  ;;  %v2179_v8 = vmax.f32 %v2059_v58, %v2147_v1  ;;  %v2080_v15 = vadd.f32 %v11621_v57, %v9306_v9  ;;  %v9307_v26 = vpop.f32.mrb[50].mxu1 }
 0x14a   : > { %v1742_v63 = vmax.f32 %v1638_v40, %v1710_v54  ;;  %v1711_v0 = vmul.f32 0.2, %v1641_v20  ;;  %9340 = vmatprep.mubr.msk.bf16.mxu0 %vm249_vm1, %v2287_v44  ;;  %2211 = vst.msk [vmem:[#allocation2 + $0xa9] sm:$0xff] %vm249_vm1, %v2178_v21  ;;  %2214 = vst.msk [vmem:[#allocation2 + $0xc9] sm:$0xff] %vm249_vm1, %v2181_v6  ;;  %v2072_v25 = vadd.f32 %v11621_v57, %v2071_v16  ;;  %v2074_v33 = vpop.f32.mrb[51].mxu1  ;;  %v2235_v54 = vld [vmem:[#allocation2 + $0x20] sm:$0xff] }
 0x14b   : > { %v1740_v2 = vmax.f32 %v1630_v47, %v1708_v59  ;;  %v1709_v3 = vmul.f32 0.2, %v1633_v60  ;;  %v5440_v13 = vld [vmem:[#allocation2 + $0x258] sm:$0xff]  ;;  %2212 = vst.msk [vmem:[#allocation2 + $0xb1] sm:$0xff] %vm249_vm1, %v2179_v8  ;;  %v2152_v31 = vmul.f32 0.2, %v2080_v15  ;;  %v2083_v32 = vadd.f32 %v11621_v57, %v9307_v26 }
 0x14c   : > { %1775 = vst.msk [vmem:[#allocation2 + $0x288] sm:$0xff] %vm249_vm1, %v1742_v63  ;;  %v1743_v7 = vmax.f32 %v1641_v20, %v1711_v0  ;;  %v2279_v22 = vld [vmem:[#allocation2 + $0x240] sm:$0xff]  ;;  %v2150_v38 = vmul.f32 0.2, %v2072_v25  ;;  %v2075_v39 = vadd.f32 %v11621_v57, %v2074_v33  ;;  %v2237_v47 = vld [vmem:[#allocation2 + $0x38] sm:$0xff] }
 0x14d   : > { %1773 = vst.msk [vmem:[#allocation2 + $0x270] sm:$0xff] %vm249_vm1, %v1740_v2  ;;  %v1741_v11 = vmax.f32 %v1633_v60, %v1709_v3  ;;  %v9272_v12 = vpop.f32.mrb[52].mxu0  ;;  %v5441_v14 = vld [vmem:[#allocation2 + $0x260] sm:$0xff]  ;;  %v2184_v42 = vmax.f32 %v2080_v15, %v2152_v31  ;;  %v2153_v43 = vmul.f32 0.2, %v2083_v32  ;;  %v2250_v61 = vpack.c.bf16 %v2237_v47, %v2236_v46 }
 0x14e   : > { %1776 = vst.msk [vmem:[#allocation2 + $0x290] sm:$0xff] %vm249_vm1, %v1743_v7  ;;  %v1654_v17 = vadd.f32 %v11621_v57, %v9272_v12  ;;  %v1645_v18 = vpop.f32.mrb[53].mxu0  ;;  %v5456_v19 = vpack.c.bf16 %v5441_v14, %v5440_v13  ;;  %v2280_v23 = vld [vmem:[#allocation2 + $0x248] sm:$0xff]  ;;  %v2182_v48 = vmax.f32 %v2072_v25, %v2150_v38  ;;  %v2151_v49 = vmul.f32 0.2, %v2075_v39  ;;  %v11671_v31 = vld [vmem:[#allocation2 + $0x60] sm:$0xff] }
 0x14f   : > { %1774 = vst.msk [vmem:[#allocation2 + $0x278] sm:$0xff] %vm249_vm1, %v1741_v11  ;;  %v1646_v27 = vadd.f32 %v11621_v57, %v1645_v18  ;;  %v9273_v28 = vpop.f32.mrb[54].mxu0  ;;  %v2288_v30 = vpack.c.bf16 %v2280_v23, %v2279_v22  ;;  %2217 = vst.msk [vmem:[#allocation2 + $0xf1] sm:$0xff] %vm249_vm1, %v2184_v42  ;;  %v2185_v20 = vmax.f32 %v2083_v32, %v2153_v43  ;;  %v9310_v58 = vpop.f32.mrb[52].mxu1  ;;  %v11664_v23 = vld [vmem:[%s12600_s3 + $0x48] sm:$0xff]   ;;  %v10718_v38 = vld [vmem:[%s12600_s3] sm:$0xff]  }
 0x150   : > { %v1714_v34 = vmul.f32 0.2, %v1654_v17  ;;  %v1657_v36 = vadd.f32 %v11621_v57, %v9273_v28  ;;  %v1648_v37 = vpop.f32.mrb[55].mxu0  ;;  %9712 = vmatprep.mubr.msk.bf16.mxu1 %vm249_vm1, %v5456_v19  ;;  %2215 = vst.msk [vmem:[#allocation2 + $0xd9] sm:$0xff] %vm249_vm1, %v2182_v48  ;;  %v2183_v56 = vmax.f32 %v2075_v39, %v2151_v49  ;;  %v2096_v0 = vadd.f32 %v11621_v57, %v9310_v58  ;;  %v2087_v21 = vpop.f32.mrb[53].mxu1  ;;  %v11673_v32 = vld [vmem:[#allocation2 + $0x68] sm:$0xff] }
 0x151   : > { %v1712_v40 = vmul.f32 0.2, %v1646_v27  ;;  %v1649_v41 = vadd.f32 %v11621_v57, %v1648_v37  ;;  %9341 = vmatmul.mubr.msk.bf16.gmra.mrb[76].mxu0 %vm249_vm1, %v2288_v30  ;;  %2218 = vst.msk [vmem:[#allocation2 + $0xf9] sm:$0xff] %vm249_vm1, %v2185_v20  ;;  %v2249_v3 = vpack.c.bf16 %v2235_v54, %v2234_v53  ;;  %v2088_v7 = vadd.f32 %v11621_v57, %v2087_v21  ;;  %v9311_v8 = vpop.f32.mrb[54].mxu1  ;;  %v2238_v39 = vld [vmem:[#allocation2 + $0x48] sm:$0xff] }
 0x152   : > { %v1746_v44 = vmax.f32 %v1654_v17, %v1714_v34  ;;  %v1715_v45 = vmul.f32 0.2, %v1657_v36  ;;  %9352 = vmatprep.mubr.msk.bf16.mxu0 %vm249_vm1, %v2248_v24  ;;  %2216 = vst.msk [vmem:[#allocation2 + $0xe1] sm:$0xff] %vm249_vm1, %v2183_v56  ;;  %v2156_v13 = vmul.f32 0.2, %v2096_v0  ;;  %v2099_v14 = vadd.f32 %v11621_v57, %v9311_v8  ;;  %v2090_v15 = vpop.f32.mrb[55].mxu1 }
 0x153   : > { %v1744_v50 = vmax.f32 %v1646_v27, %v1712_v40  ;;  %v1713_v51 = vmul.f32 0.2, %v1649_v41  ;;  %v5444_v62 = vld [vmem:[#allocation2 + $0x288] sm:$0xff]  ;;  %v2154_v19 = vmul.f32 0.2, %v2088_v7  ;;  %v2091_v22 = vadd.f32 %v11621_v57, %v2090_v15  ;;  %v2239_v40 = vld [vmem:[#allocation2 + $0x50] sm:$0xff] }
 0x154   : > { %1779 = vst.msk [vmem:[#allocation2 + $0x2b8] sm:$0xff] %vm249_vm1, %v1746_v44  ;;  %v1747_v55 = vmax.f32 %v1657_v36, %v1715_v45  ;;  %v5442_v4 = vld [vmem:[#allocation2 + $0x270] sm:$0xff]  ;;  %v2188_v26 = vmax.f32 %v2096_v0, %v2156_v13  ;;  %v2157_v27 = vmul.f32 0.2, %v2099_v14  ;;  %v2252_v48 = vpack.c.bf16 %v11673_v32, %v11671_v31  ;;  %v2245_v31 = vld [vmem:[#allocation2 + $0x98] sm:$0xff] }
 0x155   : > { %1777 = vst.msk [vmem:[#allocation2 + $0x2a0] sm:$0xff] %vm249_vm1, %v1744_v50  ;;  %v1745_v59 = vmax.f32 %v1649_v41, %v1713_v51  ;;  %v9276_v60 = vpop.f32.mrb[56].mxu0  ;;  %v5445_v63 = vld [vmem:[#allocation2 + $0x290] sm:$0xff]  ;;  %v2186_v33 = vmax.f32 %v2088_v7, %v2154_v19  ;;  %v2155_v34 = vmul.f32 0.2, %v2091_v22 }
 0x156   : > { %1780 = vst.msk [vmem:[#allocation2 + $0x2c0] sm:$0xff] %vm249_vm1, %v1747_v55  ;;  %v1670_v1 = vadd.f32 %v11621_v57, %v9276_v60  ;;  %v1661_v2 = vpop.f32.mrb[57].mxu0  ;;  %v5443_v5 = vld [vmem:[#allocation2 + $0x278] sm:$0xff]  ;;  %v5458_v6 = vpack.c.bf16 %v5445_v63, %v5444_v62  ;;  %2221 = vst.msk [vmem:[#allocation2 + $0x121] sm:$0xff] %vm249_vm1, %v2188_v26  ;;  %v2189_v41 = vmax.f32 %v2099_v14, %v2157_v27  ;;  %v11687_v45 = vld [vmem:[%s12600_s3 + $0x50] sm:$0xff]  }
 0x157   : > { %1778 = vst.msk [vmem:[#allocation2 + $0x2a8] sm:$0xff] %vm249_vm1, %v1745_v59  ;;  %v1662_v9 = vadd.f32 %v11621_v57, %v1661_v2  ;;  %v9277_v11 = vpop.f32.mrb[58].mxu0  ;;  %v5457_v12 = vpack.c.bf16 %v5443_v5, %v5442_v4  ;;  %2219 = vst.msk [vmem:[#allocation2 + $0x109] sm:$0xff] %vm249_vm1, %v2186_v33  ;;  %v2187_v43 = vmax.f32 %v2091_v22, %v2155_v34  ;;  %v9314_v44 = vpop.f32.mrb[56].mxu1 }
 0x158   : > { %v1718_v16 = vmul.f32 0.2, %v1670_v1  ;;  %v1673_v17 = vadd.f32 %v11621_v57, %v9277_v11  ;;  %v1664_v18 = vpop.f32.mrb[59].mxu0  ;;  %2222 = vst.msk [vmem:[#allocation2 + $0x129] sm:$0xff] %vm249_vm1, %v2189_v41  ;;  %v2112_v51 = vadd.f32 %v11621_v57, %v9314_v44  ;;  %v2103_v53 = vpop.f32.mrb[57].mxu1  ;;  %v2251_v55 = vpack.c.bf16 %v2239_v40, %v2238_v39 }
 0x159   : > { %v1716_v24 = vmul.f32 0.2, %v1662_v9  ;;  %v1665_v25 = vadd.f32 %v11621_v57, %v1664_v18  ;;  %9353 = vmatmul.mubr.msk.bf16.vlgmr.msra.gmra.mrb[64].mxu0 %vm249_vm1, %v2249_v3  ;;  %9713 = vmatmul.mubr.msk.bf16.vlgmr.msra.gmra.mrb[64].mxu1 %vm249_vm1, %v5457_v12  ;;  %2220 = vst.msk [vmem:[#allocation2 + $0x111] sm:$0xff] %vm249_vm1, %v2187_v43  ;;  %v2104_v60 = vadd.f32 %v11621_v57, %v2103_v53 }
 0x15a   : > { %v1750_v28 = vmax.f32 %v1670_v1, %v1718_v16  ;;  %v1719_v30 = vmul.f32 0.2, %v1673_v17  ;;  %9356 = vmatprep.mubr.msk.bf16.mxu0 %vm249_vm1, %v2250_v61  ;;  %9716 = vmatprep.mubr.msk.bf16.mxu1 %vm249_vm1, %v5458_v6  ;;  %v9315_v61 = vpop.f32.mrb[58].mxu1  ;;  %v2160_v21 = vmul.f32 0.2, %v2112_v51 }
 0x15b   : > { %v1748_v36 = vmax.f32 %v1662_v9, %v1716_v24  ;;  %v1717_v37 = vmul.f32 0.2, %v1665_v25  ;;  %9729 = vmatpush3.bf16.msra.mxu1 %v10718_v38  ;;  %9369 = vmatpush3.bf16.msra.mxu0 %v11601_v29  ;;  %v5448_v49 = vld [vmem:[#allocation2 + $0x2b8] sm:$0xff]  ;;  %v2115_v1 = vadd.f32 %v11621_v57, %v9315_v61  ;;  %v2106_v2 = vpop.f32.mrb[59].mxu1  ;;  %v2158_v6 = vmul.f32 0.2, %v2104_v60 }
 0x15c   : > { %1783 = vst.msk [vmem:[#allocation2 + $0x2e8] sm:$0xff] %vm249_vm1, %v1750_v28  ;;  %v1751_v42 = vmax.f32 %v1673_v17, %v1719_v30  ;;  %9730 = vmatprep.subr.bf16.mxu1 %v11556_v35  ;;  %9370 = vmatprep.subr.bf16.mxu0 %v11664_v23  ;;  %v5446_v56 = vld [vmem:[#allocation2 + $0x2a0] sm:$0xff]  ;;  %v2107_v7 = vadd.f32 %v11621_v57, %v2106_v2  ;;  %v2242_v24 = vld [vmem:[#allocation2 + $0x78] sm:$0xff]  ;;  %v2244_v30 = vld [vmem:[#allocation2 + $0x90] sm:$0xff] }
 0x15d   : > { %1781 = vst.msk [vmem:[#allocation2 + $0x2d0] sm:$0xff] %vm249_vm1, %v1748_v36  ;;  %v1749_v46 = vmax.f32 %v1665_v25, %v1717_v37  ;;  %v9280_v47 = vpop.f32.mrb[60].mxu0  ;;  %v5449_v50 = vld [vmem:[#allocation2 + $0x2c0] sm:$0xff]  ;;  %v2192_v11 = vmax.f32 %v2112_v51, %v2160_v21  ;;  %v2161_v12 = vmul.f32 0.2, %v2115_v1  ;;  %v2190_v15 = vmax.f32 %v2104_v60, %v2158_v6  ;;  %v5416_v61 = vld [vmem:[#allocation2 + $0xc8] sm:$0xff] }
 0x15e   : > { %1784 = vst.msk [vmem:[#allocation2 + $0x2f0] sm:$0xff] %vm249_vm1, %v1751_v42  ;;  %v1686_v54 = vadd.f32 %v11621_v57, %v9280_v47  ;;  %v1677_v20 = vpop.f32.mrb[61].mxu0  ;;  %v5447_v58 = vld [vmem:[#allocation2 + $0x2a8] sm:$0xff]  ;;  %v5460_v59 = vpack.c.bf16 %v5449_v50, %v5448_v49  ;;  %v2159_v16 = vmul.f32 0.2, %v2107_v7  ;;  %v2243_v25 = vld [vmem:[#allocation2 + $0x80] sm:$0xff]  ;;  %v2254_v47 = vpack.c.bf16 %v2245_v31, %v2244_v30 }
 0x15f   : > { %1782 = vst.msk [vmem:[#allocation2 + $0x2d8] sm:$0xff] %vm249_vm1, %v1749_v46  ;;  %v1678_v62 = vadd.f32 %v11621_v57, %v1677_v20  ;;  %v9281_v63 = vpop.f32.mrb[62].mxu0  ;;  %v5459_v0 = vpack.c.bf16 %v5447_v58, %v5446_v56  ;;  %9731 = vmatpush3.bf16.msra.mxu1 %v11556_v35  ;;  %9371 = vmatpush3.bf16.msra.mxu0 %v11664_v23  ;;  %v11710_v35 = vld [vmem:[%s12600_s3 + $0x58] sm:$0xff]   ;;  %2225 = vst.msk [vmem:[#allocation2 + $0x151] sm:$0xff] %vm249_vm1, %v2192_v11  ;;  %v9318_v27 = vpop.f32.mrb[60].mxu1  ;;  %v2588_v20 = vld [vmem:[#allocation2 + $0x1] sm:$0xff] }
 0x160   : > { %v1722_v3 = vmul.f32 0.2, %v1686_v54  ;;  %v1689_v4 = vadd.f32 %v11621_v57, %v9281_v63  ;;  %v1680_v5 = vpop.f32.mrb[63].mxu0  ;;  %9732 = vmatprep.subr.bf16.mxu1 %v11569_v52  ;;  %9372 = vmatprep.subr.bf16.mxu0 %v11687_v45  ;;  %v2193_v19 = vmax.f32 %v2115_v1, %v2161_v12  ;;  %2223 = vst.msk [vmem:[#allocation2 + $0x139] sm:$0xff] %vm249_vm1, %v2190_v15  ;;  %v2119_v34 = vpop.f32.mrb[61].mxu1  ;;  %v2247_v58 = vld [vmem:[#allocation2 + $0xb0] sm:$0xff] }
 0x161   : > { %v1720_v8 = vmul.f32 0.2, %v1678_v62  ;;  %v1681_v9 = vadd.f32 %v11621_v57, %v1680_v5  ;;  %9357 = vmatmul.mubr.msk.bf16.gmra.mrb[68].mxu0 %vm249_vm1, %v2251_v55  ;;  %9717 = vmatmul.mubr.msk.bf16.gmra.mrb[68].mxu1 %vm249_vm1, %v5459_v0  ;;  %v2191_v26 = vmax.f32 %v2107_v7, %v2159_v16  ;;  %v2128_v33 = vadd.f32 %v11621_v57, %v9318_v27  ;;  %v9319_v39 = vpop.f32.mrb[62].mxu1  ;;  %v2589_v55 = vld [vmem:[#allocation2 + $0x9] sm:$0xff]  ;;  %v5415_v60 = vld [vmem:[#allocation2 + $0xc0] sm:$0xff]  ;;  %v5417_v6 = vld [vmem:[#allocation2 + $0xd8] sm:$0xff] }
 0x162   : > { %v1754_v13 = vmax.f32 %v1686_v54, %v1722_v3  ;;  %v1723_v14 = vmul.f32 0.2, %v1689_v4  ;;  %9360 = vmatprep.mubr.msk.bf16.mxu0 %vm249_vm1, %v2252_v48  ;;  %9720 = vmatprep.mubr.msk.bf16.mxu1 %vm249_vm1, %v5460_v59  ;;  %2226 = vst.msk [vmem:[#allocation2 + $0x159] sm:$0xff] %vm249_vm1, %v2193_v19  ;;  %v2120_v38 = vadd.f32 %v11621_v57, %v2119_v34  ;;  %v2122_v46 = vpop.f32.mrb[63].mxu1  ;;  %v2590_v3 = vld [vmem:[#allocation2 + $0x19] sm:$0xff]  ;;  %v2591_v5 = vld [vmem:[#allocation2 + $0x21] sm:$0xff] }
 0x163   : > { %v1752_v17 = vmax.f32 %v1678_v62, %v1720_v8  ;;  %v1721_v18 = vmul.f32 0.2, %v1681_v9  ;;  %9733 = vmatpush3.bf16.msra.mxu1 %v11569_v52  ;;  %9373 = vmatpush3.bf16.msra.mxu0 %v11687_v45  ;;  %v11727_v52 = vld [vmem:[%s12600_s3 + $0x60] sm:$0xff]   ;;  %2224 = vst.msk [vmem:[#allocation2 + $0x141] sm:$0xff] %vm249_vm1, %v2191_v26  ;;  %v2253_v40 = vpack.c.bf16 %v2243_v25, %v2242_v24  ;;  %v5452_v42 = vld [vmem:[#allocation2 + $0x2e8] sm:$0xff]  ;;  %v5420_v11 = vld [vmem:[#allocation2 + $0xf8] sm:$0xff] }
 0x164   : > { %1787 = vst.msk [vmem:[#allocation2 + $0x318] sm:$0xff] %vm249_vm1, %v1754_v13  ;;  %v1755_v22 = vmax.f32 %v1689_v4, %v1723_v14  ;;  %9734 = vmatprep.subr.bf16.mxu1 %v11588_v10  ;;  %9374 = vmatprep.subr.bf16.mxu0 %v11710_v35  ;;  %v5450_v36 = vld [vmem:[#allocation2 + $0x2d0] sm:$0xff]  ;;  %v2164_v43 = vmul.f32 0.2, %v2128_v33  ;;  %v2131_v44 = vadd.f32 %v11621_v57, %v9319_v39  ;;  %v2162_v49 = vmul.f32 0.2, %v2120_v38 }
 0x165   : > { %1785 = vst.msk [vmem:[#allocation2 + $0x300] sm:$0xff] %vm249_vm1, %v1752_v17  ;;  %v1753_v28 = vmax.f32 %v1681_v9, %v1721_v18  ;;  %v5453_v32 = vld [vmem:[#allocation2 + $0x2f0] sm:$0xff]  ;;  %v2123_v50 = vadd.f32 %v11621_v57, %v2122_v46  ;;  %v2246_v57 = vld [vmem:[#allocation2 + $0xa8] sm:$0xff]  ;;  %v2604_v0 = vpack.c.bf16 %v2589_v55, %v2588_v20  ;;  %v5431_v2 = vpack.c.bf16 %v5416_v61, %v5415_v60  ;;  %v5418_v7 = vld [vmem:[#allocation2 + $0xe0] sm:$0xff] }
 0x166   : > { %1788 = vst.msk [vmem:[#allocation2 + $0x320] sm:$0xff] %vm249_vm1, %v1755_v22  ;;  %v5451_v37 = vld [vmem:[#allocation2 + $0x2d8] sm:$0xff]  ;;  %v5462_v48 = vpack.c.bf16 %v5453_v32, %v5452_v42  ;;  %v2165_v51 = vmul.f32 0.2, %v2131_v44  ;;  %v2194_v53 = vmax.f32 %v2120_v38, %v2162_v49  ;;  %v2255_v21 = vpack.c.bf16 %v2247_v58, %v2246_v57  ;;  %v5419_v9 = vld [vmem:[#allocation2 + $0xf0] sm:$0xff]  ;;  %v11757_v16 = vld [vmem:[%s12600_s3 + $0x68] sm:$0xff]  }
 0x167   : > { %1786 = vst.msk [vmem:[#allocation2 + $0x308] sm:$0xff] %vm249_vm1, %v1753_v28  ;;  %v5461_v41 = vpack.c.bf16 %v5451_v37, %v5450_v36  ;;  %9735 = vmatpush3.bf16.msra.mxu1 %v11588_v10  ;;  %9375 = vmatpush3.bf16.msra.mxu0 %v11710_v35  ;;  %v2196_v10 = vmax.f32 %v2128_v33, %v2164_v43  ;;  %v2163_v54 = vmul.f32 0.2, %v2123_v50  ;;  %v2592_v4 = vld [vmem:[#allocation2 + $0x31] sm:$0xff]  ;;  %v2593_v8 = vld [vmem:[#allocation2 + $0x39] sm:$0xff]  ;;  %v2594_v17 = vld [vmem:[#allocation2 + $0x49] sm:$0xff] }
 0x168   : > { %9752 = vmatprep.subr.bf16.mxu1 %v11601_v29  ;;  %9392 = vmatprep.subr.bf16.mxu0 %v11727_v52  ;;  %v2197_v56 = vmax.f32 %v2131_v44, %v2165_v51  ;;  %2227 = vst.msk [vmem:[#allocation2 + $0x169] sm:$0xff] %vm249_vm1, %v2194_v53  ;;  %v2605_v12 = vpack.c.bf16 %v2591_v5, %v2590_v3  ;;  %v2596_v18 = vld [vmem:[#allocation2 + $0x61] sm:$0xff]  ;;  %v11768_v19 = vld [vmem:[%s12600_s3 + $0x70] sm:$0xff]   ;;  %v11779_v33 = vld [vmem:[%s12600_s3 + $0x78] sm:$0xff]  }
 0x169   : > { %9361 = vmatmul.mubr.msk.bf16.gmra.mrb[72].mxu0 %vm249_vm1, %v2253_v40  ;;  %9721 = vmatmul.mubr.msk.bf16.gmra.mrb[72].mxu1 %vm249_vm1, %v5461_v41  ;;  %2229 = vst.msk [vmem:[#allocation2 + $0x181] sm:$0xff] %vm249_vm1, %v2196_v10  ;;  %v2195_v59 = vmax.f32 %v2123_v50, %v2163_v54  ;;  %v5432_v13 = vpack.c.bf16 %v5418_v7, %v5417_v6  ;;  %v2595_v22 = vld [vmem:[#allocation2 + $0x51] sm:$0xff]  ;;  %v5421_v24 = vld [vmem:[#allocation2 + $0x108] sm:$0xff]  ;;  %v5423_v27 = vld [vmem:[#allocation2 + $0x120] sm:$0xff] }
 0x16a   : > { %9364 = vmatprep.mubr.msk.bf16.mxu0 %vm249_vm1, %v2254_v47  ;;  %9724 = vmatprep.mubr.msk.bf16.mxu1 %vm249_vm1, %v5462_v48  ;;  %2230 = vst.msk [vmem:[#allocation2 + $0x189] sm:$0xff] %vm249_vm1, %v2197_v56  ;;  %v2606_v14 = vpack.c.bf16 %v2593_v8, %v2592_v4  ;;  %v5433_v15 = vpack.c.bf16 %v5420_v11, %v5419_v9  ;;  %v5422_v25 = vld [vmem:[#allocation2 + $0x110] sm:$0xff]  ;;  %v5424_v28 = vld [vmem:[#allocation2 + $0x128] sm:$0xff]  ;;  %v11790_v36 = vld [vmem:[%s12600_s3 + $0x80] sm:$0xff]  }
 0x16b   : > { %2228 = vst.msk [vmem:[#allocation2 + $0x171] sm:$0xff] %vm249_vm1, %v2195_v59  ;;  %v2597_v26 = vld [vmem:[#allocation2 + $0x69] sm:$0xff]  ;;  %v5434_v30 = vpack.c.bf16 %v5422_v25, %v5421_v24  ;;  %v5435_v32 = vpack.c.bf16 %v5424_v28, %v5423_v27  ;;  %v2600_v34 = vld [vmem:[#allocation2 + $0x91] sm:$0xff]  ;;  %v2599_v37 = vld [vmem:[#allocation2 + $0x81] sm:$0xff] }
 0x16c   : > { %v5454_v62 = vld [vmem:[#allocation2 + $0x300] sm:$0xff]  ;;  %v2608_v31 = vpack.c.bf16 %v2597_v26, %v2596_v18  ;;  %v5425_v38 = vld [vmem:[#allocation2 + $0x138] sm:$0xff]  ;;  %v5427_v41 = vld [vmem:[#allocation2 + $0x150] sm:$0xff] }
 0x16d   : > { %v5426_v39 = vld [vmem:[#allocation2 + $0x140] sm:$0xff]  ;;  %v5428_v42 = vld [vmem:[#allocation2 + $0x158] sm:$0xff]  ;;  %v2602_v47 = vld [vmem:[#allocation2 + $0xa9] sm:$0xff] }
 0x16e   : > { %v5455_v63 = vld [vmem:[#allocation2 + $0x308] sm:$0xff]  ;;  %v2601_v40 = vld [vmem:[#allocation2 + $0x99] sm:$0xff]  ;;  %v5436_v44 = vpack.c.bf16 %v5426_v39, %v5425_v38  ;;  %v5437_v46 = vpack.c.bf16 %v5428_v42, %v5427_v41  ;;  %v2784_v57 = vld [vmem:[#allocation2 + $0x1b1] sm:$0xff] }
 0x16f   : > { %v5463_v1 = vpack.c.bf16 %v5455_v63, %v5454_v62  ;;  %v2782_v48 = vld [vmem:[#allocation2 + $0x199] sm:$0xff]  ;;  %v2783_v49 = vld [vmem:[#allocation2 + $0x1a1] sm:$0xff]  ;;  %v5707_v53 = vld [vmem:[#allocation2 + $0xc9] sm:$0xff] }
 0x170   : > { %v5429_v50 = vld [vmem:[#allocation2 + $0x168] sm:$0xff]  ;;  %v2798_v54 = vpack.c.bf16 %v2783_v49, %v2782_v48  ;;  %v2785_v59 = vld [vmem:[#allocation2 + $0x1b9] sm:$0xff]  ;;  %v2787_v62 = vld [vmem:[#allocation2 + $0x1d1] sm:$0xff] }
 0x171   : > { %9365 = vmatmul.mubr.msk.bf16.gmra.mrb[76].mxu0 %vm249_vm1, %v2255_v21  ;;  %9725 = vmatmul.mubr.msk.bf16.gmra.mrb[76].mxu1 %vm249_vm1, %v5463_v1  ;;  %v5706_v51 = vld [vmem:[#allocation2 + $0xc1] sm:$0xff]  ;;  %v2786_v58 = vld [vmem:[#allocation2 + $0x1c9] sm:$0xff]  ;;  %v5708_v60 = vld [vmem:[#allocation2 + $0xd9] sm:$0xff]  ;;  %v2799_v21 = vpack.c.bf16 %v2785_v59, %v2784_v57 }
 0x172   : > { %9736 = vmatprep.mubr.msk.bf16.mxu1 %vm249_vm1, %v5431_v2  ;;  %9376 = vmatprep.mubr.msk.bf16.mxu0 %vm249_vm1, %v2604_v0  ;;  %v5430_v10 = vld [vmem:[#allocation2 + $0x170] sm:$0xff]  ;;  %v5722_v56 = vpack.c.bf16 %v5707_v53, %v5706_v51  ;;  %v5709_v61 = vld [vmem:[#allocation2 + $0xe1] sm:$0xff]  ;;  %v5711_v0 = vld [vmem:[#allocation2 + $0xf9] sm:$0xff]  ;;  %v2800_v2 = vpack.c.bf16 %v2787_v62, %v2786_v58 }
 0x173   : > { %v5438_v55 = vpack.c.bf16 %v5430_v10, %v5429_v50  ;;  %v5710_v63 = vld [vmem:[#allocation2 + $0xf1] sm:$0xff]  ;;  %v5723_v1 = vpack.c.bf16 %v5709_v61, %v5708_v60  ;;  %v11809_v4 = vld [vmem:[%s12600_s3 + $0x88] sm:$0xff]   ;;  %v2790_v11 = vld [vmem:[#allocation2 + $0x1f9] sm:$0xff] }
 0x174   : > { %v5724_v3 = vpack.c.bf16 %v5711_v0, %v5710_v63  ;;  %v2788_v5 = vld [vmem:[#allocation2 + $0x1e1] sm:$0xff]  ;;  %v2789_v6 = vld [vmem:[#allocation2 + $0x1e9] sm:$0xff]  ;;  %v5713_v9 = vld [vmem:[#allocation2 + $0x111] sm:$0xff] }
 0x175   : > { %v11820_v7 = vld [vmem:[%s12600_s3 + $0x90] sm:$0xff]   ;;  %v2793_v24 = vld [vmem:[#allocation2 + $0x219] sm:$0xff]  ;;  %v5717_v27 = vld [vmem:[#allocation2 + $0x141] sm:$0xff] }
 0x176   : > { %v5712_v8 = vld [vmem:[#allocation2 + $0x109] sm:$0xff]  ;;  %v5716_v26 = vld [vmem:[#allocation2 + $0x139] sm:$0xff]  ;;  %v5873_v62 = vld [vmem:[#allocation2 + $0x2a1] sm:$0xff] }
 0x177   : > { %v2794_v25 = vld [vmem:[#allocation2 + $0x229] sm:$0xff]  ;;  %v11844_v28 = vld [vmem:[%s12600_s3 + $0xa0] sm:$0xff]   ;;  %v2977_v41 = vld [vmem:[#allocation2 + $0x338] sm:$0xff] }
 0x178   : > { %v2976_v38 = vld [vmem:[#allocation2 + $0x330] sm:$0xff]  ;;  %v5867_v42 = vld [vmem:[#allocation2 + $0x259] sm:$0xff]  ;;  %v2978_v48 = vld [vmem:[#allocation2 + $0x348] sm:$0xff] }
 0x179   : > { %9377 = vmatmul.mubr.msk.bf16.vlgmr.msra.gmra.mrb[64].mxu0 %vm249_vm1, %v2605_v12  ;;  %9737 = vmatmul.mubr.msk.bf16.vlgmr.msra.gmra.mrb[64].mxu1 %vm249_vm1, %v5432_v13  ;;  %v2791_v12 = vld [vmem:[#allocation2 + $0x201] sm:$0xff]  ;;  %v2797_v39 = vld [vmem:[#allocation2 + $0x249] sm:$0xff]  ;;  %v5870_v50 = vld [vmem:[#allocation2 + $0x279] sm:$0xff] }
 0x17a   : > { %9380 = vmatprep.mubr.msk.bf16.mxu0 %vm249_vm1, %v2606_v14  ;;  %9740 = vmatprep.mubr.msk.bf16.mxu1 %vm249_vm1, %v5433_v15  ;;  %v5714_v13 = vld [vmem:[#allocation2 + $0x121] sm:$0xff]  ;;  %v5715_v14 = vld [vmem:[#allocation2 + $0x129] sm:$0xff]  ;;  %v5725_v15 = vpack.c.bf16 %v5713_v9, %v5712_v8  ;;  %v2982_v59 = vld [vmem:[#allocation2 + $0x378] sm:$0xff] }
 0x17b   : > { %9753 = vmatpush3.bf16.msra.mxu1 %v11601_v29  ;;  %9393 = vmatpush3.bf16.msra.mxu0 %v11727_v52  ;;  %v2607_v29 = vpack.c.bf16 %v2595_v22, %v2594_v17  ;;  %v2802_v17 = vpack.c.bf16 %v2791_v12, %v2790_v11  ;;  %v5726_v18 = vpack.c.bf16 %v5715_v14, %v5714_v13  ;;  %v11831_v22 = vld [vmem:[%s12600_s3 + $0x98] sm:$0xff]   ;;  %v2979_v49 = vld [vmem:[#allocation2 + $0x350] sm:$0xff]  ;;  %v2980_v10 = vld [vmem:[#allocation2 + $0x360] sm:$0xff] }
 0x17c   : > { %9754 = vmatprep.subr.bf16.mxu1 %v11664_v23  ;;  %9394 = vmatprep.subr.bf16.mxu0 %v11757_v16  ;;  %v2981_v51 = vld [vmem:[#allocation2 + $0x368] sm:$0xff]  ;;  %v2983_v60 = vld [vmem:[#allocation2 + $0x380] sm:$0xff]  ;;  %v2984_v61 = vld [vmem:[#allocation2 + $0x390] sm:$0xff] }
 0x17d   : > { %v5871_v53 = vld [vmem:[#allocation2 + $0x289] sm:$0xff]  ;;  %v11883_v8 = vld [vmem:[%s12600_s3 + $0xb8] sm:$0xff]   ;;  %v2988_v11 = vld [vmem:[#allocation2 + $0x3c0] sm:$0xff] }
 0x17e   : > { %v11861_v58 = vld [vmem:[%s12600_s3 + $0xa8] sm:$0xff]   ;;  %v11874_v0 = vld [vmem:[%s12600_s3 + $0xb0] sm:$0xff]   ;;  %v5878_v13 = vld [vmem:[#allocation2 + $0x2d9] sm:$0xff] }
 0x17f   : > { %9755 = vmatpush3.bf16.msra.mxu1 %v11664_v23  ;;  %9395 = vmatpush3.bf16.msra.mxu0 %v11757_v16  ;;  %v2598_v23 = vld [vmem:[#allocation2 + $0x79] sm:$0xff]  ;;  %v5874_v63 = vld [vmem:[#allocation2 + $0x2a9] sm:$0xff]  ;;  %v5877_v12 = vld [vmem:[#allocation2 + $0x2d1] sm:$0xff] }
 0x180   : > { %9756 = vmatprep.subr.bf16.mxu1 %v11687_v45  ;;  %9396 = vmatprep.subr.bf16.mxu0 %v11768_v19  ;;  %v2609_v43 = vpack.c.bf16 %v2599_v37, %v2598_v23  ;;  %v5727_v23 = vpack.c.bf16 %v5717_v27, %v5716_v26  ;;  %v2796_v37 = vld [vmem:[#allocation2 + $0x241] sm:$0xff]  ;;  %v2987_v9 = vld [vmem:[#allocation2 + $0x3b0] sm:$0xff] }
 0x181   : > { %9381 = vmatmul.mubr.msk.bf16.gmra.mrb[68].mxu0 %vm249_vm1, %v2607_v29  ;;  %9741 = vmatmul.mubr.msk.bf16.gmra.mrb[68].mxu1 %vm249_vm1, %v5434_v30  ;;  %v2795_v29 = vld [vmem:[#allocation2 + $0x231] sm:$0xff]  ;;  %v11896_v14 = vld [vmem:[%s12600_s3 + $0xc0] sm:$0xff]  }
 0x182   : > { %9384 = vmatprep.mubr.msk.bf16.mxu0 %vm249_vm1, %v2608_v31  ;;  %9744 = vmatprep.mubr.msk.bf16.mxu1 %vm249_vm1, %v5435_v32  ;;  %v5718_v30 = vld [vmem:[#allocation2 + $0x151] sm:$0xff]  ;;  %v5719_v31 = vld [vmem:[#allocation2 + $0x159] sm:$0xff]  ;;  %v5881_v27 = vld [vmem:[#allocation2 + $0x301] sm:$0xff] }
 0x183   : > { %9757 = vmatpush3.bf16.msra.mxu1 %v11687_v45  ;;  %9397 = vmatpush3.bf16.msra.mxu0 %v11768_v19  ;;  %v2610_v45 = vpack.c.bf16 %v2601_v40, %v2600_v34  ;;  %v5728_v34 = vpack.c.bf16 %v5719_v31, %v5718_v30  ;;  %v5721_v40 = vld [vmem:[#allocation2 + $0x171] sm:$0xff]  ;;  %v2991_v26 = vld [vmem:[#allocation2 + $0x3e0] sm:$0xff] }
 0x184   : > { %9758 = vmatprep.subr.bf16.mxu1 %v11710_v35  ;;  %9398 = vmatprep.subr.bf16.mxu0 %v11779_v33  ;;  %v6029_v30 = vld [vmem:[#allocation2 + $0x3f0] sm:$0xff]  ;;  %v6030_v31 = vld [vmem:[#allocation2 + $0x3f8] sm:$0xff] }
 0x187   : > { %9759 = vmatpush3.bf16.msra.mxu1 %v11710_v35  ;;  %9399 = vmatpush3.bf16.msra.mxu0 %v11779_v33  ;;  %v2603_v35 = vld [vmem:[#allocation2 + $0xb1] sm:$0xff] }
 0x188   : > { %9776 = vmatprep.subr.bf16.mxu1 %v11727_v52  ;;  %9416 = vmatprep.subr.bf16.mxu0 %v11790_v36  ;;  %v2611_v20 = vpack.c.bf16 %v2603_v35, %v2602_v47  ;;  %v5869_v35 = vld [vmem:[#allocation2 + $0x271] sm:$0xff] }
 0x189   : > { %9385 = vmatmul.mubr.msk.bf16.gmra.mrb[72].mxu0 %vm249_vm1, %v2609_v43  ;;  %9745 = vmatmul.mubr.msk.bf16.gmra.mrb[72].mxu1 %vm249_vm1, %v5436_v44  ;;  %v5868_v43 = vld [vmem:[#allocation2 + $0x261] sm:$0xff]  ;;  %v2805_v44 = vpack.c.bf16 %v2797_v39, %v2796_v37  ;;  %v6045_v37 = vpack.c.bf16 %v6030_v31, %v6029_v30  ;;  %v3369_v30 = vld [vmem:[#allocation2 + $0x369] sm:$0xff] }
 0x18a   : > { %9388 = vmatprep.mubr.msk.bf16.mxu0 %vm249_vm1, %v2610_v45  ;;  %9748 = vmatprep.mubr.msk.bf16.mxu1 %vm249_vm1, %v5437_v46  ;;  %v2992_v46 = vpack.c.bf16 %v2977_v41, %v2976_v38  ;;  %v5883_v47 = vpack.c.bf16 %v5868_v43, %v5867_v42  ;;  %v3173_v38 = vld [vmem:[#allocation2 + $0x4e8] sm:$0xff]  ;;  %v6033_v41 = vld [vmem:[#allocation2 + $0x420] sm:$0xff] }
 0x18b   : > { %v6031_v39 = vld [vmem:[#allocation2 + $0x408] sm:$0xff]  ;;  %v3172_v43 = vld [vmem:[#allocation2 + $0x4e0] sm:$0xff] }
 0x18c   : > { %v6034_v42 = vld [vmem:[#allocation2 + $0x428] sm:$0xff]  ;;  %v6196_v31 = vld [vmem:[#allocation2 + $0x5c0] sm:$0xff] }
 0x191   : > { %9389 = vmatmul.mubr.msk.bf16.gmra.mrb[76].mxu0 %vm249_vm1, %v2611_v20  ;;  %9749 = vmatmul.mubr.msk.bf16.gmra.mrb[76].mxu1 %vm249_vm1, %v5438_v55  ;;  %v2993_v20 = vpack.c.bf16 %v2979_v49, %v2978_v48  ;;  %v5884_v55 = vpack.c.bf16 %v5870_v50, %v5869_v35  ;;  %v6047_v48 = vpack.c.bf16 %v6034_v42, %v6033_v41  ;;  %v11913_v49 = vld [vmem:[%s12600_s3 + $0xc8] sm:$0xff]   ;;  %v3177_v35 = vld [vmem:[#allocation2 + $0x518] sm:$0xff]  ;;  %v11978_v42 = vld [vmem:[%s12600_s3 + $0xf0] sm:$0xff]  }
 0x192   : > { %9760 = vmatprep.mubr.msk.bf16.mxu1 %vm249_vm1, %v5722_v56  ;;  %9400 = vmatprep.mubr.msk.bf16.mxu0 %vm249_vm1, %v2798_v54  ;;  %v5872_v54 = vld [vmem:[#allocation2 + $0x291] sm:$0xff]  ;;  %v2994_v56 = vpack.c.bf16 %v2981_v51, %v2980_v10  ;;  %v6036_v10 = vld [vmem:[#allocation2 + $0x440] sm:$0xff] }
 0x193   : > { %v5885_v57 = vpack.c.bf16 %v5872_v54, %v5871_v53  ;;  %v6035_v50 = vld [vmem:[#allocation2 + $0x438] sm:$0xff]  ;;  %v11926_v51 = vld [vmem:[%s12600_s3 + $0xd0] sm:$0xff]  }
 0x194   : > { %v3179_v53 = vld [vmem:[#allocation2 + $0x530] sm:$0xff]  ;;  %v6198_v41 = vld [vmem:[#allocation2 + $0x5d8] sm:$0xff] }
 0x195   : > { %v6037_v54 = vld [vmem:[#allocation2 + $0x450] sm:$0xff] }
 0x199   : > { %9401 = vmatmul.mubr.msk.bf16.vlgmr.msra.gmra.mrb[64].mxu0 %vm249_vm1, %v2799_v21  ;;  %9761 = vmatmul.mubr.msk.bf16.vlgmr.msra.gmra.mrb[64].mxu1 %vm249_vm1, %v5723_v1  ;;  %v2985_v21 = vld [vmem:[#allocation2 + $0x398] sm:$0xff] }
 0x19a   : > { %9404 = vmatprep.mubr.msk.bf16.mxu0 %vm249_vm1, %v2800_v2  ;;  %9764 = vmatprep.mubr.msk.bf16.mxu1 %vm249_vm1, %v5724_v3  ;;  %v5875_v1 = vld [vmem:[#allocation2 + $0x2b9] sm:$0xff]  ;;  %v5876_v2 = vld [vmem:[#allocation2 + $0x2c1] sm:$0xff]  ;;  %v5886_v3 = vpack.c.bf16 %v5874_v63, %v5873_v62  ;;  %v6040_v63 = vld [vmem:[#allocation2 + $0x470] sm:$0xff] }
 0x19b   : > { %9777 = vmatpush3.bf16.msra.mxu1 %v11727_v52  ;;  %9417 = vmatpush3.bf16.msra.mxu0 %v11790_v36  ;;  %v2801_v52 = vpack.c.bf16 %v2789_v6, %v2788_v5  ;;  %v2996_v5 = vpack.c.bf16 %v2985_v21, %v2984_v61  ;;  %v5887_v6 = vpack.c.bf16 %v5876_v2, %v5875_v1  ;;  %v11935_v61 = vld [vmem:[%s12600_s3 + $0xd8] sm:$0xff]   ;;  %v6039_v62 = vld [vmem:[#allocation2 + $0x468] sm:$0xff]  ;;  %v11948_v21 = vld [vmem:[%s12600_s3 + $0xe0] sm:$0xff]  }
 0x19c   : > { %9778 = vmatprep.subr.bf16.mxu1 %v11757_v16  ;;  %9418 = vmatprep.subr.bf16.mxu0 %v11809_v4  ;;  %v3183_v1 = vld [vmem:[#allocation2 + $0x560] sm:$0xff] }
 0x19d   : > { %v6041_v2 = vld [vmem:[#allocation2 + $0x480] sm:$0xff] }
 0x19f   : > { %9779 = vmatpush3.bf16.msra.mxu1 %v11757_v16  ;;  %9419 = vmatpush3.bf16.msra.mxu0 %v11809_v4  ;;  %v2792_v16 = vld [vmem:[#allocation2 + $0x211] sm:$0xff] }
 0x1a0   : > { %9780 = vmatprep.subr.bf16.mxu1 %v11768_v19  ;;  %9420 = vmatprep.subr.bf16.mxu0 %v11820_v7  ;;  %v2803_v32 = vpack.c.bf16 %v2793_v24, %v2792_v16  ;;  %v5888_v16 = vpack.c.bf16 %v5878_v13, %v5877_v12  ;;  %v6043_v12 = vld [vmem:[#allocation2 + $0x498] sm:$0xff]  ;;  %v6044_v13 = vld [vmem:[#allocation2 + $0x4a0] sm:$0xff] }
 0x1a1   : > { %9405 = vmatmul.mubr.msk.bf16.gmra.mrb[68].mxu0 %vm249_vm1, %v2801_v52  ;;  %9765 = vmatmul.mubr.msk.bf16.gmra.mrb[68].mxu1 %vm249_vm1, %v5725_v15  ;;  %v2989_v52 = vld [vmem:[#allocation2 + $0x3c8] sm:$0xff] }
 0x1a2   : > { %9408 = vmatprep.mubr.msk.bf16.mxu0 %vm249_vm1, %v2802_v17  ;;  %9768 = vmatprep.mubr.msk.bf16.mxu1 %vm249_vm1, %v5726_v18  ;;  %v5879_v15 = vld [vmem:[#allocation2 + $0x2e9] sm:$0xff]  ;;  %v5880_v17 = vld [vmem:[#allocation2 + $0x2f1] sm:$0xff] }
 0x1a3   : > { %9781 = vmatpush3.bf16.msra.mxu1 %v11768_v19  ;;  %9421 = vmatpush3.bf16.msra.mxu0 %v11820_v7  ;;  %v2804_v19 = vpack.c.bf16 %v2795_v29, %v2794_v25  ;;  %v5889_v24 = vpack.c.bf16 %v5880_v17, %v5879_v15  ;;  %v2990_v25 = vld [vmem:[#allocation2 + $0x3d8] sm:$0xff]  ;;  %v3171_v29 = vld [vmem:[#allocation2 + $0x4d0] sm:$0xff] }
 0x1a4   : > { %9782 = vmatprep.subr.bf16.mxu1 %v11779_v33  ;;  %9422 = vmatprep.subr.bf16.mxu0 %v11831_v22  ;;  %v6192_v15 = vld [vmem:[#allocation2 + $0x590] sm:$0xff] }
 0x1a5   : > { %v3184_v17 = vld [vmem:[#allocation2 + $0x570] sm:$0xff] }
 0x1a7   : > { %9783 = vmatpush3.bf16.msra.mxu1 %v11779_v33  ;;  %9423 = vmatpush3.bf16.msra.mxu0 %v11831_v22  ;;  %v5720_v33 = vld [vmem:[#allocation2 + $0x169] sm:$0xff] }
 0x1a8   : > { %9800 = vmatprep.subr.bf16.mxu1 %v11790_v36  ;;  %9440 = vmatprep.subr.bf16.mxu0 %v11844_v28  ;;  %v5729_v45 = vpack.c.bf16 %v5721_v40, %v5720_v33  ;;  %v6032_v33 = vld [vmem:[#allocation2 + $0x410] sm:$0xff]  ;;  %v3175_v40 = vld [vmem:[#allocation2 + $0x500] sm:$0xff] }
 0x1a9   : > { %9409 = vmatmul.mubr.msk.bf16.gmra.mrb[72].mxu0 %vm249_vm1, %v2803_v32  ;;  %9769 = vmatmul.mubr.msk.bf16.gmra.mrb[72].mxu1 %vm249_vm1, %v5727_v23  ;;  %v2999_v32 = vpack.c.bf16 %v2991_v26, %v2990_v25  ;;  %v3366_v26 = vld [vmem:[#allocation2 + $0x349] sm:$0xff] }
 0x1aa   : > { %9412 = vmatprep.mubr.msk.bf16.mxu0 %vm249_vm1, %v2804_v19  ;;  %9772 = vmatprep.mubr.msk.bf16.mxu1 %vm249_vm1, %v5728_v34  ;;  %v3170_v19 = vld [vmem:[#allocation2 + $0x4c8] sm:$0xff] }
 0x1ab   : > { %v3186_v34 = vpack.c.bf16 %v3171_v29, %v3170_v19  ;;  %v3368_v29 = vld [vmem:[#allocation2 + $0x361] sm:$0xff] }
 0x1b1   : > { %9413 = vmatmul.mubr.msk.bf16.gmra.mrb[76].mxu0 %vm249_vm1, %v2805_v44  ;;  %9773 = vmatmul.mubr.msk.bf16.gmra.mrb[76].mxu1 %vm249_vm1, %v5729_v45  ;;  %v3187_v44 = vpack.c.bf16 %v3173_v38, %v3172_v43  ;;  %v6046_v45 = vpack.c.bf16 %v6032_v33, %v6031_v39  ;;  %v11965_v39 = vld [vmem:[%s12600_s3 + $0xe8] sm:$0xff]   ;;  %v3370_v33 = vld [vmem:[#allocation2 + $0x379] sm:$0xff]  ;;  %v3372_v43 = vld [vmem:[#allocation2 + $0x391] sm:$0xff] }
 0x1b2   : > { %9424 = vmatprep.mubr.msk.bf16.mxu0 %vm249_vm1, %v2992_v46  ;;  %9784 = vmatprep.mubr.msk.bf16.mxu1 %vm249_vm1, %v5883_v47  ;;  %v3174_v46 = vld [vmem:[#allocation2 + $0x4f8] sm:$0xff] }
 0x1b3   : > { %v3188_v47 = vpack.c.bf16 %v3175_v40, %v3174_v46  ;;  %v3371_v40 = vld [vmem:[#allocation2 + $0x381] sm:$0xff]  ;;  %v6197_v46 = vld [vmem:[#allocation2 + $0x5d0] sm:$0xff] }
 0x1b9   : > { %9425 = vmatmul.mubr.msk.bf16.vlgmr.msra.gmra.mrb[64].mxu0 %vm249_vm1, %v2993_v20  ;;  %9785 = vmatmul.mubr.msk.bf16.vlgmr.msra.gmra.mrb[64].mxu1 %vm249_vm1, %v5884_v55  ;;  %v6038_v20 = vld [vmem:[#allocation2 + $0x458] sm:$0xff]  ;;  %v3176_v55 = vld [vmem:[#allocation2 + $0x510] sm:$0xff] }
 0x1ba   : > { %9428 = vmatprep.mubr.msk.bf16.mxu0 %vm249_vm1, %v2994_v56  ;;  %9788 = vmatprep.mubr.msk.bf16.mxu1 %vm249_vm1, %v5885_v57  ;;  %v3189_v56 = vpack.c.bf16 %v3177_v35, %v3176_v55  ;;  %v3178_v57 = vld [vmem:[#allocation2 + $0x528] sm:$0xff] }
 0x1bb   : > { %9801 = vmatpush3.bf16.msra.mxu1 %v11790_v36  ;;  %9441 = vmatpush3.bf16.msra.mxu0 %v11844_v28  ;;  %v2995_v36 = vpack.c.bf16 %v2983_v60, %v2982_v59  ;;  %v3190_v59 = vpack.c.bf16 %v3179_v53, %v3178_v57  ;;  %v6049_v60 = vpack.c.bf16 %v6038_v20, %v6037_v54  ;;  %v3375_v53 = vld [vmem:[#allocation2 + $0x3b1] sm:$0xff]  ;;  %v6202_v54 = vld [vmem:[#allocation2 + $0x608] sm:$0xff]  ;;  %v12000_v20 = vld [vmem:[%s12600_s3 + $0x100] sm:$0xff]  }
 0x1bc   : > { %9802 = vmatprep.subr.bf16.mxu1 %v11809_v4  ;;  %9442 = vmatprep.subr.bf16.mxu0 %v11861_v58  ;;  %v3376_v55 = vld [vmem:[#allocation2 + $0x3c1] sm:$0xff] }
 0x1bd   : > { %v6201_v57 = vld [vmem:[#allocation2 + $0x600] sm:$0xff] }
 0x1bf   : > { %9803 = vmatpush3.bf16.msra.mxu1 %v11809_v4  ;;  %9443 = vmatpush3.bf16.msra.mxu0 %v11861_v58  ;;  %v2986_v4 = vld [vmem:[#allocation2 + $0x3a8] sm:$0xff] }
 0x1c0   : > { %9804 = vmatprep.subr.bf16.mxu1 %v11820_v7  ;;  %9444 = vmatprep.subr.bf16.mxu0 %v11874_v0  ;;  %v2997_v18 = vpack.c.bf16 %v2987_v9, %v2986_v4 }
 0x1c1   : > { %9429 = vmatmul.mubr.msk.bf16.gmra.mrb[68].mxu0 %vm249_vm1, %v2995_v36  ;;  %9789 = vmatmul.mubr.msk.bf16.gmra.mrb[68].mxu1 %vm249_vm1, %v5886_v3  ;;  %v6042_v36 = vld [vmem:[#allocation2 + $0x488] sm:$0xff]  ;;  %v3180_v3 = vld [vmem:[#allocation2 + $0x540] sm:$0xff] }
 0x1c2   : > { %9432 = vmatprep.mubr.msk.bf16.mxu0 %vm249_vm1, %v2996_v5  ;;  %9792 = vmatprep.mubr.msk.bf16.mxu1 %vm249_vm1, %v5887_v6  ;;  %v6050_v6 = vpack.c.bf16 %v6040_v63, %v6039_v62  ;;  %v6051_v9 = vpack.c.bf16 %v6042_v36, %v6041_v2  ;;  %v3558_v63 = vld [vmem:[#allocation2 + $0x4c9] sm:$0xff]  ;;  %v3379_v2 = vld [vmem:[#allocation2 + $0x3e1] sm:$0xff]  ;;  %v3559_v36 = vld [vmem:[#allocation2 + $0x4d1] sm:$0xff] }
 0x1c3   : > { %9805 = vmatpush3.bf16.msra.mxu1 %v11820_v7  ;;  %9445 = vmatpush3.bf16.msra.mxu0 %v11874_v0  ;;  %v2998_v7 = vpack.c.bf16 %v2989_v52, %v2988_v11  ;;  %v3185_v11 = vld [vmem:[#allocation2 + $0x578] sm:$0xff] }
 0x1c4   : > { %9806 = vmatprep.subr.bf16.mxu1 %v11831_v22  ;;  %9446 = vmatprep.subr.bf16.mxu0 %v11883_v8  ;;  %v3365_v52 = vld [vmem:[#allocation2 + $0x339] sm:$0xff] }
 0x1c7   : > { %9807 = vmatpush3.bf16.msra.mxu1 %v11831_v22  ;;  %9447 = vmatpush3.bf16.msra.mxu0 %v11883_v8  ;;  %v5882_v22 = vld [vmem:[#allocation2 + $0x309] sm:$0xff] }
 0x1c8   : > { %9824 = vmatprep.subr.bf16.mxu1 %v11844_v28  ;;  %9464 = vmatprep.subr.bf16.mxu0 %v11896_v14  ;;  %v5890_v23 = vpack.c.bf16 %v5882_v22, %v5881_v27  ;;  %v3367_v27 = vld [vmem:[#allocation2 + $0x351] sm:$0xff]  ;;  %v6194_v22 = vld [vmem:[#allocation2 + $0x5a8] sm:$0xff] }
 0x1c9   : > { %9433 = vmatmul.mubr.msk.bf16.gmra.mrb[72].mxu0 %vm249_vm1, %v2997_v18  ;;  %9793 = vmatmul.mubr.msk.bf16.gmra.mrb[72].mxu1 %vm249_vm1, %v5888_v16  ;;  %v3193_v18 = vpack.c.bf16 %v3185_v11, %v3184_v17  ;;  %v6052_v16 = vpack.c.bf16 %v6044_v13, %v6043_v12  ;;  %v3560_v12 = vld [vmem:[#allocation2 + $0x4e1] sm:$0xff]  ;;  %v3561_v13 = vld [vmem:[#allocation2 + $0x4e9] sm:$0xff] }
 0x1ca   : > { %9436 = vmatprep.mubr.msk.bf16.mxu0 %vm249_vm1, %v2998_v7  ;;  %9796 = vmatprep.mubr.msk.bf16.mxu1 %vm249_vm1, %v5889_v24  ;;  %v6191_v7 = vld [vmem:[#allocation2 + $0x588] sm:$0xff] }
 0x1cb   : > { %v6207_v25 = vpack.c.bf16 %v6192_v15, %v6191_v7  ;;  %v3562_v15 = vld [vmem:[#allocation2 + $0x4f9] sm:$0xff]  ;;  %v3563_v17 = vld [vmem:[#allocation2 + $0x501] sm:$0xff]  ;;  %v3575_v7 = vpack.c.bf16 %v3561_v13, %v3560_v12 }
 0x1cc   : > { %v12069_v13 = vld [vmem:[%s12600_s3 + $0x128] sm:$0xff]  }
 0x1d1   : > { %9437 = vmatmul.mubr.msk.bf16.gmra.mrb[76].mxu0 %vm249_vm1, %v2999_v32  ;;  %9797 = vmatmul.mubr.msk.bf16.gmra.mrb[76].mxu1 %vm249_vm1, %v5890_v23  ;;  %v6193_v32 = vld [vmem:[#allocation2 + $0x5a0] sm:$0xff]  ;;  %v3381_v23 = vpack.c.bf16 %v3367_v27, %v3366_v26  ;;  %v12017_v27 = vld [vmem:[%s12600_s3 + $0x108] sm:$0xff]  }
 0x1d2   : > { %9448 = vmatprep.mubr.msk.bf16.mxu0 %vm249_vm1, %v3186_v34  ;;  %9808 = vmatprep.mubr.msk.bf16.mxu1 %vm249_vm1, %v6045_v37  ;;  %v6208_v19 = vpack.c.bf16 %v6194_v22, %v6193_v32  ;;  %v6195_v34 = vld [vmem:[#allocation2 + $0x5b8] sm:$0xff]  ;;  %v3382_v37 = vpack.c.bf16 %v3369_v30, %v3368_v29  ;;  %v3566_v30 = vld [vmem:[#allocation2 + $0x529] sm:$0xff]  ;;  %v6359_v32 = vld [vmem:[#allocation2 + $0x441] sm:$0xff] }
 0x1d3   : > { %v6209_v38 = vpack.c.bf16 %v6196_v31, %v6195_v34  ;;  %v3564_v22 = vld [vmem:[#allocation2 + $0x511] sm:$0xff]  ;;  %v3565_v29 = vld [vmem:[#allocation2 + $0x519] sm:$0xff] }
 0x1d4   : > { %v6358_v31 = vld [vmem:[#allocation2 + $0x439] sm:$0xff]  ;;  %v6360_v34 = vld [vmem:[#allocation2 + $0x451] sm:$0xff] }
 0x1d9   : > { %9449 = vmatmul.mubr.msk.bf16.vlgmr.msra.gmra.mrb[64].mxu0 %vm249_vm1, %v3187_v44  ;;  %9809 = vmatmul.mubr.msk.bf16.vlgmr.msra.gmra.mrb[64].mxu1 %vm249_vm1, %v6046_v45  ;;  %v3373_v44 = vld [vmem:[#allocation2 + $0x399] sm:$0xff]  ;;  %v6200_v45 = vld [vmem:[#allocation2 + $0x5f0] sm:$0xff] }
 0x1da   : > { %9452 = vmatprep.mubr.msk.bf16.mxu0 %vm249_vm1, %v3188_v47  ;;  %9812 = vmatprep.mubr.msk.bf16.mxu1 %vm249_vm1, %v6047_v48  ;;  %v3383_v47 = vpack.c.bf16 %v3371_v40, %v3370_v33  ;;  %v6199_v48 = vld [vmem:[#allocation2 + $0x5e8] sm:$0xff]  ;;  %v3384_v35 = vpack.c.bf16 %v3373_v44, %v3372_v43  ;;  %v3570_v44 = vld [vmem:[#allocation2 + $0x559] sm:$0xff] }
 0x1db   : > { %9825 = vmatpush3.bf16.msra.mxu1 %v11844_v28  ;;  %9465 = vmatpush3.bf16.msra.mxu0 %v11896_v14  ;;  %v6048_v28 = vpack.c.bf16 %v6036_v10, %v6035_v50  ;;  %v6211_v50 = vpack.c.bf16 %v6200_v45, %v6199_v48  ;;  %v11987_v10 = vld [vmem:[%s12600_s3 + $0xf8] sm:$0xff]   ;;  %v3569_v43 = vld [vmem:[#allocation2 + $0x549] sm:$0xff]  ;;  %v6364_v48 = vld [vmem:[#allocation2 + $0x481] sm:$0xff] }
 0x1dc   : > { %9826 = vmatprep.subr.bf16.mxu1 %v11861_v58  ;;  %9466 = vmatprep.subr.bf16.mxu0 %v11913_v49  ;;  %v6362_v45 = vld [vmem:[#allocation2 + $0x469] sm:$0xff] }
 0x1df   : > { %9827 = vmatpush3.bf16.msra.mxu1 %v11861_v58  ;;  %9467 = vmatpush3.bf16.msra.mxu0 %v11913_v49  ;;  %v3181_v58 = vld [vmem:[#allocation2 + $0x548] sm:$0xff] }
 0x1e0   : > { %9828 = vmatprep.subr.bf16.mxu1 %v11874_v0  ;;  %9468 = vmatprep.subr.bf16.mxu0 %v11926_v51  ;;  %v3191_v5 = vpack.c.bf16 %v3181_v58, %v3180_v3  ;;  %v6352_v3 = vld [vmem:[#allocation2 + $0x3f1] sm:$0xff] }
 0x1e1   : > { %9453 = vmatmul.mubr.msk.bf16.gmra.mrb[68].mxu0 %vm249_vm1, %v3189_v56  ;;  %9813 = vmatmul.mubr.msk.bf16.gmra.mrb[68].mxu1 %vm249_vm1, %v6048_v28  ;;  %v3377_v56 = vld [vmem:[#allocation2 + $0x3c9] sm:$0xff]  ;;  %v6204_v28 = vld [vmem:[#allocation2 + $0x620] sm:$0xff] }
 0x1e2   : > { %9456 = vmatprep.mubr.msk.bf16.mxu0 %vm249_vm1, %v3190_v59  ;;  %9816 = vmatprep.mubr.msk.bf16.mxu1 %vm249_vm1, %v6049_v60  ;;  %v6212_v60 = vpack.c.bf16 %v6202_v54, %v6201_v57  ;;  %v3386_v58 = vpack.c.bf16 %v3377_v56, %v3376_v55  ;;  %v3572_v54 = vld [vmem:[#allocation2 + $0x571] sm:$0xff]  ;;  %v3573_v55 = vld [vmem:[#allocation2 + $0x579] sm:$0xff] }
 0x1e3   : > { %9829 = vmatpush3.bf16.msra.mxu1 %v11874_v0  ;;  %9469 = vmatpush3.bf16.msra.mxu0 %v11926_v51  ;;  %v3182_v0 = vld [vmem:[#allocation2 + $0x558] sm:$0xff] }
 0x1e4   : > { %9830 = vmatprep.subr.bf16.mxu1 %v11883_v8  ;;  %9470 = vmatprep.subr.bf16.mxu0 %v11935_v61  ;;  %v3192_v4 = vpack.c.bf16 %v3183_v1, %v3182_v0  ;;  %v3378_v1 = vld [vmem:[#allocation2 + $0x3d9] sm:$0xff] }
 0x1e5   : > { %v3387_v0 = vpack.c.bf16 %v3379_v2, %v3378_v1  ;;  %v6366_v56 = vld [vmem:[#allocation2 + $0x499] sm:$0xff]  ;;  %v6515_v1 = vld [vmem:[#allocation2 + $0x5a1] sm:$0xff]  ;;  %v6516_v2 = vld [vmem:[#allocation2 + $0x5a9] sm:$0xff] }
 0x1e6   : > { %v3752_v57 = vld [vmem:[#allocation2 + $0x18] sm:$0xff] }
 0x1e7   : > { %9831 = vmatpush3.bf16.msra.mxu1 %v11883_v8  ;;  %9471 = vmatpush3.bf16.msra.mxu0 %v11935_v61  ;;  %v3364_v8 = vld [vmem:[#allocation2 + $0x331] sm:$0xff] }
 0x1e8   : > { %9848 = vmatprep.subr.bf16.mxu1 %v11896_v14  ;;  %9488 = vmatprep.subr.bf16.mxu0 %v11948_v21  ;;  %v3380_v24 = vpack.c.bf16 %v3365_v52, %v3364_v8  ;;  %v6354_v8 = vld [vmem:[#allocation2 + $0x409] sm:$0xff]  ;;  %v6355_v52 = vld [vmem:[#allocation2 + $0x411] sm:$0xff] }
 0x1e9   : > { %9457 = vmatmul.mubr.msk.bf16.gmra.mrb[72].mxu0 %vm249_vm1, %v3191_v5  ;;  %9817 = vmatmul.mubr.msk.bf16.gmra.mrb[72].mxu1 %vm249_vm1, %v6050_v6  ;;  %v6353_v5 = vld [vmem:[#allocation2 + $0x3f9] sm:$0xff]  ;;  %v6205_v6 = vld [vmem:[#allocation2 + $0x630] sm:$0xff] }
 0x1ea   : > { %9460 = vmatprep.mubr.msk.bf16.mxu0 %vm249_vm1, %v3192_v4  ;;  %9820 = vmatprep.mubr.msk.bf16.mxu1 %vm249_vm1, %v6051_v9  ;;  %v3574_v9 = vpack.c.bf16 %v3559_v36, %v3558_v63  ;;  %v6368_v11 = vpack.c.bf16 %v6353_v5, %v6352_v3  ;;  %v3755_v36 = vld [vmem:[#allocation2 + $0x38] sm:$0xff]  ;;  %v3756_v5 = vld [vmem:[#allocation2 + $0x48] sm:$0xff] }
 0x1eb   : > { %v6517_v3 = vld [vmem:[#allocation2 + $0x5b9] sm:$0xff] }
 0x1f1   : > { %9461 = vmatmul.mubr.msk.bf16.gmra.mrb[76].mxu0 %vm249_vm1, %v3193_v18  ;;  %9821 = vmatmul.mubr.msk.bf16.gmra.mrb[76].mxu1 %vm249_vm1, %v6052_v16  ;;  %v6356_v18 = vld [vmem:[#allocation2 + $0x421] sm:$0xff]  ;;  %v6357_v16 = vld [vmem:[#allocation2 + $0x429] sm:$0xff] }
 0x1f2   : > { %9472 = vmatprep.mubr.msk.bf16.mxu0 %vm249_vm1, %v3380_v24  ;;  %9832 = vmatprep.mubr.msk.bf16.mxu1 %vm249_vm1, %v6207_v25  ;;  %v6369_v24 = vpack.c.bf16 %v6355_v52, %v6354_v8  ;;  %v3576_v25 = vpack.c.bf16 %v3563_v17, %v3562_v15  ;;  %v6370_v26 = vpack.c.bf16 %v6357_v16, %v6356_v18  ;;  %v6519_v8 = vld [vmem:[#allocation2 + $0x5d1] sm:$0xff]  ;;  %v6520_v52 = vld [vmem:[#allocation2 + $0x5d9] sm:$0xff]  ;;  %v6521_v15 = vld [vmem:[#allocation2 + $0x5e9] sm:$0xff] }
 0x1f3   : > { %v3758_v17 = vld [vmem:[#allocation2 + $0x60] sm:$0xff]  ;;  %v3759_v18 = vld [vmem:[#allocation2 + $0x68] sm:$0xff]  ;;  %v12082_v16 = vld [vmem:[%s12600_s3 + $0x130] sm:$0xff]  }
 0x1f9   : > { %9473 = vmatmul.mubr.msk.bf16.vlgmr.msra.gmra.mrb[64].mxu0 %vm249_vm1, %v3381_v23  ;;  %9833 = vmatmul.mubr.msk.bf16.vlgmr.msra.gmra.mrb[64].mxu1 %vm249_vm1, %v6208_v19  ;;  %v12030_v23 = vld [vmem:[%s12600_s3 + $0x110] sm:$0xff]  }
 0x1fa   : > { %9476 = vmatprep.mubr.msk.bf16.mxu0 %vm249_vm1, %v3382_v37  ;;  %9836 = vmatprep.mubr.msk.bf16.mxu1 %vm249_vm1, %v6209_v38  ;;  %v3567_v19 = vld [vmem:[#allocation2 + $0x531] sm:$0xff]  ;;  %v6361_v37 = vld [vmem:[#allocation2 + $0x459] sm:$0xff]  ;;  %v6371_v38 = vpack.c.bf16 %v6359_v32, %v6358_v31  ;;  %v6524_v31 = vld [vmem:[#allocation2 + $0x609] sm:$0xff] }
 0x1fb   : > { %9849 = vmatpush3.bf16.msra.mxu1 %v11896_v14  ;;  %9489 = vmatpush3.bf16.msra.mxu0 %v11948_v21  ;;  %v6210_v14 = vpack.c.bf16 %v6198_v41, %v6197_v46  ;;  %v3578_v33 = vpack.c.bf16 %v3567_v19, %v3566_v30  ;;  %v6372_v40 = vpack.c.bf16 %v6361_v37, %v6360_v34  ;;  %v12039_v41 = vld [vmem:[%s12600_s3 + $0x118] sm:$0xff]   ;;  %v3762_v19 = vld [vmem:[#allocation2 + $0x90] sm:$0xff]  ;;  %v12104_v37 = vld [vmem:[%s12600_s3 + $0x140] sm:$0xff]  }
 0x1fc   : > { %9850 = vmatprep.subr.bf16.mxu1 %v11913_v49  ;;  %9490 = vmatprep.subr.bf16.mxu0 %v11965_v39  ;;  %v6363_v46 = vld [vmem:[#allocation2 + $0x471] sm:$0xff]  ;;  %v6525_v32 = vld [vmem:[#allocation2 + $0x619] sm:$0xff] }
 0x1fd   : > { %v12091_v30 = vld [vmem:[%s12600_s3 + $0x138] sm:$0xff]  }
 0x1fe   : > { %v3763_v34 = vld [vmem:[#allocation2 + $0x98] sm:$0xff] }
 0x1ff   : > { %9851 = vmatpush3.bf16.msra.mxu1 %v11913_v49  ;;  %9491 = vmatpush3.bf16.msra.mxu0 %v11965_v39  ;;  %v3374_v49 = vld [vmem:[#allocation2 + $0x3a9] sm:$0xff] }
 0x200   : > { %9852 = vmatprep.subr.bf16.mxu1 %v11926_v51  ;;  %9492 = vmatprep.subr.bf16.mxu0 %v11978_v42  ;;  %v3385_v59 = vpack.c.bf16 %v3375_v53, %v3374_v49  ;;  %v6373_v49 = vpack.c.bf16 %v6363_v46, %v6362_v45  ;;  %v3766_v45 = vld [vmem:[#allocation2 + $0xc0] sm:$0xff]  ;;  %v3767_v46 = vld [vmem:[#allocation2 + $0xc8] sm:$0xff] }
 0x201   : > { %9477 = vmatmul.mubr.msk.bf16.gmra.mrb[68].mxu0 %vm249_vm1, %v3383_v47  ;;  %9837 = vmatmul.mubr.msk.bf16.gmra.mrb[68].mxu1 %vm249_vm1, %v6210_v14  ;;  %v12052_v47 = vld [vmem:[%s12600_s3 + $0x120] sm:$0xff]  }
 0x202   : > { %9480 = vmatprep.mubr.msk.bf16.mxu0 %vm249_vm1, %v3384_v35  ;;  %9840 = vmatprep.mubr.msk.bf16.mxu1 %vm249_vm1, %v6211_v50  ;;  %v3571_v14 = vld [vmem:[#allocation2 + $0x561] sm:$0xff]  ;;  %v6365_v35 = vld [vmem:[#allocation2 + $0x489] sm:$0xff] }
 0x203   : > { %9853 = vmatpush3.bf16.msra.mxu1 %v11926_v51  ;;  %9493 = vmatpush3.bf16.msra.mxu0 %v11978_v42  ;;  %v6203_v51 = vld [vmem:[#allocation2 + $0x618] sm:$0xff]  ;;  %v6374_v53 = vpack.c.bf16 %v6365_v35, %v6364_v48  ;;  %v6676_v35 = vld [vmem:[#allocation2 + $0xe0] sm:$0xff] }
 0x204   : > { %9854 = vmatprep.subr.bf16.mxu1 %v11935_v61  ;;  %9494 = vmatprep.subr.bf16.mxu0 %v11987_v10  ;;  %v6213_v62 = vpack.c.bf16 %v6204_v28, %v6203_v51  ;;  %v6513_v28 = vld [vmem:[#allocation2 + $0x589] sm:$0xff]  ;;  %v3581_v51 = vpack.c.bf16 %v3573_v55, %v3572_v54  ;;  %v6675_v48 = vld [vmem:[#allocation2 + $0xd8] sm:$0xff] }
 0x205   : > { %v6691_v54 = vpack.c.bf16 %v6676_v35, %v6675_v48  ;;  %v3949_v55 = vld [vmem:[#allocation2 + $0x1d0] sm:$0xff]  ;;  %v6842_v35 = vld [vmem:[#allocation2 + $0x2a8] sm:$0xff] }
 0x206   : > { %v4145_v48 = vld [vmem:[#allocation2 + $0x51] sm:$0xff] }
 0x207   : > { %9855 = vmatpush3.bf16.msra.mxu1 %v11935_v61  ;;  %9495 = vmatpush3.bf16.msra.mxu0 %v11987_v10  ;;  %v6206_v61 = vld [vmem:[#allocation2 + $0x638] sm:$0xff] }
 0x208   : > { %9872 = vmatprep.subr.bf16.mxu1 %v11948_v21  ;;  %9512 = vmatprep.subr.bf16.mxu0 %v12000_v20  ;;  %v6214_v4 = vpack.c.bf16 %v6206_v61, %v6205_v6  ;;  %v3754_v61 = vld [vmem:[#allocation2 + $0x30] sm:$0xff] }
 0x209   : > { %9481 = vmatmul.mubr.msk.bf16.gmra.mrb[72].mxu0 %vm249_vm1, %v3385_v59  ;;  %9841 = vmatmul.mubr.msk.bf16.gmra.mrb[72].mxu1 %vm249_vm1, %v6212_v60  ;;  %v3753_v59 = vld [vmem:[#allocation2 + $0x20] sm:$0xff]  ;;  %v6514_v60 = vld [vmem:[#allocation2 + $0x591] sm:$0xff] }
 0x20a   : > { %9484 = vmatprep.mubr.msk.bf16.mxu0 %vm249_vm1, %v3386_v58  ;;  %9844 = vmatprep.mubr.msk.bf16.mxu1 %vm249_vm1, %v6213_v62  ;;  %v3768_v62 = vpack.c.bf16 %v3753_v59, %v3752_v57  ;;  %v6529_v63 = vpack.c.bf16 %v6514_v60, %v6513_v28  ;;  %v3757_v6 = vld [vmem:[#allocation2 + $0x50] sm:$0xff]  ;;  %v3951_v28 = vld [vmem:[#allocation2 + $0x1e8] sm:$0xff] }
 0x20b   : > { %v6679_v57 = vld [vmem:[#allocation2 + $0x108] sm:$0xff]  ;;  %v6680_v59 = vld [vmem:[#allocation2 + $0x110] sm:$0xff] }
 0x20c   : > { %v3948_v60 = vld [vmem:[#allocation2 + $0x1c8] sm:$0xff] }
 0x211   : > { %9485 = vmatmul.mubr.msk.bf16.gmra.mrb[76].mxu0 %vm249_vm1, %v3387_v0  ;;  %9845 = vmatmul.mubr.msk.bf16.gmra.mrb[76].mxu1 %vm249_vm1, %v6214_v4  ;;  %v6518_v0 = vld [vmem:[#allocation2 + $0x5c1] sm:$0xff]  ;;  %v3769_v4 = vpack.c.bf16 %v3755_v36, %v3754_v61 }
 0x212   : > { %9496 = vmatprep.mubr.msk.bf16.mxu0 %vm249_vm1, %v3574_v9  ;;  %9856 = vmatprep.mubr.msk.bf16.mxu1 %vm249_vm1, %v6368_v11  ;;  %v6530_v9 = vpack.c.bf16 %v6516_v2, %v6515_v1  ;;  %v3770_v11 = vpack.c.bf16 %v3757_v6, %v3756_v5  ;;  %v6531_v12 = vpack.c.bf16 %v6518_v0, %v6517_v3  ;;  %v12121_v2 = vld [vmem:[%s12600_s3 + $0x148] sm:$0xff]   ;;  %v3953_v61 = vld [vmem:[#allocation2 + $0x200] sm:$0xff]  ;;  %v12134_v5 = vld [vmem:[%s12600_s3 + $0x150] sm:$0xff]  }
 0x213   : > { %v6693_v1 = vpack.c.bf16 %v6680_v59, %v6679_v57  ;;  %v6681_v36 = vld [vmem:[#allocation2 + $0x120] sm:$0xff]  ;;  %v6682_v3 = vld [vmem:[#allocation2 + $0x128] sm:$0xff]  ;;  %v3955_v6 = vld [vmem:[#allocation2 + $0x218] sm:$0xff] }
 0x214   : > { %v6683_v0 = vld [vmem:[#allocation2 + $0x138] sm:$0xff]  ;;  %v6844_v57 = vld [vmem:[#allocation2 + $0x2c0] sm:$0xff]  ;;  %v12186_v59 = vld [vmem:[%s12600_s3 + $0x170] sm:$0xff]  }
 0x219   : > { %9497 = vmatmul.mubr.msk.bf16.vlgmr.msra.gmra.mrb[64].mxu0 %vm249_vm1, %v3575_v7  ;;  %9857 = vmatmul.mubr.msk.bf16.vlgmr.msra.gmra.mrb[64].mxu1 %vm249_vm1, %v6369_v24  ;;  %v3760_v7 = vld [vmem:[#allocation2 + $0x78] sm:$0xff]  ;;  %v3761_v24 = vld [vmem:[#allocation2 + $0x80] sm:$0xff] }
 0x21a   : > { %9500 = vmatprep.mubr.msk.bf16.mxu0 %vm249_vm1, %v3576_v25  ;;  %9860 = vmatprep.mubr.msk.bf16.mxu1 %vm249_vm1, %v6370_v26  ;;  %v6522_v25 = vld [vmem:[#allocation2 + $0x5f1] sm:$0xff]  ;;  %v6532_v26 = vpack.c.bf16 %v6520_v52, %v6519_v8 }
 0x21b   : > { %9873 = vmatpush3.bf16.msra.mxu1 %v11948_v21  ;;  %9513 = vmatpush3.bf16.msra.mxu0 %v12000_v20  ;;  %v3577_v21 = vpack.c.bf16 %v3565_v29, %v3564_v22  ;;  %v3772_v22 = vpack.c.bf16 %v3761_v24, %v3760_v7  ;;  %v6533_v29 = vpack.c.bf16 %v6522_v25, %v6521_v15  ;;  %v12143_v15 = vld [vmem:[%s12600_s3 + $0x158] sm:$0xff]   ;;  %v12156_v7 = vld [vmem:[%s12600_s3 + $0x160] sm:$0xff]   ;;  %v3959_v24 = vld [vmem:[#allocation2 + $0x248] sm:$0xff] }
 0x21c   : > { %9874 = vmatprep.subr.bf16.mxu1 %v11965_v39  ;;  %9514 = vmatprep.subr.bf16.mxu0 %v12017_v27  ;;  %v6687_v25 = vld [vmem:[#allocation2 + $0x168] sm:$0xff] }
 0x21f   : > { %9875 = vmatpush3.bf16.msra.mxu1 %v11965_v39  ;;  %9515 = vmatpush3.bf16.msra.mxu0 %v12017_v27  ;;  %v3568_v39 = vld [vmem:[#allocation2 + $0x541] sm:$0xff] }
 0x220   : > { %9876 = vmatprep.subr.bf16.mxu1 %v11978_v42  ;;  %9516 = vmatprep.subr.bf16.mxu0 %v12030_v23  ;;  %v3579_v50 = vpack.c.bf16 %v3569_v43, %v3568_v39 }
 0x221   : > { %9501 = vmatmul.mubr.msk.bf16.gmra.mrb[68].mxu0 %vm249_vm1, %v3577_v21  ;;  %9861 = vmatmul.mubr.msk.bf16.gmra.mrb[68].mxu1 %vm249_vm1, %v6371_v38  ;;  %v3764_v21 = vld [vmem:[#allocation2 + $0xa8] sm:$0xff]  ;;  %v3765_v38 = vld [vmem:[#allocation2 + $0xb0] sm:$0xff] }
 0x222   : > { %9504 = vmatprep.mubr.msk.bf16.mxu0 %vm249_vm1, %v3578_v33  ;;  %9864 = vmatprep.mubr.msk.bf16.mxu1 %vm249_vm1, %v6372_v40  ;;  %v6526_v33 = vld [vmem:[#allocation2 + $0x621] sm:$0xff]  ;;  %v3773_v40 = vpack.c.bf16 %v3763_v34, %v3762_v19 }
 0x223   : > { %9877 = vmatpush3.bf16.msra.mxu1 %v11978_v42  ;;  %9517 = vmatpush3.bf16.msra.mxu0 %v12030_v23  ;;  %v3580_v42 = vpack.c.bf16 %v3571_v14, %v3570_v44  ;;  %v6535_v43 = vpack.c.bf16 %v6526_v33, %v6525_v32  ;;  %v6527_v44 = vld [vmem:[#allocation2 + $0x631] sm:$0xff]  ;;  %v3961_v32 = vld [vmem:[#allocation2 + $0x260] sm:$0xff]  ;;  %v6690_v34 = vld [vmem:[#allocation2 + $0x188] sm:$0xff] }
 0x224   : > { %9878 = vmatprep.subr.bf16.mxu1 %v11987_v10  ;;  %9518 = vmatprep.subr.bf16.mxu0 %v12039_v41  ;;  %v3947_v14 = vld [vmem:[#allocation2 + $0x1b8] sm:$0xff]  ;;  %v6689_v19 = vld [vmem:[#allocation2 + $0x180] sm:$0xff] }
 0x225   : > { %v3960_v33 = vld [vmem:[#allocation2 + $0x258] sm:$0xff] }
 0x227   : > { %9879 = vmatpush3.bf16.msra.mxu1 %v11987_v10  ;;  %9519 = vmatpush3.bf16.msra.mxu0 %v12039_v41  ;;  %v6367_v10 = vld [vmem:[#allocation2 + $0x4a1] sm:$0xff] }
 0x228   : > { %9896 = vmatprep.subr.bf16.mxu1 %v12000_v20  ;;  %9536 = vmatprep.subr.bf16.mxu0 %v12052_v47  ;;  %v6375_v58 = vpack.c.bf16 %v6367_v10, %v6366_v56  ;;  %v6677_v56 = vld [vmem:[#allocation2 + $0xf0] sm:$0xff]  ;;  %v6678_v10 = vld [vmem:[#allocation2 + $0xf8] sm:$0xff] }
 0x229   : > { %9505 = vmatmul.mubr.msk.bf16.gmra.mrb[72].mxu0 %vm249_vm1, %v3579_v50  ;;  %9865 = vmatmul.mubr.msk.bf16.gmra.mrb[72].mxu1 %vm249_vm1, %v6373_v49  ;;  %v3775_v50 = vpack.c.bf16 %v3767_v46, %v3766_v45  ;;  %v4142_v45 = vld [vmem:[#allocation2 + $0x31] sm:$0xff]  ;;  %v4143_v46 = vld [vmem:[#allocation2 + $0x39] sm:$0xff] }
 0x22a   : > { %9508 = vmatprep.mubr.msk.bf16.mxu0 %vm249_vm1, %v3580_v42  ;;  %9868 = vmatprep.mubr.msk.bf16.mxu1 %vm249_vm1, %v6374_v53  ;;  %v3946_v42 = vld [vmem:[#allocation2 + $0x1b0] sm:$0xff] }
 0x22b   : > { %v3962_v53 = vpack.c.bf16 %v3947_v14, %v3946_v42  ;;  %v4144_v14 = vld [vmem:[#allocation2 + $0x49] sm:$0xff] }
 0x231   : > { %9509 = vmatmul.mubr.msk.bf16.gmra.mrb[76].mxu0 %vm249_vm1, %v3581_v51  ;;  %9869 = vmatmul.mubr.msk.bf16.gmra.mrb[76].mxu1 %vm249_vm1, %v6375_v58  ;;  %v3963_v51 = vpack.c.bf16 %v3949_v55, %v3948_v60  ;;  %v6692_v58 = vpack.c.bf16 %v6678_v10, %v6677_v56  ;;  %v12173_v56 = vld [vmem:[%s12600_s3 + $0x168] sm:$0xff]   ;;  %v4148_v60 = vld [vmem:[#allocation2 + $0x79] sm:$0xff] }
 0x232   : > { %9520 = vmatprep.mubr.msk.bf16.mxu0 %vm249_vm1, %v3768_v62  ;;  %9880 = vmatprep.mubr.msk.bf16.mxu1 %vm249_vm1, %v6529_v63  ;;  %v3950_v62 = vld [vmem:[#allocation2 + $0x1e0] sm:$0xff] }
 0x233   : > { %v3964_v63 = vpack.c.bf16 %v3951_v28, %v3950_v62  ;;  %v4146_v10 = vld [vmem:[#allocation2 + $0x61] sm:$0xff]  ;;  %v4147_v28 = vld [vmem:[#allocation2 + $0x69] sm:$0xff]  ;;  %v6843_v62 = vld [vmem:[#allocation2 + $0x2b8] sm:$0xff] }
 0x239   : > { %9521 = vmatmul.mubr.msk.bf16.vlgmr.msra.gmra.mrb[64].mxu0 %vm249_vm1, %v3769_v4  ;;  %9881 = vmatmul.mubr.msk.bf16.vlgmr.msra.gmra.mrb[64].mxu1 %vm249_vm1, %v6530_v9  ;;  %v6684_v4 = vld [vmem:[#allocation2 + $0x140] sm:$0xff]  ;;  %v3952_v9 = vld [vmem:[#allocation2 + $0x1f8] sm:$0xff] }
 0x23a   : > { %9524 = vmatprep.mubr.msk.bf16.mxu0 %vm249_vm1, %v3770_v11  ;;  %9884 = vmatprep.mubr.msk.bf16.mxu1 %vm249_vm1, %v6531_v12  ;;  %v3965_v11 = vpack.c.bf16 %v3953_v61, %v3952_v9  ;;  %v3954_v12 = vld [vmem:[#allocation2 + $0x210] sm:$0xff]  ;;  %v6695_v52 = vpack.c.bf16 %v6684_v4, %v6683_v0  ;;  %v12208_v4 = vld [vmem:[%s12600_s3 + $0x180] sm:$0xff]  }
 0x23b   : > { %9897 = vmatpush3.bf16.msra.mxu1 %v12000_v20  ;;  %9537 = vmatpush3.bf16.msra.mxu0 %v12052_v47  ;;  %v3771_v20 = vpack.c.bf16 %v3759_v18, %v3758_v17  ;;  %v3966_v8 = vpack.c.bf16 %v3955_v6, %v3954_v12  ;;  %v6685_v17 = vld [vmem:[#allocation2 + $0x150] sm:$0xff]  ;;  %v6686_v18 = vld [vmem:[#allocation2 + $0x158] sm:$0xff]  ;;  %v6847_v12 = vld [vmem:[#allocation2 + $0x2e8] sm:$0xff] }
 0x23c   : > { %9898 = vmatprep.subr.bf16.mxu1 %v12017_v27  ;;  %9538 = vmatprep.subr.bf16.mxu0 %v12069_v13  ;;  %v4151_v6 = vld [vmem:[#allocation2 + $0x99] sm:$0xff]  ;;  %v6848_v0 = vld [vmem:[#allocation2 + $0x2f0] sm:$0xff] }
 0x23d   : > { %v4152_v9 = vld [vmem:[#allocation2 + $0xa9] sm:$0xff] }
 0x23f   : > { %9899 = vmatpush3.bf16.msra.mxu1 %v12017_v27  ;;  %9539 = vmatpush3.bf16.msra.mxu0 %v12069_v13  ;;  %v6523_v27 = vld [vmem:[#allocation2 + $0x601] sm:$0xff] }
 0x240   : > { %9900 = vmatprep.subr.bf16.mxu1 %v12030_v23  ;;  %9540 = vmatprep.subr.bf16.mxu0 %v12082_v16  ;;  %v6534_v39 = vpack.c.bf16 %v6524_v31, %v6523_v27 }
 0x241   : > { %9525 = vmatmul.mubr.msk.bf16.gmra.mrb[68].mxu0 %vm249_vm1, %v3771_v20  ;;  %9885 = vmatmul.mubr.msk.bf16.gmra.mrb[68].mxu1 %vm249_vm1, %v6532_v26  ;;  %v6688_v20 = vld [vmem:[#allocation2 + $0x170] sm:$0xff]  ;;  %v3956_v26 = vld [vmem:[#allocation2 + $0x228] sm:$0xff] }
 0x242   : > { %9528 = vmatprep.mubr.msk.bf16.mxu0 %vm249_vm1, %v3772_v22  ;;  %9888 = vmatprep.mubr.msk.bf16.mxu1 %vm249_vm1, %v6533_v29  ;;  %v6696_v29 = vpack.c.bf16 %v6686_v18, %v6685_v17  ;;  %v6697_v31 = vpack.c.bf16 %v6688_v20, %v6687_v25  ;;  %v4154_v18 = vld [vmem:[#allocation2 + $0xc1] sm:$0xff]  ;;  %v4335_v20 = vld [vmem:[#allocation2 + $0x1b9] sm:$0xff] }
 0x243   : > { %9901 = vmatpush3.bf16.msra.mxu1 %v12030_v23  ;;  %9541 = vmatpush3.bf16.msra.mxu0 %v12082_v16  ;;  %v3774_v23 = vpack.c.bf16 %v3765_v38, %v3764_v21  ;;  %v4141_v21 = vld [vmem:[#allocation2 + $0x21] sm:$0xff]  ;;  %v6838_v38 = vld [vmem:[#allocation2 + $0x278] sm:$0xff] }
 0x244   : > { %9902 = vmatprep.subr.bf16.mxu1 %v12039_v41  ;;  %9542 = vmatprep.subr.bf16.mxu0 %v12091_v30  ;;  %v6852_v25 = vld [vmem:[#allocation2 + $0x320] sm:$0xff] }
 0x247   : > { %9903 = vmatpush3.bf16.msra.mxu1 %v12039_v41  ;;  %9543 = vmatpush3.bf16.msra.mxu0 %v12091_v30  ;;  %v6528_v41 = vld [vmem:[#allocation2 + $0x639] sm:$0xff] }
 0x248   : > { %9920 = vmatprep.subr.bf16.mxu1 %v12052_v47  ;;  %9560 = vmatprep.subr.bf16.mxu0 %v12104_v37  ;;  %v6536_v49 = vpack.c.bf16 %v6528_v41, %v6527_v44  ;;  %v6840_v41 = vld [vmem:[#allocation2 + $0x290] sm:$0xff] }
 0x249   : > { %9529 = vmatmul.mubr.msk.bf16.gmra.mrb[72].mxu0 %vm249_vm1, %v3773_v40  ;;  %9889 = vmatmul.mubr.msk.bf16.gmra.mrb[72].mxu1 %vm249_vm1, %v6534_v39  ;;  %v3969_v40 = vpack.c.bf16 %v3961_v32, %v3960_v33  ;;  %v6698_v39 = vpack.c.bf16 %v6690_v34, %v6689_v19  ;;  %v4336_v19 = vld [vmem:[#allocation2 + $0x1c9] sm:$0xff]  ;;  %v4337_v34 = vld [vmem:[#allocation2 + $0x1d1] sm:$0xff] }
 0x24a   : > { %9532 = vmatprep.mubr.msk.bf16.mxu0 %vm249_vm1, %v3774_v23  ;;  %9892 = vmatprep.mubr.msk.bf16.mxu1 %vm249_vm1, %v6535_v43  ;;  %v6837_v23 = vld [vmem:[#allocation2 + $0x270] sm:$0xff] }
 0x24b   : > { %v6853_v44 = vpack.c.bf16 %v6838_v38, %v6837_v23  ;;  %v4338_v38 = vld [vmem:[#allocation2 + $0x1e1] sm:$0xff]  ;;  %v4339_v33 = vld [vmem:[#allocation2 + $0x1e9] sm:$0xff]  ;;  %v4351_v23 = vpack.c.bf16 %v4337_v34, %v4336_v19 }
 0x24c   : > { %v12277_v34 = vld [vmem:[%s12600_s3 + $0x1a8] sm:$0xff]  }
 0x251   : > { %9533 = vmatmul.mubr.msk.bf16.gmra.mrb[76].mxu0 %vm249_vm1, %v3775_v50  ;;  %9893 = vmatmul.mubr.msk.bf16.gmra.mrb[76].mxu1 %vm249_vm1, %v6536_v49  ;;  %v6839_v50 = vld [vmem:[#allocation2 + $0x288] sm:$0xff]  ;;  %v4157_v49 = vpack.c.bf16 %v4143_v46, %v4142_v45 }
 0x252   : > { %9544 = vmatprep.mubr.msk.bf16.mxu0 %vm249_vm1, %v3962_v53  ;;  %9904 = vmatprep.mubr.msk.bf16.mxu1 %vm249_vm1, %v6691_v54  ;;  %v6854_v42 = vpack.c.bf16 %v6840_v41, %v6839_v50  ;;  %v6841_v53 = vld [vmem:[#allocation2 + $0x2a0] sm:$0xff]  ;;  %v4158_v54 = vpack.c.bf16 %v4145_v48, %v4144_v14  ;;  %v12225_v46 = vld [vmem:[%s12600_s3 + $0x188] sm:$0xff]   ;;  %v4342_v50 = vld [vmem:[#allocation2 + $0x211] sm:$0xff] }
 0x253   : > { %v6855_v55 = vpack.c.bf16 %v6842_v35, %v6841_v53  ;;  %v4340_v41 = vld [vmem:[#allocation2 + $0x1f9] sm:$0xff]  ;;  %v4341_v14 = vld [vmem:[#allocation2 + $0x201] sm:$0xff]  ;;  %v7005_v35 = vld [vmem:[#allocation2 + $0x129] sm:$0xff] }
 0x254   : > { %v7004_v48 = vld [vmem:[#allocation2 + $0x121] sm:$0xff]  ;;  %v7006_v53 = vld [vmem:[#allocation2 + $0x139] sm:$0xff] }
 0x259   : > { %9545 = vmatmul.mubr.msk.bf16.vlgmr.msra.gmra.mrb[64].mxu0 %vm249_vm1, %v3963_v51  ;;  %9905 = vmatmul.mubr.msk.bf16.vlgmr.msra.gmra.mrb[64].mxu1 %vm249_vm1, %v6692_v58  ;;  %v4149_v51 = vld [vmem:[#allocation2 + $0x81] sm:$0xff]  ;;  %v6846_v58 = vld [vmem:[#allocation2 + $0x2d8] sm:$0xff] }
 0x25a   : > { %9548 = vmatprep.mubr.msk.bf16.mxu0 %vm249_vm1, %v3964_v63  ;;  %9908 = vmatprep.mubr.msk.bf16.mxu1 %vm249_vm1, %v6693_v1  ;;  %v4159_v63 = vpack.c.bf16 %v4147_v28, %v4146_v10  ;;  %v6845_v1 = vld [vmem:[#allocation2 + $0x2d0] sm:$0xff]  ;;  %v4160_v61 = vpack.c.bf16 %v4149_v51, %v4148_v60 }
 0x25b   : > { %9921 = vmatpush3.bf16.msra.mxu1 %v12052_v47  ;;  %9561 = vmatpush3.bf16.msra.mxu0 %v12104_v37  ;;  %v6694_v47 = vpack.c.bf16 %v6682_v3, %v6681_v36  ;;  %v6857_v36 = vpack.c.bf16 %v6846_v58, %v6845_v1  ;;  %v12195_v3 = vld [vmem:[%s12600_s3 + $0x178] sm:$0xff]   ;;  %v7010_v1 = vld [vmem:[#allocation2 + $0x169] sm:$0xff] }
 0x25c   : > { %9922 = vmatprep.subr.bf16.mxu1 %v12069_v13  ;;  %9562 = vmatprep.subr.bf16.mxu0 %v12121_v2  ;;  %v4345_v60 = vld [vmem:[#allocation2 + $0x231] sm:$0xff]  ;;  %v7009_v58 = vld [vmem:[#allocation2 + $0x159] sm:$0xff] }
 0x25d   : > { %v7008_v51 = vld [vmem:[#allocation2 + $0x151] sm:$0xff] }
 0x25f   : > { %9923 = vmatpush3.bf16.msra.mxu1 %v12069_v13  ;;  %9563 = vmatpush3.bf16.msra.mxu0 %v12121_v2  ;;  %v3957_v13 = vld [vmem:[#allocation2 + $0x230] sm:$0xff] }
 0x260   : > { %9924 = vmatprep.subr.bf16.mxu1 %v12082_v16  ;;  %9564 = vmatprep.subr.bf16.mxu0 %v12134_v5  ;;  %v3967_v22 = vpack.c.bf16 %v3957_v13, %v3956_v26  ;;  %v6998_v26 = vld [vmem:[#allocation2 + $0xd9] sm:$0xff] }
 0x261   : > { %9549 = vmatmul.mubr.msk.bf16.gmra.mrb[68].mxu0 %vm249_vm1, %v3965_v11  ;;  %9909 = vmatmul.mubr.msk.bf16.gmra.mrb[68].mxu1 %vm249_vm1, %v6694_v47  ;;  %v4153_v11 = vld [vmem:[#allocation2 + $0xb1] sm:$0xff]  ;;  %v6850_v47 = vld [vmem:[#allocation2 + $0x308] sm:$0xff] }
 0x262   : > { %9552 = vmatprep.mubr.msk.bf16.mxu0 %vm249_vm1, %v3966_v8  ;;  %9912 = vmatprep.mubr.msk.bf16.mxu1 %vm249_vm1, %v6695_v52  ;;  %v6858_v52 = vpack.c.bf16 %v6848_v0, %v6847_v12  ;;  %v4162_v13 = vpack.c.bf16 %v4153_v11, %v4152_v9  ;;  %v4348_v0 = vld [vmem:[#allocation2 + $0x259] sm:$0xff]  ;;  %v4529_v9 = vld [vmem:[#allocation2 + $0x348] sm:$0xff]  ;;  %v4530_v12 = vld [vmem:[#allocation2 + $0x350] sm:$0xff] }
 0x263   : > { %9925 = vmatpush3.bf16.msra.mxu1 %v12082_v16  ;;  %9565 = vmatpush3.bf16.msra.mxu0 %v12134_v5  ;;  %v3958_v16 = vld [vmem:[#allocation2 + $0x240] sm:$0xff] }
 0x264   : > { %9926 = vmatprep.subr.bf16.mxu1 %v12091_v30  ;;  %9566 = vmatprep.subr.bf16.mxu0 %v12143_v15  ;;  %v3968_v27 = vpack.c.bf16 %v3959_v24, %v3958_v16  ;;  %v4155_v24 = vld [vmem:[#allocation2 + $0xc9] sm:$0xff]  ;;  %v4349_v11 = vld [vmem:[#allocation2 + $0x261] sm:$0xff] }
 0x265   : > { %v4163_v16 = vpack.c.bf16 %v4155_v24, %v4154_v18  ;;  %v4531_v24 = vld [vmem:[#allocation2 + $0x360] sm:$0xff] }
 0x267   : > { %9927 = vmatpush3.bf16.msra.mxu1 %v12091_v30  ;;  %9567 = vmatpush3.bf16.msra.mxu0 %v12143_v15  ;;  %v4140_v30 = vld [vmem:[#allocation2 + $0x19] sm:$0xff] }
 0x268   : > { %9944 = vmatprep.subr.bf16.mxu1 %v12104_v37  ;;  %9584 = vmatprep.subr.bf16.mxu0 %v12156_v7  ;;  %v4156_v43 = vpack.c.bf16 %v4141_v21, %v4140_v30  ;;  %v7000_v30 = vld [vmem:[#allocation2 + $0xf1] sm:$0xff]  ;;  %v7001_v21 = vld [vmem:[#allocation2 + $0xf9] sm:$0xff] }
 0x269   : > { %9553 = vmatmul.mubr.msk.bf16.gmra.mrb[72].mxu0 %vm249_vm1, %v3967_v22  ;;  %9913 = vmatmul.mubr.msk.bf16.gmra.mrb[72].mxu1 %vm249_vm1, %v6696_v29  ;;  %v6999_v22 = vld [vmem:[#allocation2 + $0xe1] sm:$0xff]  ;;  %v6851_v29 = vld [vmem:[#allocation2 + $0x318] sm:$0xff] }
 0x26a   : > { %9556 = vmatprep.mubr.msk.bf16.mxu0 %vm249_vm1, %v3968_v27  ;;  %9916 = vmatprep.mubr.msk.bf16.mxu1 %vm249_vm1, %v6697_v31  ;;  %v6860_v27 = vpack.c.bf16 %v6852_v25, %v6851_v29  ;;  %v7014_v32 = vpack.c.bf16 %v6999_v22, %v6998_v26  ;;  %v4532_v25 = vld [vmem:[#allocation2 + $0x368] sm:$0xff]  ;;  %v4533_v26 = vld [vmem:[#allocation2 + $0x378] sm:$0xff]  ;;  %v4534_v22 = vld [vmem:[#allocation2 + $0x380] sm:$0xff] }
 0x26b   : > { %v7163_v29 = vld [vmem:[#allocation2 + $0x2a1] sm:$0xff] }
 0x271   : > { %9557 = vmatmul.mubr.msk.bf16.gmra.mrb[76].mxu0 %vm249_vm1, %v3969_v40  ;;  %9917 = vmatmul.mubr.msk.bf16.gmra.mrb[76].mxu1 %vm249_vm1, %v6698_v39  ;;  %v7002_v40 = vld [vmem:[#allocation2 + $0x109] sm:$0xff]  ;;  %v7003_v39 = vld [vmem:[#allocation2 + $0x111] sm:$0xff] }
 0x272   : > { %9568 = vmatprep.mubr.msk.bf16.mxu0 %vm249_vm1, %v4156_v43  ;;  %9928 = vmatprep.mubr.msk.bf16.mxu1 %vm249_vm1, %v6853_v44  ;;  %v7015_v43 = vpack.c.bf16 %v7001_v21, %v7000_v30  ;;  %v4352_v44 = vpack.c.bf16 %v4339_v33, %v4338_v38  ;;  %v7016_v45 = vpack.c.bf16 %v7003_v39, %v7002_v40  ;;  %v4535_v30 = vld [vmem:[#allocation2 + $0x390] sm:$0xff]  ;;  %v4536_v21 = vld [vmem:[#allocation2 + $0x398] sm:$0xff]  ;;  %v4537_v38 = vld [vmem:[#allocation2 + $0x3a8] sm:$0xff] }
 0x273   : > { %v7165_v33 = vld [vmem:[#allocation2 + $0x2b9] sm:$0xff]  ;;  %v7166_v40 = vld [vmem:[#allocation2 + $0x2c1] sm:$0xff]  ;;  %v12290_v39 = vld [vmem:[%s12600_s3 + $0x1b0] sm:$0xff]  }
 0x279   : > { %9569 = vmatmul.mubr.msk.bf16.vlgmr.msra.gmra.mrb[64].mxu0 %vm249_vm1, %v4157_v49  ;;  %9929 = vmatmul.mubr.msk.bf16.vlgmr.msra.gmra.mrb[64].mxu1 %vm249_vm1, %v6854_v42  ;;  %v12238_v49 = vld [vmem:[%s12600_s3 + $0x190] sm:$0xff]   ;;  %v4343_v42 = vld [vmem:[#allocation2 + $0x219] sm:$0xff] }
 0x27a   : > { %9572 = vmatprep.mubr.msk.bf16.mxu0 %vm249_vm1, %v4158_v54  ;;  %9932 = vmatprep.mubr.msk.bf16.mxu1 %vm249_vm1, %v6855_v55  ;;  %v7007_v54 = vld [vmem:[#allocation2 + $0x141] sm:$0xff]  ;;  %v7017_v55 = vpack.c.bf16 %v7005_v35, %v7004_v48  ;;  %v4354_v10 = vpack.c.bf16 %v4343_v42, %v4342_v50  ;;  %v12299_v48 = vld [vmem:[%s12600_s3 + $0x1b8] sm:$0xff]   ;;  %v7169_v50 = vld [vmem:[#allocation2 + $0x2e9] sm:$0xff] }
 0x27b   : > { %9945 = vmatpush3.bf16.msra.mxu1 %v12104_v37  ;;  %9585 = vmatpush3.bf16.msra.mxu0 %v12156_v7  ;;  %v6856_v37 = vpack.c.bf16 %v6844_v57, %v6843_v62  ;;  %v7018_v28 = vpack.c.bf16 %v7007_v54, %v7006_v53  ;;  %v12247_v57 = vld [vmem:[%s12600_s3 + $0x198] sm:$0xff]   ;;  %v4346_v62 = vld [vmem:[#allocation2 + $0x241] sm:$0xff] }
 0x27c   : > { %9946 = vmatprep.subr.bf16.mxu1 %v12121_v2  ;;  %9586 = vmatprep.subr.bf16.mxu0 %v12173_v56  ;;  %v4540_v35 = vld [vmem:[#allocation2 + $0x3c8] sm:$0xff]  ;;  %v7170_v42 = vld [vmem:[#allocation2 + $0x2f1] sm:$0xff]  ;;  %v12312_v54 = vld [vmem:[%s12600_s3 + $0x1c0] sm:$0xff]  }
 0x27d   : > { %v4541_v53 = vld [vmem:[#allocation2 + $0x3d8] sm:$0xff] }
 0x27f   : > { %9947 = vmatpush3.bf16.msra.mxu1 %v12121_v2  ;;  %9587 = vmatpush3.bf16.msra.mxu0 %v12173_v56  ;;  %v4150_v2 = vld [vmem:[#allocation2 + $0x91] sm:$0xff] }
 0x280   : > { %9948 = vmatprep.subr.bf16.mxu1 %v12134_v5  ;;  %9588 = vmatprep.subr.bf16.mxu0 %v12186_v59  ;;  %v4161_v8 = vpack.c.bf16 %v4151_v6, %v4150_v2  ;;  %v7019_v2 = vpack.c.bf16 %v7009_v58, %v7008_v51  ;;  %v4543_v51 = vld [vmem:[#allocation2 + $0x3f0] sm:$0xff]  ;;  %v4544_v58 = vld [vmem:[#allocation2 + $0x3f8] sm:$0xff] }
 0x281   : > { %9573 = vmatmul.mubr.msk.bf16.gmra.mrb[68].mxu0 %vm249_vm1, %v4159_v63  ;;  %9933 = vmatmul.mubr.msk.bf16.gmra.mrb[68].mxu1 %vm249_vm1, %v6856_v37  ;;  %v12260_v63 = vld [vmem:[%s12600_s3 + $0x1a0] sm:$0xff]   ;;  %v4347_v37 = vld [vmem:[#allocation2 + $0x249] sm:$0xff] }
 0x282   : > { %9576 = vmatprep.mubr.msk.bf16.mxu0 %vm249_vm1, %v4160_v61  ;;  %9936 = vmatprep.mubr.msk.bf16.mxu1 %vm249_vm1, %v6857_v36  ;;  %v7011_v61 = vld [vmem:[#allocation2 + $0x171] sm:$0xff] }
 0x283   : > { %9949 = vmatpush3.bf16.msra.mxu1 %v12134_v5  ;;  %9589 = vmatpush3.bf16.msra.mxu0 %v12186_v59  ;;  %v6849_v5 = vld [vmem:[#allocation2 + $0x300] sm:$0xff]  ;;  %v7020_v6 = vpack.c.bf16 %v7011_v61, %v7010_v1  ;;  %v7321_v1 = vld [vmem:[#allocation2 + $0x408] sm:$0xff]  ;;  %v7322_v61 = vld [vmem:[#allocation2 + $0x410] sm:$0xff] }
 0x284   : > { %9950 = vmatprep.subr.bf16.mxu1 %v12143_v15  ;;  %9590 = vmatprep.subr.bf16.mxu0 %v12195_v3  ;;  %v6859_v17 = vpack.c.bf16 %v6850_v47, %v6849_v5  ;;  %v7013_v47 = vld [vmem:[#allocation2 + $0x189] sm:$0xff]  ;;  %v4357_v5 = vpack.c.bf16 %v4349_v11, %v4348_v0  ;;  %v7337_v0 = vpack.c.bf16 %v7322_v61, %v7321_v1  ;;  %v7323_v11 = vld [vmem:[#allocation2 + $0x420] sm:$0xff]  ;;  %v7488_v61 = vld [vmem:[#allocation2 + $0x5d8] sm:$0xff] }
 0x285   : > { %v4923_v1 = vld [vmem:[#allocation2 + $0x381] sm:$0xff] }
 0x287   : > { %9951 = vmatpush3.bf16.msra.mxu1 %v12143_v15  ;;  %9591 = vmatpush3.bf16.msra.mxu0 %v12195_v3  ;;  %v4334_v15 = vld [vmem:[#allocation2 + $0x1b1] sm:$0xff] }
 0x288   : > { %9968 = vmatprep.subr.bf16.mxu1 %v12156_v7  ;;  %9608 = vmatprep.subr.bf16.mxu0 %v12208_v4  ;;  %v4350_v31 = vpack.c.bf16 %v4335_v20, %v4334_v15  ;;  %v7161_v15 = vld [vmem:[#allocation2 + $0x289] sm:$0xff]  ;;  %v7162_v20 = vld [vmem:[#allocation2 + $0x291] sm:$0xff] }
 0x289   : > { %9577 = vmatmul.mubr.msk.bf16.gmra.mrb[72].mxu0 %vm249_vm1, %v4161_v8  ;;  %9937 = vmatmul.mubr.msk.bf16.gmra.mrb[72].mxu1 %vm249_vm1, %v6858_v52  ;;  %v7159_v8 = vld [vmem:[#allocation2 + $0x271] sm:$0xff]  ;;  %v7160_v52 = vld [vmem:[#allocation2 + $0x279] sm:$0xff] }
 0x28a   : > { %9580 = vmatprep.mubr.msk.bf16.mxu0 %vm249_vm1, %v4162_v13  ;;  %9940 = vmatprep.mubr.msk.bf16.mxu1 %vm249_vm1, %v6859_v17  ;;  %v4545_v17 = vpack.c.bf16 %v4530_v12, %v4529_v9  ;;  %v7175_v18 = vpack.c.bf16 %v7160_v52, %v7159_v8  ;;  %v4727_v9 = vld [vmem:[#allocation2 + $0x500] sm:$0xff]  ;;  %v7325_v12 = vld [vmem:[#allocation2 + $0x438] sm:$0xff] }
 0x28b   : > { %v7326_v8 = vld [vmem:[#allocation2 + $0x440] sm:$0xff]  ;;  %v4726_v52 = vld [vmem:[#allocation2 + $0x4f8] sm:$0xff] }
 0x291   : > { %9581 = vmatmul.mubr.msk.bf16.gmra.mrb[76].mxu0 %vm249_vm1, %v4163_v16  ;;  %9941 = vmatmul.mubr.msk.bf16.gmra.mrb[76].mxu1 %vm249_vm1, %v6860_v27  ;;  %v7164_v16 = vld [vmem:[#allocation2 + $0x2a9] sm:$0xff]  ;;  %v4546_v27 = vpack.c.bf16 %v4532_v25, %v4531_v24  ;;  %v7339_v24 = vpack.c.bf16 %v7326_v8, %v7325_v12 }
 0x292   : > { %9592 = vmatprep.mubr.msk.bf16.mxu0 %vm249_vm1, %v4350_v31  ;;  %9952 = vmatprep.mubr.msk.bf16.mxu1 %vm249_vm1, %v7014_v32  ;;  %v7176_v31 = vpack.c.bf16 %v7162_v20, %v7161_v15  ;;  %v4547_v32 = vpack.c.bf16 %v4534_v22, %v4533_v26  ;;  %v7177_v19 = vpack.c.bf16 %v7164_v16, %v7163_v29  ;;  %v12329_v25 = vld [vmem:[%s12600_s3 + $0x1c8] sm:$0xff]   ;;  %v4731_v15 = vld [vmem:[#allocation2 + $0x530] sm:$0xff]  ;;  %v7328_v26 = vld [vmem:[#allocation2 + $0x458] sm:$0xff] }
 0x293   : > { %v7327_v20 = vld [vmem:[#allocation2 + $0x450] sm:$0xff]  ;;  %v4733_v29 = vld [vmem:[#allocation2 + $0x548] sm:$0xff] }
 0x294   : > { %v12342_v22 = vld [vmem:[%s12600_s3 + $0x1d0] sm:$0xff]   ;;  %v7329_v16 = vld [vmem:[#allocation2 + $0x468] sm:$0xff] }
 0x295   : > { %v7490_v12 = vld [vmem:[#allocation2 + $0x5f0] sm:$0xff] }
 0x296   : > { %v12394_v8 = vld [vmem:[%s12600_s3 + $0x1f0] sm:$0xff]  }
 0x299   : > { %9593 = vmatmul.mubr.msk.bf16.vlgmr.msra.gmra.mrb[64].mxu0 %vm249_vm1, %v4351_v23  ;;  %9953 = vmatmul.mubr.msk.bf16.vlgmr.msra.gmra.mrb[64].mxu1 %vm249_vm1, %v7015_v43  ;;  %v4538_v23 = vld [vmem:[#allocation2 + $0x3b0] sm:$0xff] }
 0x29a   : > { %9596 = vmatprep.mubr.msk.bf16.mxu0 %vm249_vm1, %v4352_v44  ;;  %9956 = vmatprep.mubr.msk.bf16.mxu1 %vm249_vm1, %v7016_v45  ;;  %v7167_v43 = vld [vmem:[#allocation2 + $0x2d1] sm:$0xff]  ;;  %v7168_v44 = vld [vmem:[#allocation2 + $0x2d9] sm:$0xff]  ;;  %v7178_v45 = vpack.c.bf16 %v7166_v40, %v7165_v33  ;;  %v7332_v40 = vld [vmem:[#allocation2 + $0x488] sm:$0xff] }
 0x29b   : > { %9969 = vmatpush3.bf16.msra.mxu1 %v12156_v7  ;;  %9609 = vmatpush3.bf16.msra.mxu0 %v12208_v4  ;;  %v4353_v7 = vpack.c.bf16 %v4341_v14, %v4340_v41  ;;  %v4549_v41 = vpack.c.bf16 %v4538_v23, %v4537_v38  ;;  %v7179_v14 = vpack.c.bf16 %v7168_v44, %v7167_v43  ;;  %v12351_v38 = vld [vmem:[%s12600_s3 + $0x1d8] sm:$0xff]   ;;  %v7331_v33 = vld [vmem:[#allocation2 + $0x480] sm:$0xff] }
 0x29c   : > { %9970 = vmatprep.subr.bf16.mxu1 %v12173_v56  ;;  %9610 = vmatprep.subr.bf16.mxu0 %v12225_v46  ;;  %v12364_v23 = vld [vmem:[%s12600_s3 + $0x1e0] sm:$0xff]   ;;  %v4737_v43 = vld [vmem:[#allocation2 + $0x578] sm:$0xff] }
 0x29d   : > { %v7333_v44 = vld [vmem:[#allocation2 + $0x498] sm:$0xff] }
 0x29f   : > { %9971 = vmatpush3.bf16.msra.mxu1 %v12173_v56  ;;  %9611 = vmatpush3.bf16.msra.mxu0 %v12225_v46  ;;  %v4344_v56 = vld [vmem:[#allocation2 + $0x229] sm:$0xff] }
 0x2a0   : > { %9972 = vmatprep.subr.bf16.mxu1 %v12186_v59  ;;  %9612 = vmatprep.subr.bf16.mxu0 %v12238_v49  ;;  %v4355_v36 = vpack.c.bf16 %v4345_v60, %v4344_v56  ;;  %v7180_v56 = vpack.c.bf16 %v7170_v42, %v7169_v50  ;;  %v7335_v50 = vld [vmem:[#allocation2 + $0x4b0] sm:$0xff]  ;;  %v7336_v42 = vld [vmem:[#allocation2 + $0x4b8] sm:$0xff] }
 0x2a1   : > { %9597 = vmatmul.mubr.msk.bf16.gmra.mrb[68].mxu0 %vm249_vm1, %v4353_v7  ;;  %9957 = vmatmul.mubr.msk.bf16.gmra.mrb[68].mxu1 %vm249_vm1, %v7017_v55  ;;  %v4542_v7 = vld [vmem:[#allocation2 + $0x3e0] sm:$0xff] }
 0x2a2   : > { %9600 = vmatprep.mubr.msk.bf16.mxu0 %vm249_vm1, %v4354_v10  ;;  %9960 = vmatprep.mubr.msk.bf16.mxu1 %vm249_vm1, %v7018_v28  ;;  %v7171_v55 = vld [vmem:[#allocation2 + $0x301] sm:$0xff]  ;;  %v7172_v10 = vld [vmem:[#allocation2 + $0x309] sm:$0xff] }
 0x2a3   : > { %9973 = vmatpush3.bf16.msra.mxu1 %v12186_v59  ;;  %9613 = vmatpush3.bf16.msra.mxu0 %v12238_v49  ;;  %v4356_v59 = vpack.c.bf16 %v4347_v37, %v4346_v62  ;;  %v7181_v60 = vpack.c.bf16 %v7172_v10, %v7171_v55  ;;  %v7173_v62 = vld [vmem:[#allocation2 + $0x319] sm:$0xff]  ;;  %v4725_v37 = vld [vmem:[#allocation2 + $0x4e8] sm:$0xff]  ;;  %v4919_v55 = vld [vmem:[#allocation2 + $0x351] sm:$0xff] }
 0x2a4   : > { %9974 = vmatprep.subr.bf16.mxu1 %v12195_v3  ;;  %9614 = vmatprep.subr.bf16.mxu0 %v12247_v57  ;;  %v7484_v10 = vld [vmem:[#allocation2 + $0x5a8] sm:$0xff] }
 0x2a7   : > { %9975 = vmatpush3.bf16.msra.mxu1 %v12195_v3  ;;  %9615 = vmatpush3.bf16.msra.mxu0 %v12247_v57  ;;  %v7012_v3 = vld [vmem:[#allocation2 + $0x181] sm:$0xff] }
 0x2a8   : > { %9992 = vmatprep.subr.bf16.mxu1 %v12208_v4  ;;  %9632 = vmatprep.subr.bf16.mxu0 %v12260_v63  ;;  %v7021_v13 = vpack.c.bf16 %v7013_v47, %v7012_v3  ;;  %v7324_v3 = vld [vmem:[#allocation2 + $0x428] sm:$0xff]  ;;  %v4729_v47 = vld [vmem:[#allocation2 + $0x518] sm:$0xff] }
 0x2a9   : > { %9601 = vmatmul.mubr.msk.bf16.gmra.mrb[72].mxu0 %vm249_vm1, %v4355_v36  ;;  %9961 = vmatmul.mubr.msk.bf16.gmra.mrb[72].mxu1 %vm249_vm1, %v7019_v2  ;;  %v4552_v36 = vpack.c.bf16 %v4544_v58, %v4543_v51  ;;  %v4920_v58 = vld [vmem:[#allocation2 + $0x361] sm:$0xff] }
 0x2aa   : > { %9604 = vmatprep.mubr.msk.bf16.mxu0 %vm249_vm1, %v4356_v59  ;;  %9964 = vmatprep.mubr.msk.bf16.mxu1 %vm249_vm1, %v7020_v6  ;;  %v4724_v59 = vld [vmem:[#allocation2 + $0x4e0] sm:$0xff] }
 0x2ab   : > { %v4740_v6 = vpack.c.bf16 %v4725_v37, %v4724_v59  ;;  %v4922_v37 = vld [vmem:[#allocation2 + $0x379] sm:$0xff] }
 0x2b1   : > { %9605 = vmatmul.mubr.msk.bf16.gmra.mrb[76].mxu0 %vm249_vm1, %v4357_v5  ;;  %9965 = vmatmul.mubr.msk.bf16.gmra.mrb[76].mxu1 %vm249_vm1, %v7021_v13  ;;  %v4741_v5 = vpack.c.bf16 %v4727_v9, %v4726_v52  ;;  %v7338_v13 = vpack.c.bf16 %v7324_v3, %v7323_v11  ;;  %v12381_v11 = vld [vmem:[%s12600_s3 + $0x1e8] sm:$0xff]   ;;  %v4924_v3 = vld [vmem:[#allocation2 + $0x391] sm:$0xff] }
 0x2b2   : > { %9616 = vmatprep.mubr.msk.bf16.mxu0 %vm249_vm1, %v4545_v17  ;;  %9976 = vmatprep.mubr.msk.bf16.mxu1 %vm249_vm1, %v7175_v18  ;;  %v4728_v17 = vld [vmem:[#allocation2 + $0x510] sm:$0xff] }
 0x2b3   : > { %v4742_v18 = vpack.c.bf16 %v4729_v47, %v4728_v17  ;;  %v4925_v47 = vld [vmem:[#allocation2 + $0x399] sm:$0xff]  ;;  %v4926_v52 = vld [vmem:[#allocation2 + $0x3a9] sm:$0xff] }
 0x2b4   : > { %v7489_v17 = vld [vmem:[#allocation2 + $0x5e8] sm:$0xff] }
 0x2b9   : > { %9617 = vmatmul.mubr.msk.bf16.vlgmr.msra.gmra.mrb[64].mxu0 %vm249_vm1, %v4546_v27  ;;  %9977 = vmatmul.mubr.msk.bf16.vlgmr.msra.gmra.mrb[64].mxu1 %vm249_vm1, %v7176_v31  ;;  %v7330_v27 = vld [vmem:[#allocation2 + $0x470] sm:$0xff]  ;;  %v4730_v31 = vld [vmem:[#allocation2 + $0x528] sm:$0xff] }
 0x2ba   : > { %9620 = vmatprep.mubr.msk.bf16.mxu0 %vm249_vm1, %v4547_v32  ;;  %9980 = vmatprep.mubr.msk.bf16.mxu1 %vm249_vm1, %v7177_v19  ;;  %v4743_v32 = vpack.c.bf16 %v4731_v15, %v4730_v31  ;;  %v4732_v19 = vld [vmem:[#allocation2 + $0x540] sm:$0xff] }
 0x2bb   : > { %9993 = vmatpush3.bf16.msra.mxu1 %v12208_v4  ;;  %9633 = vmatpush3.bf16.msra.mxu0 %v12260_v63  ;;  %v4548_v4 = vpack.c.bf16 %v4536_v21, %v4535_v30  ;;  %v4744_v30 = vpack.c.bf16 %v4733_v29, %v4732_v19  ;;  %v7341_v21 = vpack.c.bf16 %v7330_v27, %v7329_v16  ;;  %v4929_v29 = vld [vmem:[#allocation2 + $0x3c9] sm:$0xff]  ;;  %v7494_v16 = vld [vmem:[#allocation2 + $0x620] sm:$0xff] }
 0x2bc   : > { %9994 = vmatprep.subr.bf16.mxu1 %v12225_v46  ;;  %9634 = vmatprep.subr.bf16.mxu0 %v12277_v34  ;;  %v4930_v27 = vld [vmem:[#allocation2 + $0x3d9] sm:$0xff]  ;;  %v4931_v31 = vld [vmem:[#allocation2 + $0x3e1] sm:$0xff] }
 0x2bf   : > { %9995 = vmatpush3.bf16.msra.mxu1 %v12225_v46  ;;  %9635 = vmatpush3.bf16.msra.mxu0 %v12277_v34  ;;  %v4539_v46 = vld [vmem:[#allocation2 + $0x3c0] sm:$0xff] }
 0x2c0   : > { %9996 = vmatprep.subr.bf16.mxu1 %v12238_v49  ;;  %9636 = vmatprep.subr.bf16.mxu0 %v12290_v39  ;;  %v4550_v28 = vpack.c.bf16 %v4540_v35, %v4539_v46 }
 0x2c1   : > { %9621 = vmatmul.mubr.msk.bf16.gmra.mrb[68].mxu0 %vm249_vm1, %v4548_v4  ;;  %9981 = vmatmul.mubr.msk.bf16.gmra.mrb[68].mxu1 %vm249_vm1, %v7178_v45  ;;  %v7334_v4 = vld [vmem:[#allocation2 + $0x4a0] sm:$0xff]  ;;  %v4734_v45 = vld [vmem:[#allocation2 + $0x558] sm:$0xff] }
 0x2c2   : > { %9624 = vmatprep.mubr.msk.bf16.mxu0 %vm249_vm1, %v4549_v41  ;;  %9984 = vmatprep.mubr.msk.bf16.mxu1 %vm249_vm1, %v7179_v14  ;;  %v7342_v14 = vpack.c.bf16 %v7332_v40, %v7331_v33  ;;  %v7343_v35 = vpack.c.bf16 %v7334_v4, %v7333_v44  ;;  %v7497_v33 = vld [vmem:[#allocation2 + $0x648] sm:$0xff]  ;;  %v7498_v40 = vld [vmem:[#allocation2 + $0x650] sm:$0xff]  ;;  %v4933_v44 = vld [vmem:[#allocation2 + $0x3f9] sm:$0xff] }
 0x2c3   : > { %9997 = vmatpush3.bf16.msra.mxu1 %v12238_v49  ;;  %9637 = vmatpush3.bf16.msra.mxu0 %v12290_v39  ;;  %v4551_v49 = vpack.c.bf16 %v4542_v7, %v4541_v53  ;;  %v4739_v53 = vld [vmem:[#allocation2 + $0x590] sm:$0xff]  ;;  %v5112_v4 = vld [vmem:[#allocation2 + $0x4e1] sm:$0xff] }
 0x2c4   : > { %9998 = vmatprep.subr.bf16.mxu1 %v12247_v57  ;;  %9638 = vmatprep.subr.bf16.mxu0 %v12299_v48  ;;  %v4918_v7 = vld [vmem:[#allocation2 + $0x349] sm:$0xff] }
 0x2c7   : > { %9999 = vmatpush3.bf16.msra.mxu1 %v12247_v57  ;;  %9639 = vmatpush3.bf16.msra.mxu0 %v12299_v48  ;;  %v7174_v57 = vld [vmem:[#allocation2 + $0x321] sm:$0xff] }
 0x2c8   : > { %10016 = vmatprep.subr.bf16.mxu1 %v12260_v63  ;;  %9656 = vmatprep.subr.bf16.mxu0 %v12312_v54  ;;  %v7182_v2 = vpack.c.bf16 %v7174_v57, %v7173_v62  ;;  %v4921_v62 = vld [vmem:[#allocation2 + $0x369] sm:$0xff]  ;;  %v7486_v57 = vld [vmem:[#allocation2 + $0x5c0] sm:$0xff] }
 0x2c9   : > { %9625 = vmatmul.mubr.msk.bf16.gmra.mrb[72].mxu0 %vm249_vm1, %v4550_v28  ;;  %9985 = vmatmul.mubr.msk.bf16.gmra.mrb[72].mxu1 %vm249_vm1, %v7180_v56  ;;  %v4738_v28 = vld [vmem:[#allocation2 + $0x588] sm:$0xff] }
 0x2ca   : > { %9628 = vmatprep.mubr.msk.bf16.mxu0 %vm249_vm1, %v4551_v49  ;;  %9988 = vmatprep.mubr.msk.bf16.mxu1 %vm249_vm1, %v7181_v60  ;;  %v4747_v56 = vpack.c.bf16 %v4739_v53, %v4738_v28  ;;  %v7483_v49 = vld [vmem:[#allocation2 + $0x5a0] sm:$0xff]  ;;  %v4934_v60 = vpack.c.bf16 %v4919_v55, %v4918_v7  ;;  %v5116_v7 = vld [vmem:[#allocation2 + $0x511] sm:$0xff] }
 0x2cb   : > { %v7499_v51 = vpack.c.bf16 %v7484_v10, %v7483_v49  ;;  %v7646_v53 = vld [vmem:[#allocation2 + $0x421] sm:$0xff]  ;;  %v5117_v55 = vld [vmem:[#allocation2 + $0x519] sm:$0xff] }
 0x2cc   : > { %v7648_v10 = vld [vmem:[#allocation2 + $0x439] sm:$0xff]  ;;  %v7649_v28 = vld [vmem:[#allocation2 + $0x441] sm:$0xff] }
 0x2d1   : > { %9629 = vmatmul.mubr.msk.bf16.gmra.mrb[76].mxu0 %vm249_vm1, %v4552_v36  ;;  %9989 = vmatmul.mubr.msk.bf16.gmra.mrb[76].mxu1 %vm249_vm1, %v7182_v2  ;;  %v7485_v36 = vld [vmem:[#allocation2 + $0x5b8] sm:$0xff]  ;;  %v4935_v2 = vpack.c.bf16 %v4921_v62, %v4920_v58  ;;  %v5118_v58 = vld [vmem:[#allocation2 + $0x529] sm:$0xff] }
 0x2d2   : > { %9640 = vmatprep.mubr.msk.bf16.mxu0 %vm249_vm1, %v4740_v6  ;;  %10000 = vmatprep.mubr.msk.bf16.mxu1 %vm249_vm1, %v7337_v0  ;;  %v7500_v59 = vpack.c.bf16 %v7486_v57, %v7485_v36  ;;  %v7487_v6 = vld [vmem:[#allocation2 + $0x5d0] sm:$0xff]  ;;  %v4936_v0 = vpack.c.bf16 %v4923_v1, %v4922_v37  ;;  %v7651_v37 = vld [vmem:[#allocation2 + $0x459] sm:$0xff]  ;;  %v5120_v1 = vld [vmem:[#allocation2 + $0x541] sm:$0xff] }
 0x2d3   : > { %v7501_v9 = vpack.c.bf16 %v7488_v61, %v7487_v6  ;;  %v5119_v62 = vld [vmem:[#allocation2 + $0x531] sm:$0xff]  ;;  %v5121_v61 = vld [vmem:[#allocation2 + $0x549] sm:$0xff] }
 0x2d4   : > { %v7650_v57 = vld [vmem:[#allocation2 + $0x451] sm:$0xff]  ;;  %v7652_v36 = vld [vmem:[#allocation2 + $0x469] sm:$0xff] }
 0x2d5   : > { %v7663_v6 = vpack.c.bf16 %v7651_v37, %v7650_v57 }
 0x2d9   : > { %9641 = vmatmul.mubr.msk.bf16.vlgmr.msra.gmra.mrb[64].mxu0 %vm249_vm1, %v4741_v5  ;;  %10001 = vmatmul.mubr.msk.bf16.vlgmr.msra.gmra.mrb[64].mxu1 %vm249_vm1, %v7338_v13  ;;  %v4927_v5 = vld [vmem:[#allocation2 + $0x3b1] sm:$0xff]  ;;  %v7492_v13 = vld [vmem:[#allocation2 + $0x608] sm:$0xff] }
 0x2da   : > { %9644 = vmatprep.mubr.msk.bf16.mxu0 %vm249_vm1, %v4742_v18  ;;  %10004 = vmatprep.mubr.msk.bf16.mxu1 %vm249_vm1, %v7339_v24  ;;  %v4937_v18 = vpack.c.bf16 %v4925_v47, %v4924_v3  ;;  %v7491_v24 = vld [vmem:[#allocation2 + $0x600] sm:$0xff]  ;;  %v4938_v15 = vpack.c.bf16 %v4927_v5, %v4926_v52  ;;  %v5124_v52 = vld [vmem:[#allocation2 + $0x571] sm:$0xff] }
 0x2db   : > { %10017 = vmatpush3.bf16.msra.mxu1 %v12260_v63  ;;  %9657 = vmatpush3.bf16.msra.mxu0 %v12312_v54  ;;  %v7340_v63 = vpack.c.bf16 %v7328_v26, %v7327_v20  ;;  %v7503_v20 = vpack.c.bf16 %v7492_v13, %v7491_v24  ;;  %v12403_v26 = vld [vmem:[%s12600_s3 + $0x1f8] sm:$0xff]   ;;  %v5123_v3 = vld [vmem:[#allocation2 + $0x561] sm:$0xff] }
 0x2dc   : > { %10018 = vmatprep.subr.bf16.mxu1 %v12277_v34  ;;  %9658 = vmatprep.subr.bf16.mxu0 %v12329_v25  ;;  %v7654_v47 = vld [vmem:[#allocation2 + $0x481] sm:$0xff]  ;;  %v7656_v5 = vld [vmem:[#allocation2 + $0x499] sm:$0xff] }
 0x2dd   : > { %v7657_v13 = vld [vmem:[#allocation2 + $0x4a1] sm:$0xff] }
 0x2de   : > { %v7666_v24 = vpack.c.bf16 %v7657_v13, %v7656_v5 }
 0x2df   : > { %10019 = vmatpush3.bf16.msra.mxu1 %v12277_v34  ;;  %9659 = vmatpush3.bf16.msra.mxu0 %v12329_v25  ;;  %v4735_v34 = vld [vmem:[#allocation2 + $0x560] sm:$0xff] }
 0x2e0   : > { %10020 = vmatprep.subr.bf16.mxu1 %v12290_v39  ;;  %9660 = vmatprep.subr.bf16.mxu0 %v12342_v22  ;;  %v4745_v41 = vpack.c.bf16 %v4735_v34, %v4734_v45  ;;  %v5113_v45 = vld [vmem:[#allocation2 + $0x4e9] sm:$0xff] }
 0x2e1   : > { %9645 = vmatmul.mubr.msk.bf16.gmra.mrb[68].mxu0 %vm249_vm1, %v4743_v32  ;;  %10005 = vmatmul.mubr.msk.bf16.gmra.mrb[68].mxu1 %vm249_vm1, %v7340_v63  ;;  %v7496_v32 = vld [vmem:[#allocation2 + $0x638] sm:$0xff] }
 0x2e2   : > { %9648 = vmatprep.mubr.msk.bf16.mxu0 %vm249_vm1, %v4744_v30  ;;  %10008 = vmatprep.mubr.msk.bf16.mxu1 %vm249_vm1, %v7341_v21  ;;  %v7493_v63 = vld [vmem:[#allocation2 + $0x618] sm:$0xff]  ;;  %v7495_v21 = vld [vmem:[#allocation2 + $0x630] sm:$0xff] }
 0x2e3   : > { %10021 = vmatpush3.bf16.msra.mxu1 %v12290_v39  ;;  %9661 = vmatpush3.bf16.msra.mxu0 %v12342_v22  ;;  %v4736_v39 = vld [vmem:[#allocation2 + $0x570] sm:$0xff]  ;;  %v7504_v30 = vpack.c.bf16 %v7494_v16, %v7493_v63  ;;  %v7505_v34 = vpack.c.bf16 %v7496_v32, %v7495_v21  ;;  %v7805_v16 = vld [vmem:[#allocation2 + $0x5a1] sm:$0xff] }
 0x2e4   : > { %10022 = vmatprep.subr.bf16.mxu1 %v12299_v48  ;;  %9662 = vmatprep.subr.bf16.mxu0 %v12351_v38  ;;  %v4746_v46 = vpack.c.bf16 %v4737_v43, %v4736_v39  ;;  %v4932_v43 = vld [vmem:[#allocation2 + $0x3f1] sm:$0xff]  ;;  %v7808_v63 = vld [vmem:[#allocation2 + $0x5c1] sm:$0xff] }
 0x2e5   : > { %v4941_v39 = vpack.c.bf16 %v4933_v44, %v4932_v43  ;;  %v7814_v43 = vld [vmem:[#allocation2 + $0x609] sm:$0xff] }
 0x2e7   : > { %10023 = vmatpush3.bf16.msra.mxu1 %v12299_v48  ;;  %9663 = vmatpush3.bf16.msra.mxu0 %v12351_v38  ;;  %v7344_v48 = vpack.c.bf16 %v7336_v42, %v7335_v50  ;;  %v5114_v50 = vld [vmem:[#allocation2 + $0x4f9] sm:$0xff]  ;;  %v5115_v42 = vld [vmem:[#allocation2 + $0x501] sm:$0xff] }
 0x2e8   : > { %10040 = vmatprep.subr.bf16.mxu1 %v12312_v54  ;;  %9680 = vmatprep.subr.bf16.mxu0 %v12364_v23 }
 0x2e9   : > { %9649 = vmatmul.mubr.msk.bf16.gmra.mrb[72].mxu0 %vm249_vm1, %v4745_v41  ;;  %10009 = vmatmul.mubr.msk.bf16.gmra.mrb[72].mxu1 %vm249_vm1, %v7342_v14  ;;  %v7644_v41 = vld [vmem:[#allocation2 + $0x409] sm:$0xff]  ;;  %v7645_v14 = vld [vmem:[#allocation2 + $0x411] sm:$0xff] }
 0x2ea   : > { %9652 = vmatprep.mubr.msk.bf16.mxu0 %vm249_vm1, %v4746_v46  ;;  %10012 = vmatprep.mubr.msk.bf16.mxu1 %vm249_vm1, %v7343_v35  ;;  %v5128_v46 = vpack.c.bf16 %v5113_v45, %v5112_v4  ;;  %v7660_v35 = vpack.c.bf16 %v7645_v14, %v7644_v41  ;;  %v7816_v45 = vld [vmem:[#allocation2 + $0x621] sm:$0xff]  ;;  %v7817_v41 = vld [vmem:[#allocation2 + $0x631] sm:$0xff]  ;;  %v7818_v14 = vld [vmem:[#allocation2 + $0x639] sm:$0xff] }
 0x2f1   : > { %9653 = vmatmul.mubr.msk.bf16.gmra.mrb[76].mxu0 %vm249_vm1, %v4747_v56  ;;  %10013 = vmatmul.mubr.msk.bf16.gmra.mrb[76].mxu1 %vm249_vm1, %v7344_v48  ;;  %v7647_v48 = vld [vmem:[#allocation2 + $0x429] sm:$0xff]  ;;  %v5129_v56 = vpack.c.bf16 %v5115_v42, %v5114_v50  ;;  %v7820_v50 = vld [vmem:[#allocation2 + $0x651] sm:$0xff] }
 0x2f2   : > { %9664 = vmatprep.mubr.msk.bf16.mxu0 %vm249_vm1, %v4934_v60  ;;  %10024 = vmatprep.mubr.msk.bf16.mxu1 %vm249_vm1, %v7499_v51  ;;  %v7661_v49 = vpack.c.bf16 %v7647_v48, %v7646_v53  ;;  %v5130_v60 = vpack.c.bf16 %v5117_v55, %v5116_v7  ;;  %v7662_v51 = vpack.c.bf16 %v7649_v28, %v7648_v10  ;;  %v12456_v53 = vld [vmem:[%s12601_s4] ss:$0 sm:$0xff] }
 0x2f9   : > { %9665 = vmatmul.mubr.msk.bf16.vlgmr.msra.gmra.mrb[64].mxu0 %vm249_vm1, %v4935_v2  ;;  %10025 = vmatmul.mubr.msk.bf16.vlgmr.msra.gmra.mrb[64].mxu1 %vm249_vm1, %v7500_v59  ;;  %v7653_v2 = vld [vmem:[#allocation2 + $0x471] sm:$0xff]  ;;  %v5131_v59 = vpack.c.bf16 %v5119_v62, %v5118_v58 }
 0x2fa   : > { %9668 = vmatprep.mubr.msk.bf16.mxu0 %vm249_vm1, %v4936_v0  ;;  %10028 = vmatprep.mubr.msk.bf16.mxu1 %vm249_vm1, %v7501_v9  ;;  %v5132_v0 = vpack.c.bf16 %v5121_v61, %v5120_v1  ;;  %v7664_v9 = vpack.c.bf16 %v7653_v2, %v7652_v36  ;;  %v5360_v61 = vld [vmem:[%s12602_s5] sm:$0xff]  ;;  %v5361_v36 = vld [vmem:[%s12602_s5 + $0x8] sm:$0xff]  ;;  %v5362_v2 = vld [vmem:[%s12602_s5 + $0x10] sm:$0xff] }
 0x2fb   : > { %10041 = vmatpush3.bf16.msra.mxu1 %v12312_v54  ;;  %9681 = vmatpush3.bf16.msra.mxu0 %v12364_v23  ;;  %v7502_v54 = vpack.c.bf16 %v7490_v12, %v7489_v17  ;;  %v7655_v12 = vld [vmem:[#allocation2 + $0x489] sm:$0xff] }
 0x2fc   : > { %10042 = vmatprep.subr.bf16.mxu1 %v12329_v25  ;;  %9682 = vmatprep.subr.bf16.mxu0 %v12381_v11 }
 0x2ff   : > { %10043 = vmatpush3.bf16.msra.mxu1 %v12329_v25  ;;  %9683 = vmatpush3.bf16.msra.mxu0 %v12381_v11  ;;  %v4928_v25 = vld [vmem:[#allocation2 + $0x3c1] sm:$0xff] }
 0x300   : > { %10044 = vmatprep.subr.bf16.mxu1 %v12342_v22  ;;  %9684 = vmatprep.subr.bf16.mxu0 %v12394_v8  ;;  %v4939_v19 = vpack.c.bf16 %v4929_v29, %v4928_v25  ;;  %v5127_v25 = vld [vmem:[#allocation2 + $0x591] sm:$0xff] }
 0x301   : > { %9669 = vmatmul.mubr.msk.bf16.gmra.mrb[68].mxu0 %vm249_vm1, %v4937_v18  ;;  %10029 = vmatmul.mubr.msk.bf16.gmra.mrb[68].mxu1 %vm249_vm1, %v7502_v54  ;;  %v7665_v18 = vpack.c.bf16 %v7655_v12, %v7654_v47  ;;  %v5363_v47 = vld [vmem:[%s12602_s5 + $0x18] sm:$0xff] }
 0x302   : > { %9672 = vmatprep.mubr.msk.bf16.mxu0 %vm249_vm1, %v4938_v15  ;;  %10032 = vmatprep.mubr.msk.bf16.mxu1 %vm249_vm1, %v7503_v20  ;;  %v7659_v15 = vld [vmem:[#allocation2 + $0x4b9] sm:$0xff]  ;;  %v5126_v20 = vld [vmem:[#allocation2 + $0x589] sm:$0xff] }
 0x303   : > { %10045 = vmatpush3.bf16.msra.mxu1 %v12342_v22  ;;  %9685 = vmatpush3.bf16.msra.mxu0 %v12394_v8  ;;  %v4940_v22 = vpack.c.bf16 %v4931_v31, %v4930_v27  ;;  %v7806_v27 = vld [vmem:[#allocation2 + $0x5a9] sm:$0xff]  ;;  %v5135_v31 = vpack.c.bf16 %v5127_v25, %v5126_v20  ;;  %v5364_v20 = vld [vmem:[%s12602_s5 + $0x20] sm:$0xff] }
 0x304   : > { %10046 = vmatprep.subr.bf16.mxu1 %v12351_v38  ;;  %9686 = vmatprep.subr.bf16.mxu0 %v12403_v26  ;;  %v7821_v32 = vpack.c.bf16 %v7806_v27, %v7805_v16 }
 0x307   : > { %10047 = vmatpush3.bf16.msra.mxu1 %v12351_v38  ;;  %9687 = vmatpush3.bf16.msra.mxu0 %v12403_v26  ;;  %v7506_v38 = vpack.c.bf16 %v7498_v40, %v7497_v33  ;;  %v7812_v33 = vld [vmem:[#allocation2 + $0x5f1] sm:$0xff]  ;;  %v7813_v40 = vld [vmem:[#allocation2 + $0x601] sm:$0xff] }
 0x308   : > { %10064 = vmatprep.subr.bf16.mxu1 %v12364_v23  ;;  %v7825_v4 = vpack.c.bf16 %v7814_v43, %v7813_v40 }
 0x309   : > { %9673 = vmatmul.mubr.msk.bf16.gmra.mrb[72].mxu0 %vm249_vm1, %v4939_v19  ;;  %10033 = vmatmul.mubr.msk.bf16.gmra.mrb[72].mxu1 %vm249_vm1, %v7504_v30  ;;  %v7809_v19 = vld [vmem:[#allocation2 + $0x5d1] sm:$0xff]  ;;  %v7810_v30 = vld [vmem:[#allocation2 + $0x5d9] sm:$0xff] }
 0x30a   : > { %9676 = vmatprep.mubr.msk.bf16.mxu0 %vm249_vm1, %v4940_v22  ;;  %10036 = vmatprep.mubr.msk.bf16.mxu1 %vm249_vm1, %v7505_v34  ;;  %v7823_v22 = vpack.c.bf16 %v7810_v30, %v7809_v19  ;;  %v7811_v34 = vld [vmem:[#allocation2 + $0x5e9] sm:$0xff] }
 0x30b   : > { %v7824_v44 = vpack.c.bf16 %v7812_v33, %v7811_v34 }
 0x311   : > { %9677 = vmatmul.mubr.msk.bf16.gmra.mrb[76].mxu0 %vm249_vm1, %v4941_v39  ;;  %10037 = vmatmul.mubr.msk.bf16.gmra.mrb[76].mxu1 %vm249_vm1, %v7506_v38  ;;  %v7815_v38 = vld [vmem:[#allocation2 + $0x619] sm:$0xff] }
 0x312   : > { %9688 = vmatprep.mubr.msk.bf16.mxu0 %vm249_vm1, %v5128_v46  ;;  %10048 = vmatprep.mubr.msk.bf16.mxu1 %vm249_vm1, %v7660_v35  ;;  %v7826_v39 = vpack.c.bf16 %v7816_v45, %v7815_v38  ;;  %v7827_v46 = vpack.c.bf16 %v7818_v14, %v7817_v41  ;;  %v7819_v35 = vld [vmem:[#allocation2 + $0x649] sm:$0xff]  ;;  %v5367_v38 = vld [vmem:[%s12602_s5 + $0x38] sm:$0xff] }
 0x313   : > { %v7828_v42 = vpack.c.bf16 %v7820_v50, %v7819_v35 }
 0x319   : > { %9689 = vmatmul.mubr.msk.bf16.vlgmr.msra.gmra.mrb[64].mxu0 %vm249_vm1, %v5129_v56  ;;  %10049 = vmatmul.mubr.msk.bf16.vlgmr.msra.gmra.mrb[64].mxu1 %vm249_vm1, %v7661_v49 }
 0x31a   : > { %9692 = vmatprep.mubr.msk.bf16.mxu0 %vm249_vm1, %v5130_v60  ;;  %10052 = vmatprep.mubr.msk.bf16.mxu1 %vm249_vm1, %v7662_v51 }
 0x31b   : > { %10065 = vmatpush3.bf16.msra.mxu1 %v12364_v23  ;;  %v5122_v23 = vld [vmem:[#allocation2 + $0x559] sm:$0xff] }
 0x31c   : > { %10066 = vmatprep.subr.bf16.mxu1 %v12381_v11  ;;  %v5133_v17 = vpack.c.bf16 %v5123_v3, %v5122_v23 }
 0x31f   : > { %10067 = vmatpush3.bf16.msra.mxu1 %v12381_v11  ;;  %v5125_v11 = vld [vmem:[#allocation2 + $0x579] sm:$0xff] }
 0x320   : > { %10068 = vmatprep.subr.bf16.mxu1 %v12394_v8  ;;  %v5134_v54 = vpack.c.bf16 %v5125_v11, %v5124_v52 }
 0x321   : > { %9693 = vmatmul.mubr.msk.bf16.gmra.mrb[68].mxu0 %vm249_vm1, %v5131_v59  ;;  %10053 = vmatmul.mubr.msk.bf16.gmra.mrb[68].mxu1 %vm249_vm1, %v7663_v6 }
 0x322   : > { %9696 = vmatprep.mubr.msk.bf16.mxu0 %vm249_vm1, %v5132_v0  ;;  %10056 = vmatprep.mubr.msk.bf16.mxu1 %vm249_vm1, %v7664_v9 }
 0x323   : > { %10069 = vmatpush3.bf16.msra.mxu1 %v12394_v8  ;;  %v7658_v8 = vld [vmem:[#allocation2 + $0x4b1] sm:$0xff] }
 0x324   : > { %10070 = vmatprep.subr.bf16.mxu1 %v12403_v26  ;;  %v7667_v29 = vpack.c.bf16 %v7659_v15, %v7658_v8 }
 0x327   : > { %10071 = vmatpush3.bf16.msra.mxu1 %v12403_v26  ;;  %v7807_v26 = vld [vmem:[#allocation2 + $0x5b9] sm:$0xff] }
 0x328   : > { %v7822_v21 = vpack.c.bf16 %v7808_v63, %v7807_v26 }
 0x329   : > { %9697 = vmatmul.mubr.msk.bf16.gmra.mrb[72].mxu0 %vm249_vm1, %v5133_v17  ;;  %10057 = vmatmul.mubr.msk.bf16.gmra.mrb[72].mxu1 %vm249_vm1, %v7665_v18 }
 0x32a   : > { %9700 = vmatprep.mubr.msk.bf16.mxu0 %vm249_vm1, %v5134_v54  ;;  %10060 = vmatprep.mubr.msk.bf16.mxu1 %vm249_vm1, %v7666_v24 }
 0x331   : > { %9701 = vmatmul.mubr.msk.bf16.gmra.mrb[76].mxu0 %vm249_vm1, %v5135_v31  ;;  %10061 = vmatmul.mubr.msk.bf16.gmra.mrb[76].mxu1 %vm249_vm1, %v7667_v29  ;;  %v5365_v31 = vld [vmem:[%s12602_s5 + $0x28] sm:$0xff] }
 0x332   : > { %10072 = vmatprep.mubr.msk.bf16.mxu1 %vm249_vm1, %v7821_v32 }
 0x339   : > { %10073 = vmatmul.mubr.msk.bf16.vlgmr.msra.gmra.mrb[64].mxu1 %vm249_vm1, %v7822_v21  ;;  %v5366_v21 = vld [vmem:[%s12602_s5 + $0x30] sm:$0xff] }
 0x33a   : > { %10076 = vmatprep.mubr.msk.bf16.mxu1 %vm249_vm1, %v7823_v22 }
 0x341   : > { %10077 = vmatmul.mubr.msk.bf16.gmra.mrb[68].mxu1 %vm249_vm1, %v7824_v44 }
 0x342   : > { %10080 = vmatprep.mubr.msk.bf16.mxu1 %vm249_vm1, %v7825_v4 }
 0x349   : > { %10081 = vmatmul.mubr.msk.bf16.gmra.mrb[72].mxu1 %vm249_vm1, %v7826_v39 }
 0x34a   : > { %10084 = vmatprep.mubr.msk.bf16.mxu1 %vm249_vm1, %v7827_v46 }
 0x351   : > { %10085 = vmatmul.mubr.msk.bf16.gmra.mrb[76].mxu1 %vm249_vm1, %v7828_v42  ;;  %v5368_v42 = vld [vmem:[%s12602_s5 + $0x40] sm:$0xff] }
 0x3ec   : > { %v9690_v48 = vpop.f32.mrb[64].mxu0 }
 0x3ed   : > { %v5314_v7 = vadd.f32 %v9690_v48, %v12456_v53  ;;  %v5227_v55 = vpop.f32.mrb[65].mxu0 }
 0x3ee   : > { %v5312_v10 = vadd.f32 %v12456_v53, %v5227_v55  ;;  %v9691_v28 = vpop.f32.mrb[66].mxu0 }
 0x3ef   : > { %v5330_v56 = vmul.f32 0.2, %v5314_v7  ;;  %v5315_v49 = vadd.f32 %v9691_v28, %v12456_v53  ;;  %v5230_v60 = vpop.f32.mrb[67].mxu0 }
 0x3f0   : > { %v5328_v51 = vmul.f32 0.2, %v5312_v10  ;;  %v5313_v58 = vadd.f32 %v12456_v53, %v5230_v60  ;;  %v5370_v60 = vld [vmem:[%s12602_s5 + $0x50] sm:$0xff] }
 0x3f1   : > { %v5331_v62 = vmul.f32 0.2, %v5315_v49  ;;  %v5346_v1 = vmax.f32 %v5314_v7, %v5330_v56 }
 0x3f2   : > { %v5344_v57 = vmax.f32 %v5312_v10, %v5328_v51  ;;  %v5329_v37 = vmul.f32 0.2, %v5313_v58 }
 0x3f3   : > { %v5347_v0 = vmax.f32 %v5315_v49, %v5331_v62  ;;  %v5378_v5 = vmul.f32 %v5362_v2, %v5346_v1  ;;  %v5369_v49 = vld [vmem:[%s12602_s5 + $0x48] sm:$0xff]  ;;  %v5371_v2 = vld [vmem:[%s12602_s5 + $0x58] sm:$0xff] }
 0x3f4   : > { %v5345_v59 = vmax.f32 %v5313_v58, %v5329_v37  ;;  %v9694_v6 = vpop.f32.mrb[68].mxu0  ;;  %v5376_v3 = vmul.f32 %v5360_v61, %v5344_v57 }
 0x3f5   : > { %v5318_v9 = vadd.f32 %v9694_v6, %v12456_v53  ;;  %v5243_v23 = vpop.f32.mrb[69].mxu0  ;;  %v5379_v15 = vmul.f32 %v5363_v47, %v5347_v0 }
 0x3f6   : > { %v5377_v12 = vmul.f32 %v5361_v36, %v5345_v59  ;;  %v5316_v52 = vadd.f32 %v12456_v53, %v5243_v23  ;;  %v9695_v11 = vpop.f32.mrb[70].mxu0 }
 0x3f7   : > { %v5319_v13 = vadd.f32 %v9695_v11, %v12456_v53  ;;  %v5246_v17 = vpop.f32.mrb[71].mxu0  ;;  %v5334_v54 = vmul.f32 0.2, %v5318_v9 }
 0x3f8   : > { %v5392_v18 = vadd.f32 %v5377_v12, %v5376_v3  ;;  %v5332_v24 = vmul.f32 0.2, %v5316_v52  ;;  %v5317_v8 = vadd.f32 %v12456_v53, %v5246_v17 }
 0x3f9   : > { %v5335_v16 = vmul.f32 0.2, %v5319_v13  ;;  %v5350_v32 = vmax.f32 %v5318_v9, %v5334_v54 }
 0x3fa   : > { %v5393_v25 = vadd.f32 %v5392_v18, %v5378_v5  ;;  %v5348_v29 = vmax.f32 %v5316_v52, %v5332_v24  ;;  %v5333_v27 = vmul.f32 0.2, %v5317_v8 }
 0x3fb   : > { %v5351_v40 = vmax.f32 %v5319_v13, %v5335_v16  ;;  %v5382_v39 = vmul.f32 %v5366_v21, %v5350_v32  ;;  %v5372_v13 = vld [vmem:[%s12602_s5 + $0x60] sm:$0xff] }
 0x3fc   : > { %v5380_v26 = vmul.f32 %v5364_v20, %v5348_v29  ;;  %v5394_v63 = vadd.f32 %v5393_v25, %v5379_v15  ;;  %v5349_v19 = vmax.f32 %v5317_v8, %v5333_v27  ;;  %v9698_v30 = vpop.f32.mrb[72].mxu0  ;;  %v5373_v8 = vld [vmem:[%s12602_s5 + $0x68] sm:$0xff]  ;;  %v5374_v27 = vld [vmem:[%s12602_s5 + $0x70] sm:$0xff] }
 0x3fd   : > { %v5322_v22 = vadd.f32 %v9698_v30, %v12456_v53  ;;  %v5259_v34 = vpop.f32.mrb[73].mxu0  ;;  %v5383_v7 = vmul.f32 %v5367_v38, %v5351_v40 }
 0x3fe   : > { %v5395_v33 = vadd.f32 %v5394_v63, %v5380_v26  ;;  %v5381_v43 = vmul.f32 %v5365_v31, %v5349_v19  ;;  %v5320_v44 = vadd.f32 %v12456_v53, %v5259_v34  ;;  %v9699_v4 = vpop.f32.mrb[74].mxu0 }
 0x3ff   : > { %v5338_v45 = vmul.f32 0.2, %v5322_v22  ;;  %v5323_v41 = vadd.f32 %v9699_v4, %v12456_v53  ;;  %v5262_v14 = vpop.f32.mrb[75].mxu0 }
 0x400   : > { %v5396_v46 = vadd.f32 %v5395_v33, %v5381_v43  ;;  %v5336_v35 = vmul.f32 0.2, %v5320_v44  ;;  %v5321_v50 = vadd.f32 %v12456_v53, %v5262_v14 }
 0x401   : > { %v5339_v48 = vmul.f32 0.2, %v5323_v41  ;;  %v5354_v56 = vmax.f32 %v5322_v22, %v5338_v45  ;;  %v5375_v22 = vld [vmem:[%s12602_s5 + $0x78] sm:$0xff] }
 0x402   : > { %v5397_v55 = vadd.f32 %v5396_v46, %v5382_v39  ;;  %v5352_v10 = vmax.f32 %v5320_v44, %v5336_v35  ;;  %v5337_v28 = vmul.f32 0.2, %v5321_v50 }
 0x403   : > { %v5355_v37 = vmax.f32 %v5323_v41, %v5339_v48  ;;  %v5386_v9 = vmul.f32 %v5370_v60, %v5354_v56 }
 0x404   : > { %v5384_v51 = vmul.f32 %v5368_v42, %v5352_v10  ;;  %v5398_v58 = vadd.f32 %v5397_v55, %v5383_v7  ;;  %v5353_v62 = vmax.f32 %v5321_v50, %v5337_v28  ;;  %v9702_v57 = vpop.f32.mrb[76].mxu0  ;;  %v8014_v50 = vld [vmem:[%s12602_s5 + $0x80] sm:$0xff]  ;;  %v8015_v42 = vld [vmem:[%s12602_s5 + $0x88] sm:$0xff]  ;;  %v8016_v7 = vld [vmem:[%s12602_s5 + $0x90] sm:$0xff] }
 0x405   : > { %v5326_v1 = vadd.f32 %v9702_v57, %v12456_v53  ;;  %v5275_v61 = vpop.f32.mrb[77].mxu0  ;;  %v5387_v5 = vmul.f32 %v5371_v2, %v5355_v37 }
 0x406   : > { %v5399_v36 = vadd.f32 %v5398_v58, %v5384_v51  ;;  %v5385_v59 = vmul.f32 %v5369_v49, %v5353_v62  ;;  %v5324_v6 = vadd.f32 %v12456_v53, %v5275_v61  ;;  %v9703_v0 = vpop.f32.mrb[78].mxu0  ;;  %v8017_v51 = vld [vmem:[%s12602_s5 + $0x98] sm:$0xff] }
 0x407   : > { %v5327_v23 = vadd.f32 %v9703_v0, %v12456_v53  ;;  %v5278_v3 = vpop.f32.mrb[79].mxu0  ;;  %v5342_v12 = vmul.f32 0.2, %v5326_v1 }
 0x408   : > { %v5400_v47 = vadd.f32 %v5399_v36, %v5385_v59  ;;  %v5340_v52 = vmul.f32 0.2, %v5324_v6  ;;  %v5325_v11 = vadd.f32 %v12456_v53, %v5278_v3 }
 0x409   : > { %v5343_v54 = vmul.f32 0.2, %v5327_v23  ;;  %v5358_v15 = vmax.f32 %v5326_v1, %v5342_v12 }
 0x40a   : > { %v5401_v17 = vadd.f32 %v5400_v47, %v5386_v9  ;;  %v5356_v18 = vmax.f32 %v5324_v6, %v5340_v52  ;;  %v5341_v24 = vmul.f32 0.2, %v5325_v11  ;;  %v8018_v9 = vld [vmem:[%s12602_s5 + $0xa0] sm:$0xff]  ;;  %v8019_v52 = vld [vmem:[%s12602_s5 + $0xa8] sm:$0xff] }
 0x40b   : > { %v5359_v63 = vmax.f32 %v5327_v23, %v5343_v54  ;;  %v5390_v43 = vmul.f32 %v5374_v27, %v5358_v15  ;;  %v8020_v54 = vld [vmem:[%s12602_s5 + $0xb0] sm:$0xff]  ;;  %v8021_v27 = vld [vmem:[%s12602_s5 + $0xb8] sm:$0xff] }
 0x40c   : > { %v5388_v20 = vmul.f32 %v5372_v13, %v5356_v18  ;;  %v5402_v25 = vadd.f32 %v5401_v17, %v5387_v5  ;;  %v5357_v29 = vmax.f32 %v5325_v11, %v5341_v24  ;;  %v10074_v16 = vpop.f32.mrb[64].mxu1 }
 0x40d   : > { %v7968_v31 = vadd.f32 %v10074_v16, %v12456_v53  ;;  %v7887_v32 = vpop.f32.mrb[65].mxu1  ;;  %v5391_v41 = vmul.f32 %v5375_v22, %v5359_v63  ;;  %v8022_v22 = vld [vmem:[%s12602_s5 + $0xc0] sm:$0xff] }
 0x40e   : > { %v5403_v26 = vadd.f32 %v5402_v25, %v5388_v20  ;;  %v5389_v19 = vmul.f32 %v5373_v8, %v5357_v29  ;;  %v7966_v30 = vadd.f32 %v12456_v53, %v7887_v32  ;;  %v10075_v21 = vpop.f32.mrb[66].mxu1 }
 0x40f   : > { %v7984_v34 = vmul.f32 0.2, %v7968_v31  ;;  %v7969_v33 = vadd.f32 %v10075_v21, %v12456_v53  ;;  %v7890_v40 = vpop.f32.mrb[67].mxu1 }
 0x410   : > { %v5404_v44 = vadd.f32 %v5403_v26, %v5389_v19  ;;  %v7982_v4 = vmul.f32 0.2, %v7966_v30  ;;  %v7967_v38 = vadd.f32 %v12456_v53, %v7890_v40 }
 0x411   : > { %v7985_v45 = vmul.f32 0.2, %v7969_v33  ;;  %v8000_v35 = vmax.f32 %v7968_v31, %v7984_v34 }
 0x412   : > { %v5405_v14 = vadd.f32 %v5404_v44, %v5390_v43  ;;  %v7998_v39 = vmax.f32 %v7966_v30, %v7982_v4  ;;  %v7983_v46 = vmul.f32 0.2, %v7967_v38 }
 0x413   : > { %v8001_v28 = vmax.f32 %v7969_v33, %v7985_v45  ;;  %v8032_v37 = vmul.f32 %v8016_v7, %v8000_v35  ;;  %v8024_v45 = vld [vmem:[%s12602_s5 + $0xd0] sm:$0xff] }
 0x414   : > { %v12532_v48 = vadd.f32 %v5405_v14, %v5391_v41  ;;  %v7999_v55 = vmax.f32 %v7967_v38, %v7983_v46  ;;  %v10078_v10 = vpop.f32.mrb[68].mxu1  ;;  %v8030_v60 = vmul.f32 %v8014_v50, %v7998_v39  ;;  %v8023_v38 = vld [vmem:[%s12602_s5 + $0xc8] sm:$0xff] }
 0x415   : > { %v7972_v56 = vadd.f32 %v10078_v10, %v12456_v53  ;;  %v7903_v49 = vpop.f32.mrb[69].mxu1  ;;  %v8033_v0 = vmul.f32 %v8017_v51, %v8001_v28 }
 0x416   : > { %v8031_v58 = vmul.f32 %v8015_v42, %v7999_v55  ;;  %v7970_v62 = vadd.f32 %v12456_v53, %v7903_v49  ;;  %v10079_v57 = vpop.f32.mrb[70].mxu1  ;;  %v8025_v55 = vld [vmem:[%s12602_s5 + $0xd8] sm:$0xff] }
 0x417   : > { %v7973_v1 = vadd.f32 %v10079_v57, %v12456_v53  ;;  %v7906_v61 = vpop.f32.mrb[71].mxu1  ;;  %v7988_v2 = vmul.f32 0.2, %v7972_v56 }
 0x418   : > { %v8046_v36 = vadd.f32 %v8031_v58, %v8030_v60  ;;  %v7986_v59 = vmul.f32 0.2, %v7970_v62  ;;  %v7971_v6 = vadd.f32 %v12456_v53, %v7906_v61  ;;  %v8026_v61 = vld [vmem:[%s12602_s5 + $0xe0] sm:$0xff] }
 0x419   : > { %v7989_v47 = vmul.f32 0.2, %v7973_v1  ;;  %v8004_v11 = vmax.f32 %v7972_v56, %v7988_v2 }
 0x41a   : > { %v8047_v23 = vadd.f32 %v8046_v36, %v8032_v37  ;;  %v8002_v3 = vmax.f32 %v7970_v62, %v7986_v59  ;;  %v7987_v12 = vmul.f32 0.2, %v7971_v6 }
 0x41b   : > { %v8005_v20 = vmax.f32 %v7973_v1, %v7989_v47  ;;  %v8036_v63 = vmul.f32 %v8020_v54, %v8004_v11 }
 0x41c   : > { %v8034_v5 = vmul.f32 %v8018_v9, %v8002_v3  ;;  %v8048_v13 = vadd.f32 %v8047_v23, %v8033_v0  ;;  %v8003_v17 = vmax.f32 %v7971_v6, %v7987_v12  ;;  %v10082_v18 = vpop.f32.mrb[72].mxu1  ;;  %v5407_v0 = vrot.slane %v12532_v48, 4  ;;  %v8027_v9 = vld [vmem:[%s12602_s5 + $0xe8] sm:$0xff] }
 0x41d   : > { %v7976_v24 = vadd.f32 %v10082_v18, %v12456_v53  ;;  %v7919_v8 = vpop.f32.mrb[73].mxu1  ;;  %v8037_v33 = vmul.f32 %v8021_v27, %v8005_v20 }
 0x41e   : > { %v8049_v15 = vadd.f32 %v8048_v13, %v8034_v5  ;;  %v8035_v25 = vmul.f32 %v8019_v52, %v8003_v17  ;;  %v7974_v29 = vadd.f32 %v12456_v53, %v7919_v8  ;;  %v10083_v16 = vpop.f32.mrb[74].mxu1  ;;  %v8029_v13 = vld [vmem:[%s12602_s5 + $0xf8] sm:$0xff]  ;;  %v5408_v17 = vadd.f32 %v5407_v0, %v12532_v48 }
 0x41f   : > { %v7992_v31 = vmul.f32 0.2, %v7976_v24  ;;  %v7977_v32 = vadd.f32 %v10083_v16, %v12456_v53  ;;  %v7922_v26 = vpop.f32.mrb[75].mxu1 }
 0x420   : > { %v8050_v19 = vadd.f32 %v8049_v15, %v8035_v25  ;;  %v7990_v30 = vmul.f32 0.2, %v7974_v29  ;;  %v7975_v21 = vadd.f32 %v12456_v53, %v7922_v26  ;;  %v5409_v15 = vrot.slane %v5408_v17, 2 }
 0x421   : > { %v7993_v34 = vmul.f32 0.2, %v7977_v32  ;;  %v8008_v4 = vmax.f32 %v7976_v24, %v7992_v31 }
 0x422   : > { %v8051_v40 = vadd.f32 %v8050_v19, %v8036_v63  ;;  %v8006_v43 = vmax.f32 %v7974_v29, %v7990_v30  ;;  %v7991_v44 = vmul.f32 0.2, %v7975_v21  ;;  %v5410_v29 = vadd.f32 %v5409_v15, %v5408_v17 }
 0x423   : > { %v8009_v35 = vmax.f32 %v7977_v32, %v7993_v34  ;;  %v8040_v49 = vmul.f32 %v8024_v45, %v8008_v4 }
 0x424   : > { %v8038_v41 = vmul.f32 %v8022_v22, %v8006_v43  ;;  %v8052_v14 = vadd.f32 %v8051_v40, %v8037_v33  ;;  %v8007_v39 = vmax.f32 %v7975_v21, %v7991_v44  ;;  %v10086_v46 = vpop.f32.mrb[76].mxu1  ;;  %v5411_v31 = vrot.slane %v5410_v29, 1 }
 0x425   : > { %v7980_v50 = vadd.f32 %v10086_v46, %v12456_v53  ;;  %v7935_v42 = vpop.f32.mrb[77].mxu1  ;;  %v8041_v1 = vmul.f32 %v8025_v55, %v8009_v35 }
 0x426   : > { %v8053_v7 = vadd.f32 %v8052_v14, %v8038_v41  ;;  %v8039_v10 = vmul.f32 %v8023_v38, %v8007_v39  ;;  %v7978_v28 = vadd.f32 %v12456_v53, %v7935_v42  ;;  %v10087_v56 = vpop.f32.mrb[78].mxu1  ;;  %v5412_v63 = vadd.f32 %v5411_v31, %v5410_v29 }
 0x427   : > { %v7981_v60 = vadd.f32 %v10087_v56, %v12456_v53  ;;  %v7938_v51 = vpop.f32.mrb[79].mxu1  ;;  %v7996_v62 = vmul.f32 0.2, %v7980_v50 }
 0x428   : > { %v8054_v58 = vadd.f32 %v8053_v7, %v8039_v10  ;;  %v7994_v57 = vmul.f32 0.2, %v7978_v28  ;;  %v7979_v37 = vadd.f32 %v12456_v53, %v7938_v51  ;;  %v8028_v53 = vld [vmem:[%s12602_s5 + $0xf0] sm:$0xff] }
 0x429   : > { %v7997_v59 = vmul.f32 0.2, %v7981_v60  ;;  %v8012_v23 = vmax.f32 %v7980_v50, %v7996_v62 }
 0x42a   : > { %v8055_v36 = vadd.f32 %v8054_v58, %v8040_v49  ;;  %v8010_v2 = vmax.f32 %v7978_v28, %v7994_v57  ;;  %v7995_v6 = vmul.f32 0.2, %v7979_v37 }
 0x42b   : > { %v8013_v11 = vmax.f32 %v7981_v60, %v7997_v59  ;;  %v8044_v18 = vmul.f32 %v8028_v53, %v8012_v23 }
 0x42c   : > { %v8042_v3 = vmul.f32 %v8026_v61, %v8010_v2  ;;  %v8056_v47 = vadd.f32 %v8055_v36, %v8041_v1  ;;  %v8011_v12 = vmax.f32 %v7979_v37, %v7995_v6 }
 0x42d   : > { %v8045_v24 = vmul.f32 %v8029_v13, %v8013_v11 }
 0x42e   : > { %v8057_v52 = vadd.f32 %v8056_v47, %v8042_v3  ;;  %v8043_v5 = vmul.f32 %v8027_v9, %v8011_v12 }
 0x430   : > { %v8058_v54 = vadd.f32 %v8057_v52, %v8043_v5 }
 0x432   : > { %v8059_v8 = vadd.f32 %v8058_v54, %v8044_v18 }
 0x434   : > { %v8060_v20 = vadd.f32 %v8059_v8, %v8045_v24 }
 0x436   : > { %v8061_v25 = vrot.slane %v8060_v20, 4 }
 0x438   : > { %v8062_v16 = vadd.f32 %v8061_v25, %v8060_v20 }
 0x43a   : > { %v8063_v27 = vrot.slane %v8062_v16, 2 }
 0x43c   : > { %v8064_v32 = vadd.f32 %v8063_v27, %v8062_v16 }
 0x43e   : > { %v8065_v26 = vrot.slane %v8064_v32, 1 }
 0x440   : > { %v8066_v19 = vadd.f32 %v8065_v26, %v8064_v32 }
 0x442   : > { %v8067_v48 = vadd.f32 %v8066_v19, %v5412_v63 }
 0x444   : > { %8068 = vst [vmem:[%s247_s9] sm:$0x1] %v8067_v48 }
 0x445 PF: > { %s16_s21 = sadd.s32 1, %s10725_s21  }
 0x446   : > { %p13_p4 = scmp.ge.s32.totalorder %s16_s21, 4  }
 0x448   :  { %15 = sbr.rel (!%p13_p4) target bundleno = 1 (0x1), region = 104 }

</bundles_post_ra>
